<compile_context>
chip_gen: v7x
topology: tpu7x:2x2x1
jax: 0.10.0
libtpu: 0.0.40
codegen_flags: <defaults>
</compile_context>

<pallas_src>
import functools

import jax
import jax.numpy as jnp
from jax.experimental import pallas as pl
from jax.experimental.pallas import tpu as pltpu

Q_MAX = 127.0
LN_EPS = 1e-5


# ------------------------------ generation-aware configuration ------------------------------

def _vmem_capacity_bytes():
    try:
        info = pltpu.get_tpu_info()
        cap = getattr(info, "vmem_capacity_bytes", None)
        if cap:
            return int(cap)
    except Exception:
        pass
    return 64 * 1024 * 1024  # conservative default (v7x per-TC VMEM)


_VMEM_CAP = _vmem_capacity_bytes()
_BIG_VMEM = _VMEM_CAP >= 96 * 1024 * 1024      # v5e / v6e (128 MiB) vs v7x (64 MiB)

VMEM_LIMIT = (96 * 1024 * 1024) if _BIG_VMEM else (40 * 1024 * 1024)
MM_TM = 512 if _BIG_VMEM else 256              # matmul tile targets
MM_TN = 1024 if _BIG_VMEM else 512
MM_TK = 512
ROWS_TM = 256
ATTN_TQ = 256 if _BIG_VMEM else 128            # attention tile targets
ATTN_TKV = 512 if _BIG_VMEM else 256
ATTN_G = 8 if _BIG_VMEM else 4                 # heads per attention block
FUSE_N_MAX = 4096 if _BIG_VMEM else 2048       # max N for single-N-block fused epilogues


def _pick_tile(dim, target, align=1):
    """Largest divisor of `dim` <= target, preferring multiples of `align`.

    Never collapses a large dim to a single giant block (unlike the old fallback)."""
    if dim <= target:
        return dim
    best_any = None
    for cand in range(min(target, dim), 0, -1):
        if dim % cand == 0:
            if cand % align == 0:
                return cand
            if best_any is None:
                best_any = cand
    return best_any if best_any is not None else dim


def _pick_divisor(n, target):
    """Largest divisor of n that is <= target."""
    best = 1
    for cand in range(1, n + 1):
        if n % cand == 0 and cand <= target:
            best = cand
    return best


# ------------- row kernel: LayerNorm and/or per-token symmetric int8 fake-quant -------------

def _rows_kernel(*refs, do_ln, do_quant):
    if do_ln:
        x_ref, g_ref, b_ref = refs[0], refs[1], refs[2]
        outs = refs[3:]
    else:
        x_ref = refs[0]
        outs = refs[1:]
    x = x_ref[...]
    if do_ln:
        mu = jnp.mean(x, axis=-1, keepdims=True)
        var = jnp.mean((x - mu) ** 2, axis=-1, keepdims=True)
        x = (x - mu) * jax.lax.rsqrt(var + LN_EPS) * g_ref[...] + b_ref[...]
    if do_quant:
        q_ref, s_ref = outs
        # abs-max over the FULL feature row (scale must not depend on matmul K-tiling)
        amax = jnp.maximum(jnp.max(jnp.abs(x), axis=-1, keepdims=True), 1e-8)
        s = amax / Q_MAX
        q = jnp.clip(jnp.round(x / s), -Q_MAX, Q_MAX)
        q_ref[...] = q.astype(jnp.bfloat16)    # integer-valued -> exact in bf16
        s_ref[...] = s
    else:
        outs[0][...] = x


def rows_op(x2d, gamma=None, beta=None, *, do_ln, do_quant):
    M, D = x2d.shape
    tm = _pick_tile(M, ROWS_TM, 8)
    grid = (M // tm,)
    in_specs = [pl.BlockSpec((tm, D), lambda i: (i, 0))]
    args = [x2d]
    if do_ln:
        in_specs += [pl.BlockSpec((1, D), lambda i: (0, 0)),
                     pl.BlockSpec((1, D), lambda i: (0, 0))]
        args += [gamma.reshape(1, D), beta.reshape(1, D)]
    if do_quant:
        out_shape = (jax.ShapeDtypeStruct((M, D), jnp.bfloat16),
                     jax.ShapeDtypeStruct((M, 1), jnp.float32))
        out_specs = (pl.BlockSpec((tm, D), lambda i: (i, 0)),
                     pl.BlockSpec((tm, 1), lambda i: (i, 0)))
    else:
        out_shape = jax.ShapeDtypeStruct((M, D), jnp.float32)
        out_specs = pl.BlockSpec((tm, D), lambda i: (i, 0))
    return pl.pallas_call(
        functools.partial(_rows_kernel, do_ln=do_ln, do_quant=do_quant),
        grid=grid, in_specs=in_specs, out_specs=out_specs, out_shape=out_shape,
        compiler_params=pltpu.CompilerParams(dimension_semantics=("parallel",),
                                             vmem_limit_bytes=VMEM_LIMIT),
    )(*args)


# -------------------- tiled quantized matmul (int8 weights, bf16 MXU path) -------------------

def _qmm_kernel(*refs, add_residual, apply_relu, epilogue):
    idx = 0
    xq_ref = refs[idx]; idx += 1
    xs_ref = refs[idx]; idx += 1
    wq_ref = refs[idx]; idx += 1
    ws_ref = refs[idx]; idx += 1
    b_ref = refs[idx]; idx += 1
    r_ref = None
    if add_residual:
        r_ref = refs[idx]; idx += 1
    g_ref = bt_ref = None
    if epilogue == "ln_quant":
        g_ref = refs[idx]; idx += 1
        bt_ref = refs[idx]; idx += 1
    outs_and_scratch = refs[idx:]
    acc_ref = outs_and_scratch[-1]
    outs = outs_and_scratch[:-1]

    k = pl.program_id(2)

    @pl.when(k == 0)
    def _():
        acc_ref[...] = jnp.zeros_like(acc_ref)

    # int8 weights are cast to bf16 in-kernel: 4x less weight DMA than f32, bf16 MXU rate
    # (portable to v7x which has no int MXU path).
    w = wq_ref[...].astype(jnp.float32).astype(jnp.bfloat16)
    acc_ref[...] += jnp.dot(xq_ref[...], w, preferred_element_type=jnp.float32)

    @pl.when(k == pl.num_programs(2) - 1)
    def _():
        # epilogue: per-token (row) scale x per-output-channel (col) scale + bias
        y = acc_ref[...] * xs_ref[...] * ws_ref[...] + b_ref[...]
        if apply_relu:
            y = jnp.maximum(y, 0.0)
        if add_residual:
            y = y + r_ref[...]
        if epilogue == "none":
            outs[0][...] = y
        elif epilogue == "quant":
            # fused per-token re-quant of the matmul output (requires full-N block)
            q_ref, s_ref = outs
            amax = jnp.maximum(jnp.max(jnp.abs(y), axis=-1, keepdims=True), 1e-8)
            s = amax / Q_MAX
            q_ref[...] = jnp.clip(jnp.round(y / s), -Q_MAX, Q_MAX).astype(jnp.bfloat16)
            s_ref[...] = s
        else:  # "ln_quant": emit y (residual stream) AND quant(LayerNorm(y)) for next matmul
            y_ref, q_ref, s_ref = outs
            y_ref[...] = y
            mu = jnp.mean(y, axis=-1, keepdims=True)
            var = jnp.mean((y - mu) ** 2, axis=-1, keepdims=True)
            z = (y - mu) * jax.lax.rsqrt(var + LN_EPS) * g_ref[...] + bt_ref[...]
            amax = jnp.maximum(jnp.max(jnp.abs(z), axis=-1, keepdims=True), 1e-8)
            s = amax / Q_MAX
            q_ref[...] = jnp.clip(jnp.round(z / s), -Q_MAX, Q_MAX).astype(jnp.bfloat16)
            s_ref[...] = s


def quant_matmul(xq, xs, wq, ws, bias, residual=None, apply_relu=False,
                 epilogue="none", ln_gamma=None, ln_beta=None):
    M, K = xq.shape
    Kw, N = wq.shape
    assert K == Kw
    tm = _pick_tile(M, MM_TM, 8)
    tk = _pick_tile(K, MM_TK, 128)
    # fused epilogues need the full output row resident (abs-max / LN over all N features)
    tn = N if epilogue != "none" else _pick_tile(N, MM_TN, 128)
    grid = (M // tm, N // tn, K // tk)

    in_specs = [
        pl.BlockSpec((tm, tk), lambda i, j, k: (i, k)),
        pl.BlockSpec((tm, 1), lambda i, j, k: (i, 0)),
        pl.BlockSpec((tk, tn), lambda i, j, k: (k, j)),
        pl.BlockSpec((1, tn), lambda i, j, k: (0, j)),
        pl.BlockSpec((1, tn), lambda i, j, k: (0, j)),
    ]
    args = [xq, xs, wq, ws, bias]
    if residual is not None:
        in_specs.append(pl.BlockSpec((tm, tn), lambda i, j, k: (i, j)))
        args.append(residual)
    if epilogue == "ln_quant":
        in_specs += [pl.BlockSpec((1, tn), lambda i, j, k: (0, j)),
                     pl.BlockSpec((1, tn), lambda i, j, k: (0, j))]
        args += [ln_gamma.reshape(1, N), ln_beta.reshape(1, N)]

    if epilogue == "none":
        out_specs = pl.BlockSpec((tm, tn), lambda i, j, k: (i, j))
        out_shape = jax.ShapeDtypeStruct((M, N), jnp.float32)
    elif epilogue == "quant":
        out_specs = (pl.BlockSpec((tm, tn), lambda i, j, k: (i, j)),
                     pl.BlockSpec((tm, 1), lambda i, j, k: (i, 0)))
        out_shape = (jax.ShapeDtypeStruct((M, N), jnp.bfloat16),
                     jax.ShapeDtypeStruct((M, 1), jnp.float32))
    else:  # ln_quant
        out_specs = (pl.BlockSpec((tm, tn), lambda i, j, k: (i, j)),
                     pl.BlockSpec((tm, tn), lambda i, j, k: (i, j)),
                     pl.BlockSpec((tm, 1), lambda i, j, k: (i, 0)))
        out_shape = (jax.ShapeDtypeStruct((M, N), jnp.float32),
                     jax.ShapeDtypeStruct((M, N), jnp.bfloat16),
                     jax.ShapeDtypeStruct((M, 1), jnp.float32))

    return pl.pallas_call(
        functools.partial(_qmm_kernel, add_residual=residual is not None,
                          apply_relu=apply_relu, epilogue=epilogue),
        grid=grid, in_specs=in_specs, out_specs=out_specs, out_shape=out_shape,
        scratch_shapes=[pltpu.VMEM((tm, tn), jnp.float32)],
        compiler_params=pltpu.CompilerParams(
            dimension_semantics=("parallel", "parallel", "arbitrary"),
            vmem_limit_bytes=VMEM_LIMIT),
    )(*args)


# ------------- QKV prep: per-token output quant + head-major layout + q scaling -------------

def _qkv_prep_kernel(x_ref, qi_ref, ki_ref, vi_ref, qs_ref, ks_ref, vs_ref, *,
                     d_model, n_heads, head_dim, scaling):
    x = x_ref[0]                                   # (tt, 3*d_model) f32

    def tok_quant(y):
        amax = jnp.maximum(jnp.max(jnp.abs(y), axis=-1, keepdims=True), 1e-8)
        s = amax / Q_MAX
        return jnp.clip(jnp.round(y / s), -Q_MAX, Q_MAX).astype(jnp.bfloat16), s

    q = x[:, 0 * d_model:1 * d_model]
    k = x[:, 1 * d_model:2 * d_model]
    v = x[:, 2 * d_model:3 * d_model]
    qi, qsc = tok_quant(q)                         # quantize_bmm_input=True on q/k/v outputs
    ki, ksc = tok_quant(k)
    vi, vsc = tok_quant(v)                         # V stays integer-valued bf16; scale separate

    # TODO(synk): pack >=2 heads per store when head_dim < 128 to keep stores lane-dense.
    for h in range(n_heads):                       # head-major layout without XLA transposes
        sl = slice(h * head_dim, (h + 1) * head_dim)
        qi_ref[0, h, :, :] = qi[:, sl]
        ki_ref[0, h, :, :] = ki[:, sl]
        vi_ref[0, h, :, :] = vi[:, sl]

    qs_ref[0] = qsc * scaling                      # fold head_dim**-0.5 into the q scale
    ks_ref[0] = ksc
    vs_ref[0] = vsc


def qkv_prep(qkv3, num_heads, scaling):
    B, T, D3 = qkv3.shape
    D = D3 // 3
    hd = D // num_heads
    tt = _pick_tile(T, ROWS_TM, 8)
    grid = (B, T // tt)
    head_spec = pl.BlockSpec((1, num_heads, tt, hd), lambda b, t: (b, 0, t, 0))
    scale_spec = pl.BlockSpec((1, tt, 1), lambda b, t: (b, t, 0))
    return pl.pallas_call(
        functools.partial(_qkv_prep_kernel, d_model=D, n_heads=num_heads,
                          head_dim=hd, scaling=scaling),
        grid=grid,
        in_specs=[pl.BlockSpec((1, tt, D3), lambda b, t: (b, t, 0))],
        out_specs=(head_spec, head_spec, head_spec, scale_spec, scale_spec, scale_spec),
        out_shape=(jax.ShapeDtypeStruct((B, num_heads, T, hd), jnp.bfloat16),
                   jax.ShapeDtypeStruct((B, num_heads, T, hd), jnp.bfloat16),
                   jax.ShapeDtypeStruct((B, num_heads, T, hd), jnp.bfloat16),
                   jax.ShapeDtypeStruct((B, T, 1), jnp.float32),
                   jax.ShapeDtypeStruct((B, T, 1), jnp.float32),
                   jax.ShapeDtypeStruct((B, T, 1), jnp.float32)),
        compiler_params=pltpu.CompilerParams(dimension_semantics=("parallel", "parallel"),
                                             vmem_limit_bytes=VMEM_LIMIT),
    )(qkv3)


# --------------------------- attention core: flash / online softmax --------------------------

def _flash_attn_kernel(q_ref, k_ref, v_ref, qs_ref, ks_ref, vs_ref, m_ref, o_ref,
                       m_sc, l_sc, acc_sc):
    kv = pl.program_id(3)

    @pl.when(kv == 0)
    def _():
        m_sc[...] = jnp.full(m_sc.shape, -jnp.inf, m_sc.dtype)
        l_sc[...] = jnp.zeros_like(l_sc)
        acc_sc[...] = jnp.zeros_like(acc_sc)

    q = q_ref[0]                  # (G, tq,  hd) bf16, integer-valued
    k = k_ref[0]                  # (G, tkv, hd) bf16, integer-valued
    v = v_ref[0]                  # (G, tkv, hd) bf16, integer-valued
    qs = qs_ref[0]                # (tq, 1)  f32, already includes head_dim**-0.5
    ks = ks_ref[0]                # (1, tkv) f32
    vs = vs_ref[0]                # (1, tkv) f32
    mask = m_ref[0, 0]            # (tq, tkv) f32 additive mask

    # QK^T on the MXU without materializing k.T (contract last dims, batch over heads)
    s = jax.lax.dot_general(q, k, (((2,), (2,)), ((0,), (0,))),
                            preferred_element_type=jnp.float32)        # (G, tq, tkv)
    s = s * (qs * ks)[None, :, :] + mask[None, :, :]

    m_prev = m_sc[...]
    m_new = jnp.maximum(m_prev, jnp.max(s, axis=-1, keepdims=True))    # (G, tq, 1)
    alpha = jnp.exp(m_prev - m_new)
    p = jnp.exp(s - m_new)                                             # (G, tq, tkv)
    l_sc[...] = alpha * l_sc[...] + jnp.sum(p, axis=-1, keepdims=True)
    m_sc[...] = m_new

    # fold the per-key v-scale into p and run PV in bf16 (half the V traffic, bf16 MXU rate);
    # only the p->bf16 cast is approximate vs the fp32 reference.
    pv = (p * vs[None, :, :]).astype(jnp.bfloat16)
    acc_sc[...] = alpha * acc_sc[...] + jax.lax.dot_general(
        pv, v, (((2,), (1,)), ((0,), (0,))), preferred_element_type=jnp.float32)

    @pl.when(kv == pl.num_programs(3) - 1)
    def _():
        # normalize AFTER PV on the (G,tq,hd) accumulator (much smaller than (G,tq,S))
        ctx = acc_sc[...] * pl.reciprocal(l_sc[...], approx=True)
        G, _, hd = ctx.shape
        # TODO(synk): pack head groups into one lane-dense store when hd < 128.
        for g in range(G):                                             # write (B, T, D) layout
            o_ref[0, :, g * hd:(g + 1) * hd] = ctx[g]


def attention(q_int, k_int, v_int, q_scale, k_scale_lane, v_scale_lane, mask):
    B, H, T, hd = q_int.shape
    S = k_int.shape[2]
    D = H * hd
    G = _pick_divisor(H, ATTN_G)          # heads per block (largest divisor of H <= target)
    tq = _pick_tile(T, ATTN_TQ, 8)
    tkv = _pick_tile(S, ATTN_TKV, 128)
    grid = (B, H // G, T // tq, S // tkv)
    return pl.pallas_call(
        _flash_attn_kernel,
        grid=grid,
        in_specs=[
            pl.BlockSpec((1, G, tq, hd), lambda b, h, t, kv: (b, h, t, 0)),
            pl.BlockSpec((1, G, tkv, hd), lambda b, h, t, kv: (b, h, kv, 0)),
            pl.BlockSpec((1, G, tkv, hd), lambda b, h, t, kv: (b, h, kv, 0)),
            pl.BlockSpec((1, tq, 1), lambda b, h, t, kv: (b, t, 0)),
            pl.BlockSpec((1, 1, tkv), lambda b, h, t, kv: (b, 0, kv)),
            pl.BlockSpec((1, 1, tkv), lambda b, h, t, kv: (b, 0, kv)),
            pl.BlockSpec((1, 1, tq, tkv), lambda b, h, t, kv: (b, 0, t, kv)),
        ],
        out_specs=pl.BlockSpec((1, tq, G * hd), lambda b, h, t, kv: (b, t, h)),
        out_shape=jax.ShapeDtypeStruct((B, T, D), jnp.float32),
        scratch_shapes=[pltpu.VMEM((G, tq, 1), jnp.float32),
                        pltpu.VMEM((G, tq, 1), jnp.float32),
                        pltpu.VMEM((G, tq, hd), jnp.float32)],
        compiler_params=pltpu.CompilerParams(
            dimension_semantics=("parallel", "parallel", "parallel", "arbitrary"),
            vmem_limit_bytes=VMEM_LIMIT),
    )(q_int, k_int, v_int, q_scale, k_scale_lane, v_scale_lane, mask)


# -------------------------------- weight fake-quantization ----------------------------------

def quantize_weight(w):
    """w: (N_out, K_in) torch layout -> (K_in, N_out) int8 values + (1, N_out) f32 scales."""
    s = jnp.maximum(jnp.max(jnp.abs(w), axis=1, keepdims=True), 1e-8) / Q_MAX   # per out-channel
    wi = jnp.clip(jnp.round(w / s), -Q_MAX, Q_MAX)
    return wi.T.astype(jnp.int8), s.reshape(1, -1).astype(jnp.float32)


# ----------------------------------- decoder layer ------------------------------------------

def quant_opt_decoder_layer(hidden_states, attention_mask, params, num_heads,
                            do_layer_norm_before=True):
    B, T, D = hidden_states.shape
    hd = D // num_heads
    scaling = hd ** -0.5
    M = B * T
    Fdim = params["w1_t"].shape[1]

    x2d = hidden_states.reshape(M, D)

    # ---------------- self-attention block ----------------
    residual = x2d
    if do_layer_norm_before:
        xq, xs = rows_op(x2d, params["ln1_g"], params["ln1_b"], do_ln=True, do_quant=True)
    else:
        xq, xs = rows_op(x2d, do_ln=False, do_quant=True)

    qkv = quant_matmul(xq, xs, params["wqkv_t"], params["wqkv_s"], params["bqkv"])   # (M, 3D)
    q_int, k_int, v_int, q_scale, k_scale, v_scale = qkv_prep(
        qkv.reshape(B, T, 3 * D), num_heads, scaling)

    # (B,T,1)->(B,1,T) is a free reshape (same row-major order): puts K/V scales on the lanes
    ctx = attention(q_int, k_int, v_int, q_scale,
                    k_scale.reshape(B, 1, T), v_scale.reshape(B, 1, T), attention_mask)

    ctx_q, ctx_s = rows_op(ctx.reshape(M, D), do_ln=False, do_quant=True)

    fuse_out = do_layer_norm_before and D <= FUSE_N_MAX
    fuse_fc1 = Fdim <= FUSE_N_MAX

    if fuse_out:
        # fused: x2 = residual + ctx@Wo ; hq = quant(LayerNorm(x2))  (no HBM round-trip of x2)
        x2, hq, hs = quant_matmul(ctx_q, ctx_s, params["wo_t"], params["wo_s"], params["bo"],
                                  residual=residual, epilogue="ln_quant",
                                  ln_gamma=params["ln2_g"], ln_beta=params["ln2_b"])
    else:
        x2 = quant_matmul(ctx_q, ctx_s, params["wo_t"], params["wo_s"], params["bo"],
                          residual=residual)        # residual fused; dropout p=0 = identity
        if not do_layer_norm_before:
            x2 = rows_op(x2, params["ln1_g"], params["ln1_b"], do_ln=True, do_quant=False)
        if do_layer_norm_before:
            hq, hs = rows_op(x2, params["ln2_g"], params["ln2_b"], do_ln=True, do_quant=True)
        else:
            hq, hs = rows_op(x2, do_ln=False, do_quant=True)

    # ---------------------- FFN block ----------------------
    residual2 = x2
    if fuse_fc1:
        # fused: relu(fc1(h)) is per-token re-quantized in the epilogue (fc2's input quant)
        hq2, hs2 = quant_matmul(hq, hs, params["w1_t"], params["w1_s"], params["b1"],
                                apply_relu=True, epilogue="quant")
    else:
        h = quant_matmul(hq, hs, params["w1_t"], params["w1_s"], params["b1"], apply_relu=True)
        hq2, hs2 = rows_op(h, do_ln=False, do_quant=True)

    out = quant_matmul(hq2, hs2, params["w2_t"], params["w2_s"], params["b2"],
                       residual=residual2)
    if not do_layer_norm_before:
        out = rows_op(out, params["ln2_g"], params["ln2_b"], do_ln=True, do_quant=False)
    return out.reshape(B, T, D)


# ------------------------------------------ main ---------------------------------------------

if __name__ == "__main__":
    B, T, D, H = 2, 8, 32, 4
    F = 4 * D  # OPT ffn_dim = 4 * embed_dim

    key = jax.random.PRNGKey(0)
    ks = jax.random.split(key, 16)

    def mk_w(k, n_out, n_in):
        return 0.02 * jax.random.normal(k, (n_out, n_in), jnp.float32)

    def mk_b(k, n):
        return 0.01 * jax.random.normal(k, (n,), jnp.float32)

    wq, wk, wv = mk_w(ks[0], D, D), mk_w(ks[1], D, D), mk_w(ks[2], D, D)
    wo, w1, w2 = mk_w(ks[3], D, D), mk_w(ks[4], F, D), mk_w(ks[5], D, F)
    bq, bk, bv = mk_b(ks[6], D), mk_b(ks[7], D), mk_b(ks[8], D)
    bo, b1, b2 = mk_b(ks[9], D), mk_b(ks[10], F), mk_b(ks[11], D)

    wqkv_t, wqkv_s = quantize_weight(jnp.concatenate([wq, wk, wv], axis=0))  # fused QKV weights
    wo_t, wo_s = quantize_weight(wo)
    w1_t, w1_s = quantize_weight(w1)
    w2_t, w2_s = quantize_weight(w2)

    params = {
        "ln1_g": jnp.ones((D,), jnp.float32), "ln1_b": jnp.zeros((D,), jnp.float32),
        "ln2_g": jnp.ones((D,), jnp.float32), "ln2_b": jnp.zeros((D,), jnp.float32),
        "wqkv_t": wqkv_t, "wqkv_s": wqkv_s,
        "bqkv": jnp.concatenate([bq, bk, bv]).reshape(1, -1),
        "wo_t": wo_t, "wo_s": wo_s, "bo": bo.reshape(1, -1),
        "w1_t": w1_t, "w1_s": w1_s, "b1": b1.reshape(1, -1),
        "w2_t": w2_t, "w2_s": w2_s, "b2": b2.reshape(1, -1),
    }

    hidden_states = jax.random.normal(ks[12], (B, T, D), jnp.float32)

    # OPT-style additive causal mask: (B, 1, T, T), 0 where allowed, large negative otherwise.
    causal = jnp.tril(jnp.ones((T, T), jnp.float32))
    attention_mask = jnp.where(causal == 1.0, 0.0, -1e9)[None, None, :, :]
    attention_mask = jnp.broadcast_to(attention_mask, (B, 1, T, T))

    fwd = jax.jit(functools.partial(quant_opt_decoder_layer, num_heads=H,
                                    do_layer_norm_before=True))
    out = fwd(hidden_states, attention_mask, params)
    jax.block_until_ready(out)

    assert out.shape == (B, T, D) and out.dtype == jnp.float32
    assert bool(jnp.all(jnp.isfinite(out)))
    print("KERNEL_OK")
</pallas_src>

<mosaic_0001>
module attributes {stable_mosaic.version = 11 : i64} {
  func.func @_qmm_kernel(%arg0: i32, %arg1: i32, %arg2: i32, %arg3: memref<16x32xbf16, #tpu.memory_space<vmem>>, %arg4: memref<16x1xf32, #tpu.memory_space<vmem>>, %arg5: memref<32x96xi8, #tpu.memory_space<vmem>>, %arg6: memref<1x96xf32, #tpu.memory_space<vmem>>, %arg7: memref<1x96xf32, #tpu.memory_space<vmem>>, %arg8: memref<16x96xf32, #tpu.memory_space<vmem>>, %arg9: memref<16x96xf32, #tpu.memory_space<vmem>>) attributes {dimension_semantics = [#tpu.dimension_semantics<parallel>, #tpu.dimension_semantics<parallel>, #tpu.dimension_semantics<arbitrary>], iteration_bounds = array<i64: 1, 1, 1>, scalar_prefetch = 0 : i64, scratch_operands = 1 : i64, tpu.core_type = #tpu.core_type<tc>, window_params = [{transform_indices = @transform_0, window_bounds = array<i64: 16, 32>}, {transform_indices = @transform_1, window_bounds = array<i64: 16, 1>}, {transform_indices = @transform_2, window_bounds = array<i64: 32, 96>}, {transform_indices = @transform_3, window_bounds = array<i64: 1, 96>}, {transform_indices = @transform_4, window_bounds = array<i64: 1, 96>}, {transform_indices = @transform_5, window_bounds = array<i64: 16, 96>}]} {
    %c0_i32 = arith.constant 0 : i32
    %0 = arith.cmpi eq, %arg2, %c0_i32 : i32
    %1 = arith.extui %0 : i1 to i32
    %c0_i32_0 = arith.constant 0 : i32
    %2 = arith.cmpi ne, %1, %c0_i32_0 : i32
    scf.if %2 {
      %cst_10 = arith.constant 0.000000e+00 : f32
      %14 = vector.broadcast %cst_10 : f32 to vector<16x96xf32>
      %c0_11 = arith.constant 0 : index
      %c0_12 = arith.constant 0 : index
      %15 = vector.load %arg9[%c0_11, %c0_12] : memref<16x96xf32, #tpu.memory_space<vmem>>, vector<16x96xf32>
      tpu.vector_store %arg9[%c0_11, %c0_12], %14 {strides = array<i32>} : memref<16x96xf32, #tpu.memory_space<vmem>>, vector<16x96xf32>,
    } else {
    }
    %c0 = arith.constant 0 : index
    %c0_1 = arith.constant 0 : index
    %3 = vector.load %arg5[%c0, %c0_1] : memref<32x96xi8, #tpu.memory_space<vmem>>, vector<32x96xi8>
    %4 = arith.sitofp %3 : vector<32x96xi8> to vector<32x96xf32>
    %5 = arith.truncf %4 : vector<32x96xf32> to vector<32x96xbf16>
    %c0_2 = arith.constant 0 : index
    %c0_3 = arith.constant 0 : index
    %6 = vector.load %arg9[%c0_2, %c0_3] : memref<16x96xf32, #tpu.memory_space<vmem>>, vector<16x96xf32>
    %c0_4 = arith.constant 0 : index
    %c0_5 = arith.constant 0 : index
    %7 = vector.load %arg3[%c0_4, %c0_5] : memref<16x32xbf16, #tpu.memory_space<vmem>>, vector<16x32xbf16>
    %cst = arith.constant dense<0.000000e+00> : vector<16x96xf32>
    %8 = tpu.matmul %7, %5, %cst {dimension_numbers = #tpu.dot_dimension_numbers<[1], [0], [0], [1], [0, 0, 1, 1], [], []>} : vector<16x32xbf16>, vector<32x96xbf16>, vector<16x96xf32> -> vector<16x96xf32>
    %9 = arith.addf %6, %8 : vector<16x96xf32>
    %c0_6 = arith.constant 0 : index
    %c0_7 = arith.constant 0 : index
    %10 = vector.load %arg9[%c0_6, %c0_7] : memref<16x96xf32, #tpu.memory_space<vmem>>, vector<16x96xf32>
    tpu.vector_store %arg9[%c0_6, %c0_7], %9 {strides = array<i32>} : memref<16x96xf32, #tpu.memory_space<vmem>>, vector<16x96xf32>,
    %c0_i32_8 = arith.constant 0 : i32
    %11 = arith.cmpi eq, %arg2, %c0_i32_8 : i32
    %12 = arith.extui %11 : i1 to i32
    %c0_i32_9 = arith.constant 0 : i32
    %13 = arith.cmpi ne, %12, %c0_i32_9 : i32
    scf.if %13 {
      %c0_10 = arith.constant 0 : index
      %c0_11 = arith.constant 0 : index
      %14 = vector.load %arg9[%c0_10, %c0_11] : memref<16x96xf32, #tpu.memory_space<vmem>>, vector<16x96xf32>
      %c0_12 = arith.constant 0 : index
      %c0_13 = arith.constant 0 : index
      %15 = vector.load %arg4[%c0_12, %c0_13] : memref<16x1xf32, #tpu.memory_space<vmem>>, vector<16x1xf32>
      %16 = vector.broadcast %15 : vector<16x1xf32> to vector<16x96xf32>
      %17 = arith.mulf %14, %16 : vector<16x96xf32>
      %c0_14 = arith.constant 0 : index
      %c0_15 = arith.constant 0 : index
      %18 = vector.load %arg6[%c0_14, %c0_15] : memref<1x96xf32, #tpu.memory_space<vmem>>, vector<1x96xf32>
      %19 = vector.broadcast %18 : vector<1x96xf32> to vector<16x96xf32>
      %20 = arith.mulf %17, %19 : vector<16x96xf32>
      %c0_16 = arith.constant 0 : index
      %c0_17 = arith.constant 0 : index
      %21 = vector.load %arg7[%c0_16, %c0_17] : memref<1x96xf32, #tpu.memory_space<vmem>>, vector<1x96xf32>
      %22 = vector.broadcast %21 : vector<1x96xf32> to vector<16x96xf32>
      %23 = arith.addf %20, %22 : vector<16x96xf32>
      %c0_18 = arith.constant 0 : index
      %c0_19 = arith.constant 0 : index
      %24 = vector.load %arg8[%c0_18, %c0_19] : memref<16x96xf32, #tpu.memory_space<vmem>>, vector<16x96xf32>
      tpu.vector_store %arg8[%c0_18, %c0_19], %23 {strides = array<i32>} : memref<16x96xf32, #tpu.memory_space<vmem>>, vector<16x96xf32>,
    } else {
    }
    return
  }
  func.func @transform_0(%arg0: i32, %arg1: i32, %arg2: i32) -> (i32, i32) {
    %c0_i32 = arith.constant 0 : i32
    return %arg0, %arg2 : i32, i32
  }
  func.func @transform_1(%arg0: i32, %arg1: i32, %arg2: i32) -> (i32, i32) {
    %c0_i32 = arith.constant 0 : i32
    %c0_i32_0 = arith.constant 0 : i32
    return %arg0, %c0_i32 : i32, i32
  }
  func.func @transform_2(%arg0: i32, %arg1: i32, %arg2: i32) -> (i32, i32) {
    %c0_i32 = arith.constant 0 : i32
    return %arg2, %arg1 : i32, i32
  }
  func.func @transform_3(%arg0: i32, %arg1: i32, %arg2: i32) -> (i32, i32) {
    %c0_i32 = arith.constant 0 : i32
    %c0_i32_0 = arith.constant 0 : i32
    return %c0_i32, %arg1 : i32, i32
  }
  func.func @transform_4(%arg0: i32, %arg1: i32, %arg2: i32) -> (i32, i32) {
    %c0_i32 = arith.constant 0 : i32
    %c0_i32_0 = arith.constant 0 : i32
    return %c0_i32, %arg1 : i32, i32
  }
  func.func @transform_5(%arg0: i32, %arg1: i32, %arg2: i32) -> (i32, i32) {
    %c0_i32 = arith.constant 0 : i32
    return %arg0, %arg1 : i32, i32
  }
}

module attributes {stable_mosaic.version = 11 : i64} {
  func.func @_rows_kernel(%arg0: i32, %arg1: memref<16x32xf32, #tpu.memory_space<vmem>>, %arg2: memref<1x32xf32, #tpu.memory_space<vmem>>, %arg3: memref<1x32xf32, #tpu.memory_space<vmem>>, %arg4: memref<16x32xbf16, #tpu.memory_space<vmem>>, %arg5: memref<16x1xf32, #tpu.memory_space<vmem>>) attributes {dimension_semantics = [#tpu.dimension_semantics<parallel>], iteration_bounds = array<i64: 1>, scalar_prefetch = 0 : i64, scratch_operands = 0 : i64, tpu.core_type = #tpu.core_type<tc>, window_params = [{transform_indices = @transform_0, window_bounds = array<i64: 16, 32>}, {pipeline_mode = #tpu.pipeline_mode<synchronous>, transform_indices = @transform_1, window_bounds = array<i64: 1, 32>}, {pipeline_mode = #tpu.pipeline_mode<synchronous>, transform_indices = @transform_2, window_bounds = array<i64: 1, 32>}, {transform_indices = @transform_3, window_bounds = array<i64: 16, 32>}, {transform_indices = @transform_4, window_bounds = array<i64: 16, 1>}]} {
    %c0 = arith.constant 0 : index
    %c0_0 = arith.constant 0 : index
    %0 = vector.load %arg1[%c0, %c0_0] : memref<16x32xf32, #tpu.memory_space<vmem>>, vector<16x32xf32>
    %cst = arith.constant dense<0.000000e+00> : vector<16xf32>
    %1 = vector.multi_reduction <add>, %0, %cst [1] : vector<16x32xf32> to vector<16xf32>
    %2 = vector.shape_cast %1 : vector<16xf32> to vector<16x1xf32>
    %cst_1 = arith.constant 3.200000e+01 : f32
    %3 = vector.broadcast %cst_1 : f32 to vector<16x1xf32>
    %4 = arith.divf %2, %3 : vector<16x1xf32>
    %5 = vector.broadcast %4 : vector<16x1xf32> to vector<16x32xf32>
    %6 = arith.subf %0, %5 : vector<16x32xf32>
    %7 = arith.mulf %6, %6 : vector<16x32xf32>
    %cst_2 = arith.constant dense<0.000000e+00> : vector<16xf32>
    %8 = vector.multi_reduction <add>, %7, %cst_2 [1] : vector<16x32xf32> to vector<16xf32>
    %9 = vector.shape_cast %8 : vector<16xf32> to vector<16x1xf32>
    %cst_3 = arith.constant 3.200000e+01 : f32
    %10 = vector.broadcast %cst_3 : f32 to vector<16x1xf32>
    %11 = arith.divf %9, %10 : vector<16x1xf32>
    %12 = vector.broadcast %4 : vector<16x1xf32> to vector<16x32xf32>
    %13 = arith.subf %0, %12 : vector<16x32xf32>
    %cst_4 = arith.constant 9.99999974E-6 : f32
    %14 = vector.broadcast %cst_4 : f32 to vector<16x1xf32>
    %15 = arith.addf %11, %14 : vector<16x1xf32>
    %16 = math.rsqrt %15 : vector<16x1xf32>
    %17 = vector.broadcast %16 : vector<16x1xf32> to vector<16x32xf32>
    %18 = arith.mulf %13, %17 : vector<16x32xf32>
    %c0_5 = arith.constant 0 : index
    %c0_6 = arith.constant 0 : index
    %19 = vector.load %arg2[%c0_5, %c0_6] : memref<1x32xf32, #tpu.memory_space<vmem>>, vector<1x32xf32>
    %20 = vector.broadcast %19 : vector<1x32xf32> to vector<16x32xf32>
    %21 = arith.mulf %18, %20 : vector<16x32xf32>
    %c0_7 = arith.constant 0 : index
    %c0_8 = arith.constant 0 : index
    %22 = vector.load %arg3[%c0_7, %c0_8] : memref<1x32xf32, #tpu.memory_space<vmem>>, vector<1x32xf32>
    %23 = vector.broadcast %22 : vector<1x32xf32> to vector<16x32xf32>
    %24 = arith.addf %21, %23 : vector<16x32xf32>
    %25 = math.absf %24 : vector<16x32xf32>
    %cst_9 = arith.constant dense<0xFF800000> : vector<16xf32>
    %26 = vector.multi_reduction <maximumf>, %25, %cst_9 [1] : vector<16x32xf32> to vector<16xf32>
    %27 = vector.shape_cast %26 : vector<16xf32> to vector<16x1xf32>
    %cst_10 = arith.constant 9.99999993E-9 : f32
    %28 = vector.broadcast %cst_10 : f32 to vector<16x1xf32>
    %29 = arith.maximumf %27, %28 : vector<16x1xf32>
    %cst_11 = arith.constant 1.270000e+02 : f32
    %30 = vector.broadcast %cst_11 : f32 to vector<16x1xf32>
    %31 = arith.divf %29, %30 : vector<16x1xf32>
    %32 = vector.broadcast %31 : vector<16x1xf32> to vector<16x32xf32>
    %33 = arith.divf %24, %32 : vector<16x32xf32>
    %34 = math.roundeven %33 : vector<16x32xf32>
    %cst_12 = arith.constant -1.270000e+02 : f32
    %cst_13 = arith.constant 1.270000e+02 : f32
    %35 = vector.broadcast %cst_12 : f32 to vector<16x32xf32>
    %36 = arith.maximumf %35, %34 : vector<16x32xf32>
    %37 = vector.broadcast %cst_13 : f32 to vector<16x32xf32>
    %38 = arith.minimumf %37, %36 : vector<16x32xf32>
    %39 = arith.truncf %38 : vector<16x32xf32> to vector<16x32xbf16>
    %c0_14 = arith.constant 0 : index
    %c0_15 = arith.constant 0 : index
    %40 = vector.load %arg4[%c0_14, %c0_15] : memref<16x32xbf16, #tpu.memory_space<vmem>>, vector<16x32xbf16>
    tpu.vector_store %arg4[%c0_14, %c0_15], %39 {strides = array<i32>} : memref<16x32xbf16, #tpu.memory_space<vmem>>, vector<16x32xbf16>,
    %c0_16 = arith.constant 0 : index
    %c0_17 = arith.constant 0 : index
    %41 = vector.load %arg5[%c0_16, %c0_17] : memref<16x1xf32, #tpu.memory_space<vmem>>, vector<16x1xf32>
    tpu.vector_store %arg5[%c0_16, %c0_17], %31 {strides = array<i32>} : memref<16x1xf32, #tpu.memory_space<vmem>>, vector<16x1xf32>,
    return
  }
  func.func @transform_0(%arg0: i32) -> (i32, i32) {
    %c0_i32 = arith.constant 0 : i32
    %c0_i32_0 = arith.constant 0 : i32
    return %arg0, %c0_i32 : i32, i32
  }
  func.func @transform_1(%arg0: i32) -> (i32, i32) {
    %c0_i32 = arith.constant 0 : i32
    %c0_i32_0 = arith.constant 0 : i32
    %c0_i32_1 = arith.constant 0 : i32
    return %c0_i32, %c0_i32_0 : i32, i32
  }
  func.func @transform_2(%arg0: i32) -> (i32, i32) {
    %c0_i32 = arith.constant 0 : i32
    %c0_i32_0 = arith.constant 0 : i32
    %c0_i32_1 = arith.constant 0 : i32
    return %c0_i32, %c0_i32_0 : i32, i32
  }
  func.func @transform_3(%arg0: i32) -> (i32, i32) {
    %c0_i32 = arith.constant 0 : i32
    %c0_i32_0 = arith.constant 0 : i32
    return %arg0, %c0_i32 : i32, i32
  }
  func.func @transform_4(%arg0: i32) -> (i32, i32) {
    %c0_i32 = arith.constant 0 : i32
    %c0_i32_0 = arith.constant 0 : i32
    return %arg0, %c0_i32 : i32, i32
  }
}

module attributes {stable_mosaic.version = 11 : i64} {
  func.func @_qkv_prep_kernel(%arg0: i32, %arg1: i32, %arg2: memref<1x8x96xf32, #tpu.memory_space<vmem>>, %arg3: memref<1x4x8x8xbf16, #tpu.memory_space<vmem>>, %arg4: memref<1x4x8x8xbf16, #tpu.memory_space<vmem>>, %arg5: memref<1x4x8x8xbf16, #tpu.memory_space<vmem>>, %arg6: memref<1x8x1xf32, #tpu.memory_space<vmem>>, %arg7: memref<1x8x1xf32, #tpu.memory_space<vmem>>, %arg8: memref<1x8x1xf32, #tpu.memory_space<vmem>>) attributes {dimension_semantics = [#tpu.dimension_semantics<parallel>, #tpu.dimension_semantics<parallel>], iteration_bounds = array<i64: 2, 1>, scalar_prefetch = 0 : i64, scratch_operands = 0 : i64, tpu.core_type = #tpu.core_type<tc>, window_params = [{transform_indices = @transform_0, window_bounds = array<i64: 1, 8, 96>}, {transform_indices = @transform_1, window_bounds = array<i64: 1, 4, 8, 8>}, {transform_indices = @transform_2, window_bounds = array<i64: 1, 4, 8, 8>}, {transform_indices = @transform_3, window_bounds = array<i64: 1, 4, 8, 8>}, {transform_indices = @transform_4, window_bounds = array<i64: 1, 8, 1>}, {transform_indices = @transform_5, window_bounds = array<i64: 1, 8, 1>}, {transform_indices = @transform_6, window_bounds = array<i64: 1, 8, 1>}]} {
    %c0 = arith.constant 0 : index
    %c0_0 = arith.constant 0 : index
    %c0_1 = arith.constant 0 : index
    %0 = vector.load %arg2[%c0, %c0_0, %c0_1] : memref<1x8x96xf32, #tpu.memory_space<vmem>>, vector<1x8x96xf32>
    %1 = vector.shape_cast %0 : vector<1x8x96xf32> to vector<8x96xf32>
    %2 = vector.extract_strided_slice %1 {offsets = [0, 0], sizes = [8, 32], strides = [1, 1]} : vector<8x96xf32> to vector<8x32xf32>
    %3 = vector.extract_strided_slice %1 {offsets = [0, 32], sizes = [8, 32], strides = [1, 1]} : vector<8x96xf32> to vector<8x32xf32>
    %4 = vector.extract_strided_slice %1 {offsets = [0, 64], sizes = [8, 32], strides = [1, 1]} : vector<8x96xf32> to vector<8x32xf32>
    %5 = math.absf %2 : vector<8x32xf32>
    %cst = arith.constant dense<0xFF800000> : vector<8xf32>
    %6 = vector.multi_reduction <maximumf>, %5, %cst [1] : vector<8x32xf32> to vector<8xf32>
    %7 = vector.shape_cast %6 : vector<8xf32> to vector<8x1xf32>
    %cst_2 = arith.constant 9.99999993E-9 : f32
    %8 = vector.broadcast %cst_2 : f32 to vector<8x1xf32>
    %9 = arith.maximumf %7, %8 : vector<8x1xf32>
    %cst_3 = arith.constant 1.270000e+02 : f32
    %10 = vector.broadcast %cst_3 : f32 to vector<8x1xf32>
    %11 = arith.divf %9, %10 : vector<8x1xf32>
    %12 = vector.broadcast %11 : vector<8x1xf32> to vector<8x32xf32>
    %13 = arith.divf %2, %12 : vector<8x32xf32>
    %14 = math.roundeven %13 : vector<8x32xf32>
    %cst_4 = arith.constant -1.270000e+02 : f32
    %cst_5 = arith.constant 1.270000e+02 : f32
    %15 = vector.broadcast %cst_4 : f32 to vector<8x32xf32>
    %16 = arith.maximumf %15, %14 : vector<8x32xf32>
    %17 = vector.broadcast %cst_5 : f32 to vector<8x32xf32>
    %18 = arith.minimumf %17, %16 : vector<8x32xf32>
    %19 = arith.truncf %18 : vector<8x32xf32> to vector<8x32xbf16>
    %20 = math.absf %3 : vector<8x32xf32>
    %cst_6 = arith.constant dense<0xFF800000> : vector<8xf32>
    %21 = vector.multi_reduction <maximumf>, %20, %cst_6 [1] : vector<8x32xf32> to vector<8xf32>
    %22 = vector.shape_cast %21 : vector<8xf32> to vector<8x1xf32>
    %cst_7 = arith.constant 9.99999993E-9 : f32
    %23 = vector.broadcast %cst_7 : f32 to vector<8x1xf32>
    %24 = arith.maximumf %22, %23 : vector<8x1xf32>
    %cst_8 = arith.constant 1.270000e+02 : f32
    %25 = vector.broadcast %cst_8 : f32 to vector<8x1xf32>
    %26 = arith.divf %24, %25 : vector<8x1xf32>
    %27 = vector.broadcast %26 : vector<8x1xf32> to vector<8x32xf32>
    %28 = arith.divf %3, %27 : vector<8x32xf32>
    %29 = math.roundeven %28 : vector<8x32xf32>
    %cst_9 = arith.constant -1.270000e+02 : f32
    %cst_10 = arith.constant 1.270000e+02 : f32
    %30 = vector.broadcast %cst_9 : f32 to vector<8x32xf32>
    %31 = arith.maximumf %30, %29 : vector<8x32xf32>
    %32 = vector.broadcast %cst_10 : f32 to vector<8x32xf32>
    %33 = arith.minimumf %32, %31 : vector<8x32xf32>
    %34 = arith.truncf %33 : vector<8x32xf32> to vector<8x32xbf16>
    %35 = math.absf %4 : vector<8x32xf32>
    %cst_11 = arith.constant dense<0xFF800000> : vector<8xf32>
    %36 = vector.multi_reduction <maximumf>, %35, %cst_11 [1] : vector<8x32xf32> to vector<8xf32>
    %37 = vector.shape_cast %36 : vector<8xf32> to vector<8x1xf32>
    %cst_12 = arith.constant 9.99999993E-9 : f32
    %38 = vector.broadcast %cst_12 : f32 to vector<8x1xf32>
    %39 = arith.maximumf %37, %38 : vector<8x1xf32>
    %cst_13 = arith.constant 1.270000e+02 : f32
    %40 = vector.broadcast %cst_13 : f32 to vector<8x1xf32>
    %41 = arith.divf %39, %40 : vector<8x1xf32>
    %42 = vector.broadcast %41 : vector<8x1xf32> to vector<8x32xf32>
    %43 = arith.divf %4, %42 : vector<8x32xf32>
    %44 = math.roundeven %43 : vector<8x32xf32>
    %cst_14 = arith.constant -1.270000e+02 : f32
    %cst_15 = arith.constant 1.270000e+02 : f32
    %45 = vector.broadcast %cst_14 : f32 to vector<8x32xf32>
    %46 = arith.maximumf %45, %44 : vector<8x32xf32>
    %47 = vector.broadcast %cst_15 : f32 to vector<8x32xf32>
    %48 = arith.minimumf %47, %46 : vector<8x32xf32>
    %49 = arith.truncf %48 : vector<8x32xf32> to vector<8x32xbf16>
    %50 = vector.extract_strided_slice %19 {offsets = [0, 0], sizes = [8, 8], strides = [1, 1]} : vector<8x32xbf16> to vector<8x8xbf16>
    %c0_16 = arith.constant 0 : index
    %c0_17 = arith.constant 0 : index
    %c0_18 = arith.constant 0 : index
    %c0_19 = arith.constant 0 : index
    %51 = vector.load %arg3[%c0_16, %c0_17, %c0_18, %c0_19] : memref<1x4x8x8xbf16, #tpu.memory_space<vmem>>, vector<1x1x8x8xbf16>
    %52 = vector.shape_cast %51 : vector<1x1x8x8xbf16> to vector<8x8xbf16>
    %53 = vector.shape_cast %50 : vector<8x8xbf16> to vector<1x1x8x8xbf16>
    tpu.vector_store %arg3[%c0_16, %c0_17, %c0_18, %c0_19], %53 {strides = array<i32>} : memref<1x4x8x8xbf16, #tpu.memory_space<vmem>>, vector<1x1x8x8xbf16>,
    %54 = vector.extract_strided_slice %34 {offsets = [0, 0], sizes = [8, 8], strides = [1, 1]} : vector<8x32xbf16> to vector<8x8xbf16>
    %c0_20 = arith.constant 0 : index
    %c0_21 = arith.constant 0 : index
    %c0_22 = arith.constant 0 : index
    %c0_23 = arith.constant 0 : index
    %55 = vector.load %arg4[%c0_20, %c0_21, %c0_22, %c0_23] : memref<1x4x8x8xbf16, #tpu.memory_space<vmem>>, vector<1x1x8x8xbf16>
    %56 = vector.shape_cast %55 : vector<1x1x8x8xbf16> to vector<8x8xbf16>
    %57 = vector.shape_cast %54 : vector<8x8xbf16> to vector<1x1x8x8xbf16>
    tpu.vector_store %arg4[%c0_20, %c0_21, %c0_22, %c0_23], %57 {strides = array<i32>} : memref<1x4x8x8xbf16, #tpu.memory_space<vmem>>, vector<1x1x8x8xbf16>,
    %58 = vector.extract_strided_slice %49 {offsets = [0, 0], sizes = [8, 8], strides = [1, 1]} : vector<8x32xbf16> to vector<8x8xbf16>
    %c0_24 = arith.constant 0 : index
    %c0_25 = arith.constant 0 : index
    %c0_26 = arith.constant 0 : index
    %c0_27 = arith.constant 0 : index
    %59 = vector.load %arg5[%c0_24, %c0_25, %c0_26, %c0_27] : memref<1x4x8x8xbf16, #tpu.memory_space<vmem>>, vector<1x1x8x8xbf16>
    %60 = vector.shape_cast %59 : vector<1x1x8x8xbf16> to vector<8x8xbf16>
    %61 = vector.shape_cast %58 : vector<8x8xbf16> to vector<1x1x8x8xbf16>
    tpu.vector_store %arg5[%c0_24, %c0_25, %c0_26, %c0_27], %61 {strides = array<i32>} : memref<1x4x8x8xbf16, #tpu.memory_space<vmem>>, vector<1x1x8x8xbf16>,
    %62 = vector.extract_strided_slice %19 {offsets = [0, 8], sizes = [8, 8], strides = [1, 1]} : vector<8x32xbf16> to vector<8x8xbf16>
    %c0_28 = arith.constant 0 : index
    %c1 = arith.constant 1 : index
    %c0_29 = arith.constant 0 : index
    %c0_30 = arith.constant 0 : index
    %63 = vector.load %arg3[%c0_28, %c1, %c0_29, %c0_30] : memref<1x4x8x8xbf16, #tpu.memory_space<vmem>>, vector<1x1x8x8xbf16>
    %64 = vector.shape_cast %63 : vector<1x1x8x8xbf16> to vector<8x8xbf16>
    %65 = vector.shape_cast %62 : vector<8x8xbf16> to vector<1x1x8x8xbf16>
    tpu.vector_store %arg3[%c0_28, %c1, %c0_29, %c0_30], %65 {strides = array<i32>} : memref<1x4x8x8xbf16, #tpu.memory_space<vmem>>, vector<1x1x8x8xbf16>,
    %66 = vector.extract_strided_slice %34 {offsets = [0, 8], sizes = [8, 8], strides = [1, 1]} : vector<8x32xbf16> to vector<8x8xbf16>
    %c0_31 = arith.constant 0 : index
    %c1_32 = arith.constant 1 : index
    %c0_33 = arith.constant 0 : index
    %c0_34 = arith.constant 0 : index
    %67 = vector.load %arg4[%c0_31, %c1_32, %c0_33, %c0_34] : memref<1x4x8x8xbf16, #tpu.memory_space<vmem>>, vector<1x1x8x8xbf16>
    %68 = vector.shape_cast %67 : vector<1x1x8x8xbf16> to vector<8x8xbf16>
    %69 = vector.shape_cast %66 : vector<8x8xbf16> to vector<1x1x8x8xbf16>
    tpu.vector_store %arg4[%c0_31, %c1_32, %c0_33, %c0_34], %69 {strides = array<i32>} : memref<1x4x8x8xbf16, #tpu.memory_space<vmem>>, vector<1x1x8x8xbf16>,
    %70 = vector.extract_strided_slice %49 {offsets = [0, 8], sizes = [8, 8], strides = [1, 1]} : vector<8x32xbf16> to vector<8x8xbf16>
    %c0_35 = arith.constant 0 : index
    %c1_36 = arith.constant 1 : index
    %c0_37 = arith.constant 0 : index
    %c0_38 = arith.constant 0 : index
    %71 = vector.load %arg5[%c0_35, %c1_36, %c0_37, %c0_38] : memref<1x4x8x8xbf16, #tpu.memory_space<vmem>>, vector<1x1x8x8xbf16>
    %72 = vector.shape_cast %71 : vector<1x1x8x8xbf16> to vector<8x8xbf16>
    %73 = vector.shape_cast %70 : vector<8x8xbf16> to vector<1x1x8x8xbf16>
    tpu.vector_store %arg5[%c0_35, %c1_36, %c0_37, %c0_38], %73 {strides = array<i32>} : memref<1x4x8x8xbf16, #tpu.memory_space<vmem>>, vector<1x1x8x8xbf16>,
    %74 = vector.extract_strided_slice %19 {offsets = [0, 16], sizes = [8, 8], strides = [1, 1]} : vector<8x32xbf16> to vector<8x8xbf16>
    %c0_39 = arith.constant 0 : index
    %c2 = arith.constant 2 : index
    %c0_40 = arith.constant 0 : index
    %c0_41 = arith.constant 0 : index
    %75 = vector.load %arg3[%c0_39, %c2, %c0_40, %c0_41] : memref<1x4x8x8xbf16, #tpu.memory_space<vmem>>, vector<1x1x8x8xbf16>
    %76 = vector.shape_cast %75 : vector<1x1x8x8xbf16> to vector<8x8xbf16>
    %77 = vector.shape_cast %74 : vector<8x8xbf16> to vector<1x1x8x8xbf16>
    tpu.vector_store %arg3[%c0_39, %c2, %c0_40, %c0_41], %77 {strides = array<i32>} : memref<1x4x8x8xbf16, #tpu.memory_space<vmem>>, vector<1x1x8x8xbf16>,
    %78 = vector.extract_strided_slice %34 {offsets = [0, 16], sizes = [8, 8], strides = [1, 1]} : vector<8x32xbf16> to vector<8x8xbf16>
    %c0_42 = arith.constant 0 : index
    %c2_43 = arith.constant 2 : index
    %c0_44 = arith.constant 0 : index
    %c0_45 = arith.constant 0 : index
    %79 = vector.load %arg4[%c0_42, %c2_43, %c0_44, %c0_45] : memref<1x4x8x8xbf16, #tpu.memory_space<vmem>>, vector<1x1x8x8xbf16>
    %80 = vector.shape_cast %79 : vector<1x1x8x8xbf16> to vector<8x8xbf16>
    %81 = vector.shape_cast %78 : vector<8x8xbf16> to vector<1x1x8x8xbf16>
    tpu.vector_store %arg4[%c0_42, %c2_43, %c0_44, %c0_45], %81 {strides = array<i32>} : memref<1x4x8x8xbf16, #tpu.memory_space<vmem>>, vector<1x1x8x8xbf16>,
    %82 = vector.extract_strided_slice %49 {offsets = [0, 16], sizes = [8, 8], strides = [1, 1]} : vector<8x32xbf16> to vector<8x8xbf16>
    %c0_46 = arith.constant 0 : index
    %c2_47 = arith.constant 2 : index
    %c0_48 = arith.constant 0 : index
    %c0_49 = arith.constant 0 : index
    %83 = vector.load %arg5[%c0_46, %c2_47, %c0_48, %c0_49] : memref<1x4x8x8xbf16, #tpu.memory_space<vmem>>, vector<1x1x8x8xbf16>
    %84 = vector.shape_cast %83 : vector<1x1x8x8xbf16> to vector<8x8xbf16>
    %85 = vector.shape_cast %82 : vector<8x8xbf16> to vector<1x1x8x8xbf16>
    tpu.vector_store %arg5[%c0_46, %c2_47, %c0_48, %c0_49], %85 {strides = array<i32>} : memref<1x4x8x8xbf16, #tpu.memory_space<vmem>>, vector<1x1x8x8xbf16>,
    %86 = vector.extract_strided_slice %19 {offsets = [0, 24], sizes = [8, 8], strides = [1, 1]} : vector<8x32xbf16> to vector<8x8xbf16>
    %c0_50 = arith.constant 0 : index
    %c3 = arith.constant 3 : index
    %c0_51 = arith.constant 0 : index
    %c0_52 = arith.constant 0 : index
    %87 = vector.load %arg3[%c0_50, %c3, %c0_51, %c0_52] : memref<1x4x8x8xbf16, #tpu.memory_space<vmem>>, vector<1x1x8x8xbf16>
    %88 = vector.shape_cast %87 : vector<1x1x8x8xbf16> to vector<8x8xbf16>
    %89 = vector.shape_cast %86 : vector<8x8xbf16> to vector<1x1x8x8xbf16>
    tpu.vector_store %arg3[%c0_50, %c3, %c0_51, %c0_52], %89 {strides = array<i32>} : memref<1x4x8x8xbf16, #tpu.memory_space<vmem>>, vector<1x1x8x8xbf16>,
    %90 = vector.extract_strided_slice %34 {offsets = [0, 24], sizes = [8, 8], strides = [1, 1]} : vector<8x32xbf16> to vector<8x8xbf16>
    %c0_53 = arith.constant 0 : index
    %c3_54 = arith.constant 3 : index
    %c0_55 = arith.constant 0 : index
    %c0_56 = arith.constant 0 : index
    %91 = vector.load %arg4[%c0_53, %c3_54, %c0_55, %c0_56] : memref<1x4x8x8xbf16, #tpu.memory_space<vmem>>, vector<1x1x8x8xbf16>
    %92 = vector.shape_cast %91 : vector<1x1x8x8xbf16> to vector<8x8xbf16>
    %93 = vector.shape_cast %90 : vector<8x8xbf16> to vector<1x1x8x8xbf16>
    tpu.vector_store %arg4[%c0_53, %c3_54, %c0_55, %c0_56], %93 {strides = array<i32>} : memref<1x4x8x8xbf16, #tpu.memory_space<vmem>>, vector<1x1x8x8xbf16>,
    %94 = vector.extract_strided_slice %49 {offsets = [0, 24], sizes = [8, 8], strides = [1, 1]} : vector<8x32xbf16> to vector<8x8xbf16>
    %c0_57 = arith.constant 0 : index
    %c3_58 = arith.constant 3 : index
    %c0_59 = arith.constant 0 : index
    %c0_60 = arith.constant 0 : index
    %95 = vector.load %arg5[%c0_57, %c3_58, %c0_59, %c0_60] : memref<1x4x8x8xbf16, #tpu.memory_space<vmem>>, vector<1x1x8x8xbf16>
    %96 = vector.shape_cast %95 : vector<1x1x8x8xbf16> to vector<8x8xbf16>
    %97 = vector.shape_cast %94 : vector<8x8xbf16> to vector<1x1x8x8xbf16>
    tpu.vector_store %arg5[%c0_57, %c3_58, %c0_59, %c0_60], %97 {strides = array<i32>} : memref<1x4x8x8xbf16, #tpu.memory_space<vmem>>, vector<1x1x8x8xbf16>,
    %cst_61 = arith.constant 0.353553385 : f32
    %98 = vector.broadcast %cst_61 : f32 to vector<8x1xf32>
    %99 = arith.mulf %11, %98 : vector<8x1xf32>
    %c0_62 = arith.constant 0 : index
    %c0_63 = arith.constant 0 : index
    %c0_64 = arith.constant 0 : index
    %100 = vector.load %arg6[%c0_62, %c0_63, %c0_64] : memref<1x8x1xf32, #tpu.memory_space<vmem>>, vector<1x8x1xf32>
    %101 = vector.shape_cast %100 : vector<1x8x1xf32> to vector<8x1xf32>
    %102 = vector.shape_cast %99 : vector<8x1xf32> to vector<1x8x1xf32>
    tpu.vector_store %arg6[%c0_62, %c0_63, %c0_64], %102 {strides = array<i32>} : memref<1x8x1xf32, #tpu.memory_space<vmem>>, vector<1x8x1xf32>,
    %c0_65 = arith.constant 0 : index
    %c0_66 = arith.constant 0 : index
    %c0_67 = arith.constant 0 : index
    %103 = vector.load %arg7[%c0_65, %c0_66, %c0_67] : memref<1x8x1xf32, #tpu.memory_space<vmem>>, vector<1x8x1xf32>
    %104 = vector.shape_cast %103 : vector<1x8x1xf32> to vector<8x1xf32>
    %105 = vector.shape_cast %26 : vector<8x1xf32> to vector<1x8x1xf32>
    tpu.vector_store %arg7[%c0_65, %c0_66, %c0_67], %105 {strides = array<i32>} : memref<1x8x1xf32, #tpu.memory_space<vmem>>, vector<1x8x1xf32>,
    %c0_68 = arith.constant 0 : index
    %c0_69 = arith.constant 0 : index
    %c0_70 = arith.constant 0 : index
    %106 = vector.load %arg8[%c0_68, %c0_69, %c0_70] : memref<1x8x1xf32, #tpu.memory_space<vmem>>, vector<1x8x1xf32>
    %107 = vector.shape_cast %106 : vector<1x8x1xf32> to vector<8x1xf32>
    %108 = vector.shape_cast %41 : vector<8x1xf32> to vector<1x8x1xf32>
    tpu.vector_store %arg8[%c0_68, %c0_69, %c0_70], %108 {strides = array<i32>} : memref<1x8x1xf32, #tpu.memory_space<vmem>>, vector<1x8x1xf32>,
    return
  }
  func.func @transform_0(%arg0: i32, %arg1: i32) -> (i32, i32, i32) {
    %c0_i32 = arith.constant 0 : i32
    %c0_i32_0 = arith.constant 0 : i32
    return %arg0, %arg1, %c0_i32 : i32, i32, i32
  }
  func.func @transform_1(%arg0: i32, %arg1: i32) -> (i32, i32, i32, i32) {
    %c0_i32 = arith.constant 0 : i32
    %c0_i32_0 = arith.constant 0 : i32
    %c0_i32_1 = arith.constant 0 : i32
    return %arg0, %c0_i32, %arg1, %c0_i32_0 : i32, i32, i32, i32
  }
  func.func @transform_2(%arg0: i32, %arg1: i32) -> (i32, i32, i32, i32) {
    %c0_i32 = arith.constant 0 : i32
    %c0_i32_0 = arith.constant 0 : i32
    %c0_i32_1 = arith.constant 0 : i32
    return %arg0, %c0_i32, %arg1, %c0_i32_0 : i32, i32, i32, i32
  }
  func.func @transform_3(%arg0: i32, %arg1: i32) -> (i32, i32, i32, i32) {
    %c0_i32 = arith.constant 0 : i32
    %c0_i32_0 = arith.constant 0 : i32
    %c0_i32_1 = arith.constant 0 : i32
    return %arg0, %c0_i32, %arg1, %c0_i32_0 : i32, i32, i32, i32
  }
  func.func @transform_4(%arg0: i32, %arg1: i32) -> (i32, i32, i32) {
    %c0_i32 = arith.constant 0 : i32
    %c0_i32_0 = arith.constant 0 : i32
    return %arg0, %arg1, %c0_i32 : i32, i32, i32
  }
  func.func @transform_5(%arg0: i32, %arg1: i32) -> (i32, i32, i32) {
    %c0_i32 = arith.constant 0 : i32
    %c0_i32_0 = arith.constant 0 : i32
    return %arg0, %arg1, %c0_i32 : i32, i32, i32
  }
  func.func @transform_6(%arg0: i32, %arg1: i32) -> (i32, i32, i32) {
    %c0_i32 = arith.constant 0 : i32
    %c0_i32_0 = arith.constant 0 : i32
    return %arg0, %arg1, %c0_i32 : i32, i32, i32
  }
}

module attributes {stable_mosaic.version = 11 : i64} {
  func.func @_flash_attn_kernel(%arg0: i32, %arg1: i32, %arg2: i32, %arg3: i32, %arg4: memref<1x4x8x8xbf16, #tpu.memory_space<vmem>>, %arg5: memref<1x4x8x8xbf16, #tpu.memory_space<vmem>>, %arg6: memref<1x4x8x8xbf16, #tpu.memory_space<vmem>>, %arg7: memref<1x8x1xf32, #tpu.memory_space<vmem>>, %arg8: memref<1x1x8xf32, #tpu.memory_space<vmem>>, %arg9: memref<1x1x8xf32, #tpu.memory_space<vmem>>, %arg10: memref<1x1x8x8xf32, #tpu.memory_space<vmem>>, %arg11: memref<1x8x32xf32, #tpu.memory_space<vmem>>, %arg12: memref<4x8x1xf32, #tpu.memory_space<vmem>>, %arg13: memref<4x8x1xf32, #tpu.memory_space<vmem>>, %arg14: memref<4x8x8xf32, #tpu.memory_space<vmem>>) attributes {dimension_semantics = [#tpu.dimension_semantics<parallel>, #tpu.dimension_semantics<parallel>, #tpu.dimension_semantics<parallel>, #tpu.dimension_semantics<arbitrary>], iteration_bounds = array<i64: 2, 1, 1, 1>, scalar_prefetch = 0 : i64, scratch_operands = 3 : i64, tpu.core_type = #tpu.core_type<tc>, window_params = [{transform_indices = @transform_0, window_bounds = array<i64: 1, 4, 8, 8>}, {transform_indices = @transform_1, window_bounds = array<i64: 1, 4, 8, 8>}, {transform_indices = @transform_2, window_bounds = array<i64: 1, 4, 8, 8>}, {transform_indices = @transform_3, window_bounds = array<i64: 1, 8, 1>}, {transform_indices = @transform_4, window_bounds = array<i64: 1, 1, 8>}, {transform_indices = @transform_5, window_bounds = array<i64: 1, 1, 8>}, {transform_indices = @transform_6, window_bounds = array<i64: 1, 1, 8, 8>}, {transform_indices = @transform_7, window_bounds = array<i64: 1, 8, 32>}]} {
    %c0_i32 = arith.constant 0 : i32
    %0 = arith.cmpi eq, %arg3, %c0_i32 : i32
    %1 = arith.extui %0 : i1 to i32
    %c0_i32_0 = arith.constant 0 : i32
    %2 = arith.cmpi ne, %1, %c0_i32_0 : i32
    scf.if %2 {
      %cst_48 = arith.constant 0xFF800000 : f32
      %56 = vector.broadcast %cst_48 : f32 to vector<4x8x1xf32>
      %c0_49 = arith.constant 0 : index
      %c0_50 = arith.constant 0 : index
      %c0_51 = arith.constant 0 : index
      %57 = vector.load %arg12[%c0_49, %c0_50, %c0_51] : memref<4x8x1xf32, #tpu.memory_space<vmem>>, vector<4x8x1xf32>
      tpu.vector_store %arg12[%c0_49, %c0_50, %c0_51], %56 {strides = array<i32>} : memref<4x8x1xf32, #tpu.memory_space<vmem>>, vector<4x8x1xf32>,
      %cst_52 = arith.constant 0.000000e+00 : f32
      %58 = vector.broadcast %cst_52 : f32 to vector<4x8x1xf32>
      %c0_53 = arith.constant 0 : index
      %c0_54 = arith.constant 0 : index
      %c0_55 = arith.constant 0 : index
      %59 = vector.load %arg13[%c0_53, %c0_54, %c0_55] : memref<4x8x1xf32, #tpu.memory_space<vmem>>, vector<4x8x1xf32>
      tpu.vector_store %arg13[%c0_53, %c0_54, %c0_55], %58 {strides = array<i32>} : memref<4x8x1xf32, #tpu.memory_space<vmem>>, vector<4x8x1xf32>,
      %cst_56 = arith.constant 0.000000e+00 : f32
      %60 = vector.broadcast %cst_56 : f32 to vector<4x8x8xf32>
      %c0_57 = arith.constant 0 : index
      %c0_58 = arith.constant 0 : index
      %c0_59 = arith.constant 0 : index
      %61 = vector.load %arg14[%c0_57, %c0_58, %c0_59] : memref<4x8x8xf32, #tpu.memory_space<vmem>>, vector<4x8x8xf32>
      tpu.vector_store %arg14[%c0_57, %c0_58, %c0_59], %60 {strides = array<i32>} : memref<4x8x8xf32, #tpu.memory_space<vmem>>, vector<4x8x8xf32>,
    } else {
    }
    %c0 = arith.constant 0 : index
    %c0_1 = arith.constant 0 : index
    %c0_2 = arith.constant 0 : index
    %c0_3 = arith.constant 0 : index
    %3 = vector.load %arg4[%c0, %c0_1, %c0_2, %c0_3] : memref<1x4x8x8xbf16, #tpu.memory_space<vmem>>, vector<1x4x8x8xbf16>
    %4 = vector.shape_cast %3 : vector<1x4x8x8xbf16> to vector<4x8x8xbf16>
    %c0_4 = arith.constant 0 : index
    %c0_5 = arith.constant 0 : index
    %c0_6 = arith.constant 0 : index
    %c0_7 = arith.constant 0 : index
    %5 = vector.load %arg5[%c0_4, %c0_5, %c0_6, %c0_7] : memref<1x4x8x8xbf16, #tpu.memory_space<vmem>>, vector<1x4x8x8xbf16>
    %6 = vector.shape_cast %5 : vector<1x4x8x8xbf16> to vector<4x8x8xbf16>
    %c0_8 = arith.constant 0 : index
    %c0_9 = arith.constant 0 : index
    %c0_10 = arith.constant 0 : index
    %c0_11 = arith.constant 0 : index
    %7 = vector.load %arg6[%c0_8, %c0_9, %c0_10, %c0_11] : memref<1x4x8x8xbf16, #tpu.memory_space<vmem>>, vector<1x4x8x8xbf16>
    %8 = vector.shape_cast %7 : vector<1x4x8x8xbf16> to vector<4x8x8xbf16>
    %c0_12 = arith.constant 0 : index
    %c0_13 = arith.constant 0 : index
    %c0_14 = arith.constant 0 : index
    %9 = vector.load %arg7[%c0_12, %c0_13, %c0_14] : memref<1x8x1xf32, #tpu.memory_space<vmem>>, vector<1x8x1xf32>
    %10 = vector.shape_cast %9 : vector<1x8x1xf32> to vector<8x1xf32>
    %c0_15 = arith.constant 0 : index
    %c0_16 = arith.constant 0 : index
    %c0_17 = arith.constant 0 : index
    %11 = vector.load %arg8[%c0_15, %c0_16, %c0_17] : memref<1x1x8xf32, #tpu.memory_space<vmem>>, vector<1x1x8xf32>
    %12 = vector.shape_cast %11 : vector<1x1x8xf32> to vector<1x8xf32>
    %c0_18 = arith.constant 0 : index
    %c0_19 = arith.constant 0 : index
    %c0_20 = arith.constant 0 : index
    %13 = vector.load %arg9[%c0_18, %c0_19, %c0_20] : memref<1x1x8xf32, #tpu.memory_space<vmem>>, vector<1x1x8xf32>
    %14 = vector.shape_cast %13 : vector<1x1x8xf32> to vector<1x8xf32>
    %c0_21 = arith.constant 0 : index
    %c0_22 = arith.constant 0 : index
    %c0_23 = arith.constant 0 : index
    %c0_24 = arith.constant 0 : index
    %15 = vector.load %arg10[%c0_21, %c0_22, %c0_23, %c0_24] : memref<1x1x8x8xf32, #tpu.memory_space<vmem>>, vector<1x1x8x8xf32>
    %16 = vector.shape_cast %15 : vector<1x1x8x8xf32> to vector<8x8xf32>
    %cst = arith.constant dense<0.000000e+00> : vector<4x8x8xf32>
    %17 = tpu.matmul %4, %6, %cst {dimension_numbers = #tpu.dot_dimension_numbers<[2], [2], [1], [1], [0, 0, 0, 1, 1, 1], [0], [0]>} : vector<4x8x8xbf16>, vector<4x8x8xbf16>, vector<4x8x8xf32> -> vector<4x8x8xf32>
    %18 = vector.broadcast %10 : vector<8x1xf32> to vector<8x8xf32>
    %19 = vector.broadcast %12 : vector<1x8xf32> to vector<8x8xf32>
    %20 = arith.mulf %18, %19 : vector<8x8xf32>
    %21 = vector.shape_cast %20 : vector<8x8xf32> to vector<1x8x8xf32>
    %22 = vector.broadcast %21 : vector<1x8x8xf32> to vector<4x8x8xf32>
    %23 = arith.mulf %17, %22 : vector<4x8x8xf32>
    %24 = vector.shape_cast %16 : vector<8x8xf32> to vector<1x8x8xf32>
    %25 = vector.broadcast %24 : vector<1x8x8xf32> to vector<4x8x8xf32>
    %26 = arith.addf %23, %25 : vector<4x8x8xf32>
    %c0_25 = arith.constant 0 : index
    %c0_26 = arith.constant 0 : index
    %c0_27 = arith.constant 0 : index
    %27 = vector.load %arg12[%c0_25, %c0_26, %c0_27] : memref<4x8x1xf32, #tpu.memory_space<vmem>>, vector<4x8x1xf32>
    %cst_28 = arith.constant dense<0xFF800000> : vector<4x8xf32>
    %28 = vector.multi_reduction <maximumf>, %26, %cst_28 [2] : vector<4x8x8xf32> to vector<4x8xf32>
    %29 = vector.shape_cast %28 : vector<4x8xf32> to vector<4x8x1xf32>
    %30 = arith.maximumf %27, %29 : vector<4x8x1xf32>
    %31 = arith.subf %27, %30 : vector<4x8x1xf32>
    %32 = math.exp %31 : vector<4x8x1xf32>
    %33 = vector.broadcast %30 : vector<4x8x1xf32> to vector<4x8x8xf32>
    %34 = arith.subf %26, %33 : vector<4x8x8xf32>
    %35 = math.exp %34 : vector<4x8x8xf32>
    %c0_29 = arith.constant 0 : index
    %c0_30 = arith.constant 0 : index
    %c0_31 = arith.constant 0 : index
    %36 = vector.load %arg13[%c0_29, %c0_30, %c0_31] : memref<4x8x1xf32, #tpu.memory_space<vmem>>, vector<4x8x1xf32>
    %37 = arith.mulf %32, %36 : vector<4x8x1xf32>
    %cst_32 = arith.constant dense<0.000000e+00> : vector<4x8xf32>
    %38 = vector.multi_reduction <add>, %35, %cst_32 [2] : vector<4x8x8xf32> to vector<4x8xf32>
    %39 = vector.shape_cast %38 : vector<4x8xf32> to vector<4x8x1xf32>
    %40 = arith.addf %37, %39 : vector<4x8x1xf32>
    %c0_33 = arith.constant 0 : index
    %c0_34 = arith.constant 0 : index
    %c0_35 = arith.constant 0 : index
    %41 = vector.load %arg13[%c0_33, %c0_34, %c0_35] : memref<4x8x1xf32, #tpu.memory_space<vmem>>, vector<4x8x1xf32>
    tpu.vector_store %arg13[%c0_33, %c0_34, %c0_35], %40 {strides = array<i32>} : memref<4x8x1xf32, #tpu.memory_space<vmem>>, vector<4x8x1xf32>,
    %c0_36 = arith.constant 0 : index
    %c0_37 = arith.constant 0 : index
    %c0_38 = arith.constant 0 : index
    %42 = vector.load %arg12[%c0_36, %c0_37, %c0_38] : memref<4x8x1xf32, #tpu.memory_space<vmem>>, vector<4x8x1xf32>
    tpu.vector_store %arg12[%c0_36, %c0_37, %c0_38], %30 {strides = array<i32>} : memref<4x8x1xf32, #tpu.memory_space<vmem>>, vector<4x8x1xf32>,
    %43 = vector.shape_cast %14 : vector<1x8xf32> to vector<1x1x8xf32>
    %44 = vector.broadcast %43 : vector<1x1x8xf32> to vector<4x8x8xf32>
    %45 = arith.mulf %35, %44 : vector<4x8x8xf32>
    %46 = arith.truncf %45 : vector<4x8x8xf32> to vector<4x8x8xbf16>
    %c0_39 = arith.constant 0 : index
    %c0_40 = arith.constant 0 : index
    %c0_41 = arith.constant 0 : index
    %47 = vector.load %arg14[%c0_39, %c0_40, %c0_41] : memref<4x8x8xf32, #tpu.memory_space<vmem>>, vector<4x8x8xf32>
    %48 = vector.broadcast %32 : vector<4x8x1xf32> to vector<4x8x8xf32>
    %49 = arith.mulf %48, %47 : vector<4x8x8xf32>
    %cst_42 = arith.constant dense<0.000000e+00> : vector<4x8x8xf32>
    %50 = tpu.matmul %46, %8, %cst_42 {dimension_numbers = #tpu.dot_dimension_numbers<[2], [1], [1], [2], [0, 0, 0, 1, 1, 2], [0], [0]>} : vector<4x8x8xbf16>, vector<4x8x8xbf16>, vector<4x8x8xf32> -> vector<4x8x8xf32>
    %51 = arith.addf %49, %50 : vector<4x8x8xf32>
    %c0_43 = arith.constant 0 : index
    %c0_44 = arith.constant 0 : index
    %c0_45 = arith.constant 0 : index
    %52 = vector.load %arg14[%c0_43, %c0_44, %c0_45] : memref<4x8x8xf32, #tpu.memory_space<vmem>>, vector<4x8x8xf32>
    tpu.vector_store %arg14[%c0_43, %c0_44, %c0_45], %51 {strides = array<i32>} : memref<4x8x8xf32, #tpu.memory_space<vmem>>, vector<4x8x8xf32>,
    %c0_i32_46 = arith.constant 0 : i32
    %53 = arith.cmpi eq, %arg3, %c0_i32_46 : i32
    %54 = arith.extui %53 : i1 to i32
    %c0_i32_47 = arith.constant 0 : i32
    %55 = arith.cmpi ne, %54, %c0_i32_47 : i32
    scf.if %55 {
      %c0_48 = arith.constant 0 : index
      %c0_49 = arith.constant 0 : index
      %c0_50 = arith.constant 0 : index
      %56 = vector.load %arg14[%c0_48, %c0_49, %c0_50] : memref<4x8x8xf32, #tpu.memory_space<vmem>>, vector<4x8x8xf32>
      %c0_51 = arith.constant 0 : index
      %c0_52 = arith.constant 0 : index
      %c0_53 = arith.constant 0 : index
      %57 = vector.load %arg13[%c0_51, %c0_52, %c0_53] : memref<4x8x1xf32, #tpu.memory_space<vmem>>, vector<4x8x1xf32>
      %58 = tpu.reciprocal %57 {approx = true} : vector<4x8x1xf32> -> vector<4x8x1xf32>
      %59 = vector.broadcast %58 : vector<4x8x1xf32> to vector<4x8x8xf32>
      %60 = arith.mulf %56, %59 : vector<4x8x8xf32>
      %61 = vector.extract_strided_slice %60 {offsets = [0, 0, 0], sizes = [1, 8, 8], strides = [1, 1, 1]} : vector<4x8x8xf32> to vector<1x8x8xf32>
      %62 = vector.shape_cast %61 : vector<1x8x8xf32> to vector<8x8xf32>
      %c0_54 = arith.constant 0 : index
      %c0_55 = arith.constant 0 : index
      %c0_56 = arith.constant 0 : index
      %63 = vector.load %arg11[%c0_54, %c0_55, %c0_56] : memref<1x8x32xf32, #tpu.memory_space<vmem>>, vector<1x8x8xf32>
      %64 = vector.shape_cast %63 : vector<1x8x8xf32> to vector<8x8xf32>
      %65 = vector.shape_cast %62 : vector<8x8xf32> to vector<1x8x8xf32>
      tpu.vector_store %arg11[%c0_54, %c0_55, %c0_56], %65 {strides = array<i32>} : memref<1x8x32xf32, #tpu.memory_space<vmem>>, vector<1x8x8xf32>,
      %66 = vector.extract_strided_slice %60 {offsets = [1, 0, 0], sizes = [1, 8, 8], strides = [1, 1, 1]} : vector<4x8x8xf32> to vector<1x8x8xf32>
      %67 = vector.shape_cast %66 : vector<1x8x8xf32> to vector<8x8xf32>
      %c0_57 = arith.constant 0 : index
      %c0_58 = arith.constant 0 : index
      %c8 = arith.constant 8 : index
      %68 = vector.load %arg11[%c0_57, %c0_58, %c8] : memref<1x8x32xf32, #tpu.memory_space<vmem>>, vector<1x8x8xf32>
      %69 = vector.shape_cast %68 : vector<1x8x8xf32> to vector<8x8xf32>
      %70 = vector.shape_cast %67 : vector<8x8xf32> to vector<1x8x8xf32>
      tpu.vector_store %arg11[%c0_57, %c0_58, %c8], %70 {strides = array<i32>} : memref<1x8x32xf32, #tpu.memory_space<vmem>>, vector<1x8x8xf32>,
      %71 = vector.extract_strided_slice %60 {offsets = [2, 0, 0], sizes = [1, 8, 8], strides = [1, 1, 1]} : vector<4x8x8xf32> to vector<1x8x8xf32>
      %72 = vector.shape_cast %71 : vector<1x8x8xf32> to vector<8x8xf32>
      %c0_59 = arith.constant 0 : index
      %c0_60 = arith.constant 0 : index
      %c16 = arith.constant 16 : index
      %73 = vector.load %arg11[%c0_59, %c0_60, %c16] : memref<1x8x32xf32, #tpu.memory_space<vmem>>, vector<1x8x8xf32>
      %74 = vector.shape_cast %73 : vector<1x8x8xf32> to vector<8x8xf32>
      %75 = vector.shape_cast %72 : vector<8x8xf32> to vector<1x8x8xf32>
      tpu.vector_store %arg11[%c0_59, %c0_60, %c16], %75 {strides = array<i32>} : memref<1x8x32xf32, #tpu.memory_space<vmem>>, vector<1x8x8xf32>,
      %76 = vector.extract_strided_slice %60 {offsets = [3, 0, 0], sizes = [1, 8, 8], strides = [1, 1, 1]} : vector<4x8x8xf32> to vector<1x8x8xf32>
      %77 = vector.shape_cast %76 : vector<1x8x8xf32> to vector<8x8xf32>
      %c0_61 = arith.constant 0 : index
      %c0_62 = arith.constant 0 : index
      %c24 = arith.constant 24 : index
      %78 = vector.load %arg11[%c0_61, %c0_62, %c24] : memref<1x8x32xf32, #tpu.memory_space<vmem>>, vector<1x8x8xf32>
      %79 = vector.shape_cast %78 : vector<1x8x8xf32> to vector<8x8xf32>
      %80 = vector.shape_cast %77 : vector<8x8xf32> to vector<1x8x8xf32>
      tpu.vector_store %arg11[%c0_61, %c0_62, %c24], %80 {strides = array<i32>} : memref<1x8x32xf32, #tpu.memory_space<vmem>>, vector<1x8x8xf32>,
    } else {
    }
    return
  }
  func.func @transform_0(%arg0: i32, %arg1: i32, %arg2: i32, %arg3: i32) -> (i32, i32, i32, i32) {
    %c0_i32 = arith.constant 0 : i32
    %c0_i32_0 = arith.constant 0 : i32
    return %arg0, %arg1, %arg2, %c0_i32 : i32, i32, i32, i32
  }
  func.func @transform_1(%arg0: i32, %arg1: i32, %arg2: i32, %arg3: i32) -> (i32, i32, i32, i32) {
    %c0_i32 = arith.constant 0 : i32
    %c0_i32_0 = arith.constant 0 : i32
    return %arg0, %arg1, %arg3, %c0_i32 : i32, i32, i32, i32
  }
  func.func @transform_2(%arg0: i32, %arg1: i32, %arg2: i32, %arg3: i32) -> (i32, i32, i32, i32) {
    %c0_i32 = arith.constant 0 : i32
    %c0_i32_0 = arith.constant 0 : i32
    return %arg0, %arg1, %arg3, %c0_i32 : i32, i32, i32, i32
  }
  func.func @transform_3(%arg0: i32, %arg1: i32, %arg2: i32, %arg3: i32) -> (i32, i32, i32) {
    %c0_i32 = arith.constant 0 : i32
    %c0_i32_0 = arith.constant 0 : i32
    return %arg0, %arg2, %c0_i32 : i32, i32, i32
  }
  func.func @transform_4(%arg0: i32, %arg1: i32, %arg2: i32, %arg3: i32) -> (i32, i32, i32) {
    %c0_i32 = arith.constant 0 : i32
    %c0_i32_0 = arith.constant 0 : i32
    return %arg0, %c0_i32, %arg3 : i32, i32, i32
  }
  func.func @transform_5(%arg0: i32, %arg1: i32, %arg2: i32, %arg3: i32) -> (i32, i32, i32) {
    %c0_i32 = arith.constant 0 : i32
    %c0_i32_0 = arith.constant 0 : i32
    return %arg0, %c0_i32, %arg3 : i32, i32, i32
  }
  func.func @transform_6(%arg0: i32, %arg1: i32, %arg2: i32, %arg3: i32) -> (i32, i32, i32, i32) {
    %c0_i32 = arith.constant 0 : i32
    %c0_i32_0 = arith.constant 0 : i32
    return %arg0, %c0_i32, %arg2, %arg3 : i32, i32, i32, i32
  }
  func.func @transform_7(%arg0: i32, %arg1: i32, %arg2: i32, %arg3: i32) -> (i32, i32, i32) {
    %c0_i32 = arith.constant 0 : i32
    return %arg0, %arg2, %arg1 : i32, i32, i32
  }
}

module attributes {stable_mosaic.version = 11 : i64} {
  func.func @_rows_kernel(%arg0: i32, %arg1: memref<16x32xf32, #tpu.memory_space<vmem>>, %arg2: memref<16x32xbf16, #tpu.memory_space<vmem>>, %arg3: memref<16x1xf32, #tpu.memory_space<vmem>>) attributes {dimension_semantics = [#tpu.dimension_semantics<parallel>], iteration_bounds = array<i64: 1>, scalar_prefetch = 0 : i64, scratch_operands = 0 : i64, tpu.core_type = #tpu.core_type<tc>, window_params = [{transform_indices = @transform_0, window_bounds = array<i64: 16, 32>}, {transform_indices = @transform_1, window_bounds = array<i64: 16, 32>}, {transform_indices = @transform_2, window_bounds = array<i64: 16, 1>}]} {
    %c0 = arith.constant 0 : index
    %c0_0 = arith.constant 0 : index
    %0 = vector.load %arg1[%c0, %c0_0] : memref<16x32xf32, #tpu.memory_space<vmem>>, vector<16x32xf32>
    %1 = math.absf %0 : vector<16x32xf32>
    %cst = arith.constant dense<0xFF800000> : vector<16xf32>
    %2 = vector.multi_reduction <maximumf>, %1, %cst [1] : vector<16x32xf32> to vector<16xf32>
    %3 = vector.shape_cast %2 : vector<16xf32> to vector<16x1xf32>
    %cst_1 = arith.constant 9.99999993E-9 : f32
    %4 = vector.broadcast %cst_1 : f32 to vector<16x1xf32>
    %5 = arith.maximumf %3, %4 : vector<16x1xf32>
    %cst_2 = arith.constant 1.270000e+02 : f32
    %6 = vector.broadcast %cst_2 : f32 to vector<16x1xf32>
    %7 = arith.divf %5, %6 : vector<16x1xf32>
    %8 = vector.broadcast %7 : vector<16x1xf32> to vector<16x32xf32>
    %9 = arith.divf %0, %8 : vector<16x32xf32>
    %10 = math.roundeven %9 : vector<16x32xf32>
    %cst_3 = arith.constant -1.270000e+02 : f32
    %cst_4 = arith.constant 1.270000e+02 : f32
    %11 = vector.broadcast %cst_3 : f32 to vector<16x32xf32>
    %12 = arith.maximumf %11, %10 : vector<16x32xf32>
    %13 = vector.broadcast %cst_4 : f32 to vector<16x32xf32>
    %14 = arith.minimumf %13, %12 : vector<16x32xf32>
    %15 = arith.truncf %14 : vector<16x32xf32> to vector<16x32xbf16>
    %c0_5 = arith.constant 0 : index
    %c0_6 = arith.constant 0 : index
    %16 = vector.load %arg2[%c0_5, %c0_6] : memref<16x32xbf16, #tpu.memory_space<vmem>>, vector<16x32xbf16>
    tpu.vector_store %arg2[%c0_5, %c0_6], %15 {strides = array<i32>} : memref<16x32xbf16, #tpu.memory_space<vmem>>, vector<16x32xbf16>,
    %c0_7 = arith.constant 0 : index
    %c0_8 = arith.constant 0 : index
    %17 = vector.load %arg3[%c0_7, %c0_8] : memref<16x1xf32, #tpu.memory_space<vmem>>, vector<16x1xf32>
    tpu.vector_store %arg3[%c0_7, %c0_8], %7 {strides = array<i32>} : memref<16x1xf32, #tpu.memory_space<vmem>>, vector<16x1xf32>,
    return
  }
  func.func @transform_0(%arg0: i32) -> (i32, i32) {
    %c0_i32 = arith.constant 0 : i32
    %c0_i32_0 = arith.constant 0 : i32
    return %arg0, %c0_i32 : i32, i32
  }
  func.func @transform_1(%arg0: i32) -> (i32, i32) {
    %c0_i32 = arith.constant 0 : i32
    %c0_i32_0 = arith.constant 0 : i32
    return %arg0, %c0_i32 : i32, i32
  }
  func.func @transform_2(%arg0: i32) -> (i32, i32) {
    %c0_i32 = arith.constant 0 : i32
    %c0_i32_0 = arith.constant 0 : i32
    return %arg0, %c0_i32 : i32, i32
  }
}

module attributes {stable_mosaic.version = 11 : i64} {
  func.func @_qmm_kernel(%arg0: i32, %arg1: i32, %arg2: i32, %arg3: memref<16x32xbf16, #tpu.memory_space<vmem>>, %arg4: memref<16x1xf32, #tpu.memory_space<vmem>>, %arg5: memref<32x32xi8, #tpu.memory_space<vmem>>, %arg6: memref<1x32xf32, #tpu.memory_space<vmem>>, %arg7: memref<1x32xf32, #tpu.memory_space<vmem>>, %arg8: memref<16x32xf32, #tpu.memory_space<vmem>>, %arg9: memref<1x32xf32, #tpu.memory_space<vmem>>, %arg10: memref<1x32xf32, #tpu.memory_space<vmem>>, %arg11: memref<16x32xf32, #tpu.memory_space<vmem>>, %arg12: memref<16x32xbf16, #tpu.memory_space<vmem>>, %arg13: memref<16x1xf32, #tpu.memory_space<vmem>>, %arg14: memref<16x32xf32, #tpu.memory_space<vmem>>) attributes {dimension_semantics = [#tpu.dimension_semantics<parallel>, #tpu.dimension_semantics<parallel>, #tpu.dimension_semantics<arbitrary>], iteration_bounds = array<i64: 1, 1, 1>, scalar_prefetch = 0 : i64, scratch_operands = 1 : i64, tpu.core_type = #tpu.core_type<tc>, window_params = [{transform_indices = @transform_0, window_bounds = array<i64: 16, 32>}, {transform_indices = @transform_1, window_bounds = array<i64: 16, 1>}, {transform_indices = @transform_2, window_bounds = array<i64: 32, 32>}, {transform_indices = @transform_3, window_bounds = array<i64: 1, 32>}, {transform_indices = @transform_4, window_bounds = array<i64: 1, 32>}, {transform_indices = @transform_5, window_bounds = array<i64: 16, 32>}, {transform_indices = @transform_6, window_bounds = array<i64: 1, 32>}, {transform_indices = @transform_7, window_bounds = array<i64: 1, 32>}, {transform_indices = @transform_8, window_bounds = array<i64: 16, 32>}, {transform_indices = @transform_9, window_bounds = array<i64: 16, 32>}, {transform_indices = @transform_10, window_bounds = array<i64: 16, 1>}]} {
    %c0_i32 = arith.constant 0 : i32
    %0 = arith.cmpi eq, %arg2, %c0_i32 : i32
    %1 = arith.extui %0 : i1 to i32
    %c0_i32_0 = arith.constant 0 : i32
    %2 = arith.cmpi ne, %1, %c0_i32_0 : i32
    scf.if %2 {
      %cst_10 = arith.constant 0.000000e+00 : f32
      %14 = vector.broadcast %cst_10 : f32 to vector<16x32xf32>
      %c0_11 = arith.constant 0 : index
      %c0_12 = arith.constant 0 : index
      %15 = vector.load %arg14[%c0_11, %c0_12] : memref<16x32xf32, #tpu.memory_space<vmem>>, vector<16x32xf32>
      tpu.vector_store %arg14[%c0_11, %c0_12], %14 {strides = array<i32>} : memref<16x32xf32, #tpu.memory_space<vmem>>, vector<16x32xf32>,
    } else {
    }
    %c0 = arith.constant 0 : index
    %c0_1 = arith.constant 0 : index
    %3 = vector.load %arg5[%c0, %c0_1] : memref<32x32xi8, #tpu.memory_space<vmem>>, vector<32x32xi8>
    %4 = arith.sitofp %3 : vector<32x32xi8> to vector<32x32xf32>
    %5 = arith.truncf %4 : vector<32x32xf32> to vector<32x32xbf16>
    %c0_2 = arith.constant 0 : index
    %c0_3 = arith.constant 0 : index
    %6 = vector.load %arg14[%c0_2, %c0_3] : memref<16x32xf32, #tpu.memory_space<vmem>>, vector<16x32xf32>
    %c0_4 = arith.constant 0 : index
    %c0_5 = arith.constant 0 : index
    %7 = vector.load %arg3[%c0_4, %c0_5] : memref<16x32xbf16, #tpu.memory_space<vmem>>, vector<16x32xbf16>
    %cst = arith.constant dense<0.000000e+00> : vector<16x32xf32>
    %8 = tpu.matmul %7, %5, %cst {dimension_numbers = #tpu.dot_dimension_numbers<[1], [0], [0], [1], [0, 0, 1, 1], [], []>} : vector<16x32xbf16>, vector<32x32xbf16>, vector<16x32xf32> -> vector<16x32xf32>
    %9 = arith.addf %6, %8 : vector<16x32xf32>
    %c0_6 = arith.constant 0 : index
    %c0_7 = arith.constant 0 : index
    %10 = vector.load %arg14[%c0_6, %c0_7] : memref<16x32xf32, #tpu.memory_space<vmem>>, vector<16x32xf32>
    tpu.vector_store %arg14[%c0_6, %c0_7], %9 {strides = array<i32>} : memref<16x32xf32, #tpu.memory_space<vmem>>, vector<16x32xf32>,
    %c0_i32_8 = arith.constant 0 : i32
    %11 = arith.cmpi eq, %arg2, %c0_i32_8 : i32
    %12 = arith.extui %11 : i1 to i32
    %c0_i32_9 = arith.constant 0 : i32
    %13 = arith.cmpi ne, %12, %c0_i32_9 : i32
    scf.if %13 {
      %c0_10 = arith.constant 0 : index
      %c0_11 = arith.constant 0 : index
      %14 = vector.load %arg14[%c0_10, %c0_11] : memref<16x32xf32, #tpu.memory_space<vmem>>, vector<16x32xf32>
      %c0_12 = arith.constant 0 : index
      %c0_13 = arith.constant 0 : index
      %15 = vector.load %arg4[%c0_12, %c0_13] : memref<16x1xf32, #tpu.memory_space<vmem>>, vector<16x1xf32>
      %16 = vector.broadcast %15 : vector<16x1xf32> to vector<16x32xf32>
      %17 = arith.mulf %14, %16 : vector<16x32xf32>
      %c0_14 = arith.constant 0 : index
      %c0_15 = arith.constant 0 : index
      %18 = vector.load %arg6[%c0_14, %c0_15] : memref<1x32xf32, #tpu.memory_space<vmem>>, vector<1x32xf32>
      %19 = vector.broadcast %18 : vector<1x32xf32> to vector<16x32xf32>
      %20 = arith.mulf %17, %19 : vector<16x32xf32>
      %c0_16 = arith.constant 0 : index
      %c0_17 = arith.constant 0 : index
      %21 = vector.load %arg7[%c0_16, %c0_17] : memref<1x32xf32, #tpu.memory_space<vmem>>, vector<1x32xf32>
      %22 = vector.broadcast %21 : vector<1x32xf32> to vector<16x32xf32>
      %23 = arith.addf %20, %22 : vector<16x32xf32>
      %c0_18 = arith.constant 0 : index
      %c0_19 = arith.constant 0 : index
      %24 = vector.load %arg8[%c0_18, %c0_19] : memref<16x32xf32, #tpu.memory_space<vmem>>, vector<16x32xf32>
      %25 = arith.addf %23, %24 : vector<16x32xf32>
      %c0_20 = arith.constant 0 : index
      %c0_21 = arith.constant 0 : index
      %26 = vector.load %arg11[%c0_20, %c0_21] : memref<16x32xf32, #tpu.memory_space<vmem>>, vector<16x32xf32>
      tpu.vector_store %arg11[%c0_20, %c0_21], %25 {strides = array<i32>} : memref<16x32xf32, #tpu.memory_space<vmem>>, vector<16x32xf32>,
      %cst_22 = arith.constant dense<0.000000e+00> : vector<16xf32>
      %27 = vector.multi_reduction <add>, %25, %cst_22 [1] : vector<16x32xf32> to vector<16xf32>
      %28 = vector.shape_cast %27 : vector<16xf32> to vector<16x1xf32>
      %cst_23 = arith.constant 3.200000e+01 : f32
      %29 = vector.broadcast %cst_23 : f32 to vector<16x1xf32>
      %30 = arith.divf %28, %29 : vector<16x1xf32>
      %31 = vector.broadcast %30 : vector<16x1xf32> to vector<16x32xf32>
      %32 = arith.subf %25, %31 : vector<16x32xf32>
      %33 = arith.mulf %32, %32 : vector<16x32xf32>
      %cst_24 = arith.constant dense<0.000000e+00> : vector<16xf32>
      %34 = vector.multi_reduction <add>, %33, %cst_24 [1] : vector<16x32xf32> to vector<16xf32>
      %35 = vector.shape_cast %34 : vector<16xf32> to vector<16x1xf32>
      %cst_25 = arith.constant 3.200000e+01 : f32
      %36 = vector.broadcast %cst_25 : f32 to vector<16x1xf32>
      %37 = arith.divf %35, %36 : vector<16x1xf32>
      %38 = vector.broadcast %30 : vector<16x1xf32> to vector<16x32xf32>
      %39 = arith.subf %25, %38 : vector<16x32xf32>
      %cst_26 = arith.constant 9.99999974E-6 : f32
      %40 = vector.broadcast %cst_26 : f32 to vector<16x1xf32>
      %41 = arith.addf %37, %40 : vector<16x1xf32>
      %42 = math.rsqrt %41 : vector<16x1xf32>
      %43 = vector.broadcast %42 : vector<16x1xf32> to vector<16x32xf32>
      %44 = arith.mulf %39, %43 : vector<16x32xf32>
      %c0_27 = arith.constant 0 : index
      %c0_28 = arith.constant 0 : index
      %45 = vector.load %arg9[%c0_27, %c0_28] : memref<1x32xf32, #tpu.memory_space<vmem>>, vector<1x32xf32>
      %46 = vector.broadcast %45 : vector<1x32xf32> to vector<16x32xf32>
      %47 = arith.mulf %44, %46 : vector<16x32xf32>
      %c0_29 = arith.constant 0 : index
      %c0_30 = arith.constant 0 : index
      %48 = vector.load %arg10[%c0_29, %c0_30] : memref<1x32xf32, #tpu.memory_space<vmem>>, vector<1x32xf32>
      %49 = vector.broadcast %48 : vector<1x32xf32> to vector<16x32xf32>
      %50 = arith.addf %47, %49 : vector<16x32xf32>
      %51 = math.absf %50 : vector<16x32xf32>
      %cst_31 = arith.constant dense<0xFF800000> : vector<16xf32>
      %52 = vector.multi_reduction <maximumf>, %51, %cst_31 [1] : vector<16x32xf32> to vector<16xf32>
      %53 = vector.shape_cast %52 : vector<16xf32> to vector<16x1xf32>
      %cst_32 = arith.constant 9.99999993E-9 : f32
      %54 = vector.broadcast %cst_32 : f32 to vector<16x1xf32>
      %55 = arith.maximumf %53, %54 : vector<16x1xf32>
      %cst_33 = arith.constant 1.270000e+02 : f32
      %56 = vector.broadcast %cst_33 : f32 to vector<16x1xf32>
      %57 = arith.divf %55, %56 : vector<16x1xf32>
      %58 = vector.broadcast %57 : vector<16x1xf32> to vector<16x32xf32>
      %59 = arith.divf %50, %58 : vector<16x32xf32>
      %60 = math.roundeven %59 : vector<16x32xf32>
      %cst_34 = arith.constant -1.270000e+02 : f32
      %cst_35 = arith.constant 1.270000e+02 : f32
      %61 = vector.broadcast %cst_34 : f32 to vector<16x32xf32>
      %62 = arith.maximumf %61, %60 : vector<16x32xf32>
      %63 = vector.broadcast %cst_35 : f32 to vector<16x32xf32>
      %64 = arith.minimumf %63, %62 : vector<16x32xf32>
      %65 = arith.truncf %64 : vector<16x32xf32> to vector<16x32xbf16>
      %c0_36 = arith.constant 0 : index
      %c0_37 = arith.constant 0 : index
      %66 = vector.load %arg12[%c0_36, %c0_37] : memref<16x32xbf16, #tpu.memory_space<vmem>>, vector<16x32xbf16>
      tpu.vector_store %arg12[%c0_36, %c0_37], %65 {strides = array<i32>} : memref<16x32xbf16, #tpu.memory_space<vmem>>, vector<16x32xbf16>,
      %c0_38 = arith.constant 0 : index
      %c0_39 = arith.constant 0 : index
      %67 = vector.load %arg13[%c0_38, %c0_39] : memref<16x1xf32, #tpu.memory_space<vmem>>, vector<16x1xf32>
      tpu.vector_store %arg13[%c0_38, %c0_39], %57 {strides = array<i32>} : memref<16x1xf32, #tpu.memory_space<vmem>>, vector<16x1xf32>,
    } else {
    }
    return
  }
  func.func @transform_0(%arg0: i32, %arg1: i32, %arg2: i32) -> (i32, i32) {
    %c0_i32 = arith.constant 0 : i32
    return %arg0, %arg2 : i32, i32
  }
  func.func @transform_1(%arg0: i32, %arg1: i32, %arg2: i32) -> (i32, i32) {
    %c0_i32 = arith.constant 0 : i32
    %c0_i32_0 = arith.constant 0 : i32
    return %arg0, %c0_i32 : i32, i32
  }
  func.func @transform_2(%arg0: i32, %arg1: i32, %arg2: i32) -> (i32, i32) {
    %c0_i32 = arith.constant 0 : i32
    return %arg2, %arg1 : i32, i32
  }
  func.func @transform_3(%arg0: i32, %arg1: i32, %arg2: i32) -> (i32, i32) {
    %c0_i32 = arith.constant 0 : i32
    %c0_i32_0 = arith.constant 0 : i32
    return %c0_i32, %arg1 : i32, i32
  }
  func.func @transform_4(%arg0: i32, %arg1: i32, %arg2: i32) -> (i32, i32) {
    %c0_i32 = arith.constant 0 : i32
    %c0_i32_0 = arith.constant 0 : i32
    return %c0_i32, %arg1 : i32, i32
  }
  func.func @transform_5(%arg0: i32, %arg1: i32, %arg2: i32) -> (i32, i32) {
    %c0_i32 = arith.constant 0 : i32
    return %arg0, %arg1 : i32, i32
  }
  func.func @transform_6(%arg0: i32, %arg1: i32, %arg2: i32) -> (i32, i32) {
    %c0_i32 = arith.constant 0 : i32
    %c0_i32_0 = arith.constant 0 : i32
    return %c0_i32, %arg1 : i32, i32
  }
  func.func @transform_7(%arg0: i32, %arg1: i32, %arg2: i32) -> (i32, i32) {
    %c0_i32 = arith.constant 0 : i32
    %c0_i32_0 = arith.constant 0 : i32
    return %c0_i32, %arg1 : i32, i32
  }
  func.func @transform_8(%arg0: i32, %arg1: i32, %arg2: i32) -> (i32, i32) {
    %c0_i32 = arith.constant 0 : i32
    return %arg0, %arg1 : i32, i32
  }
  func.func @transform_9(%arg0: i32, %arg1: i32, %arg2: i32) -> (i32, i32) {
    %c0_i32 = arith.constant 0 : i32
    return %arg0, %arg1 : i32, i32
  }
  func.func @transform_10(%arg0: i32, %arg1: i32, %arg2: i32) -> (i32, i32) {
    %c0_i32 = arith.constant 0 : i32
    %c0_i32_0 = arith.constant 0 : i32
    return %arg0, %c0_i32 : i32, i32
  }
}

module attributes {stable_mosaic.version = 11 : i64} {
  func.func @_qmm_kernel(%arg0: i32, %arg1: i32, %arg2: i32, %arg3: memref<16x32xbf16, #tpu.memory_space<vmem>>, %arg4: memref<16x1xf32, #tpu.memory_space<vmem>>, %arg5: memref<32x128xi8, #tpu.memory_space<vmem>>, %arg6: memref<1x128xf32, #tpu.memory_space<vmem>>, %arg7: memref<1x128xf32, #tpu.memory_space<vmem>>, %arg8: memref<16x128xbf16, #tpu.memory_space<vmem>>, %arg9: memref<16x1xf32, #tpu.memory_space<vmem>>, %arg10: memref<16x128xf32, #tpu.memory_space<vmem>>) attributes {dimension_semantics = [#tpu.dimension_semantics<parallel>, #tpu.dimension_semantics<parallel>, #tpu.dimension_semantics<arbitrary>], iteration_bounds = array<i64: 1, 1, 1>, scalar_prefetch = 0 : i64, scratch_operands = 1 : i64, tpu.core_type = #tpu.core_type<tc>, window_params = [{transform_indices = @transform_0, window_bounds = array<i64: 16, 32>}, {transform_indices = @transform_1, window_bounds = array<i64: 16, 1>}, {transform_indices = @transform_2, window_bounds = array<i64: 32, 128>}, {transform_indices = @transform_3, window_bounds = array<i64: 1, 128>}, {transform_indices = @transform_4, window_bounds = array<i64: 1, 128>}, {transform_indices = @transform_5, window_bounds = array<i64: 16, 128>}, {transform_indices = @transform_6, window_bounds = array<i64: 16, 1>}]} {
    %c0_i32 = arith.constant 0 : i32
    %0 = arith.cmpi eq, %arg2, %c0_i32 : i32
    %1 = arith.extui %0 : i1 to i32
    %c0_i32_0 = arith.constant 0 : i32
    %2 = arith.cmpi ne, %1, %c0_i32_0 : i32
    scf.if %2 {
      %cst_10 = arith.constant 0.000000e+00 : f32
      %14 = vector.broadcast %cst_10 : f32 to vector<16x128xf32>
      %c0_11 = arith.constant 0 : index
      %c0_12 = arith.constant 0 : index
      %15 = vector.load %arg10[%c0_11, %c0_12] : memref<16x128xf32, #tpu.memory_space<vmem>>, vector<16x128xf32>
      tpu.vector_store %arg10[%c0_11, %c0_12], %14 {strides = array<i32>} : memref<16x128xf32, #tpu.memory_space<vmem>>, vector<16x128xf32>,
    } else {
    }
    %c0 = arith.constant 0 : index
    %c0_1 = arith.constant 0 : index
    %3 = vector.load %arg5[%c0, %c0_1] : memref<32x128xi8, #tpu.memory_space<vmem>>, vector<32x128xi8>
    %4 = arith.sitofp %3 : vector<32x128xi8> to vector<32x128xf32>
    %5 = arith.truncf %4 : vector<32x128xf32> to vector<32x128xbf16>
    %c0_2 = arith.constant 0 : index
    %c0_3 = arith.constant 0 : index
    %6 = vector.load %arg10[%c0_2, %c0_3] : memref<16x128xf32, #tpu.memory_space<vmem>>, vector<16x128xf32>
    %c0_4 = arith.constant 0 : index
    %c0_5 = arith.constant 0 : index
    %7 = vector.load %arg3[%c0_4, %c0_5] : memref<16x32xbf16, #tpu.memory_space<vmem>>, vector<16x32xbf16>
    %cst = arith.constant dense<0.000000e+00> : vector<16x128xf32>
    %8 = tpu.matmul %7, %5, %cst {dimension_numbers = #tpu.dot_dimension_numbers<[1], [0], [0], [1], [0, 0, 1, 1], [], []>} : vector<16x32xbf16>, vector<32x128xbf16>, vector<16x128xf32> -> vector<16x128xf32>
    %9 = arith.addf %6, %8 : vector<16x128xf32>
    %c0_6 = arith.constant 0 : index
    %c0_7 = arith.constant 0 : index
    %10 = vector.load %arg10[%c0_6, %c0_7] : memref<16x128xf32, #tpu.memory_space<vmem>>, vector<16x128xf32>
    tpu.vector_store %arg10[%c0_6, %c0_7], %9 {strides = array<i32>} : memref<16x128xf32, #tpu.memory_space<vmem>>, vector<16x128xf32>,
    %c0_i32_8 = arith.constant 0 : i32
    %11 = arith.cmpi eq, %arg2, %c0_i32_8 : i32
    %12 = arith.extui %11 : i1 to i32
    %c0_i32_9 = arith.constant 0 : i32
    %13 = arith.cmpi ne, %12, %c0_i32_9 : i32
    scf.if %13 {
      %c0_10 = arith.constant 0 : index
      %c0_11 = arith.constant 0 : index
      %14 = vector.load %arg10[%c0_10, %c0_11] : memref<16x128xf32, #tpu.memory_space<vmem>>, vector<16x128xf32>
      %c0_12 = arith.constant 0 : index
      %c0_13 = arith.constant 0 : index
      %15 = vector.load %arg4[%c0_12, %c0_13] : memref<16x1xf32, #tpu.memory_space<vmem>>, vector<16x1xf32>
      %16 = vector.broadcast %15 : vector<16x1xf32> to vector<16x128xf32>
      %17 = arith.mulf %14, %16 : vector<16x128xf32>
      %c0_14 = arith.constant 0 : index
      %c0_15 = arith.constant 0 : index
      %18 = vector.load %arg6[%c0_14, %c0_15] : memref<1x128xf32, #tpu.memory_space<vmem>>, vector<1x128xf32>
      %19 = vector.broadcast %18 : vector<1x128xf32> to vector<16x128xf32>
      %20 = arith.mulf %17, %19 : vector<16x128xf32>
      %c0_16 = arith.constant 0 : index
      %c0_17 = arith.constant 0 : index
      %21 = vector.load %arg7[%c0_16, %c0_17] : memref<1x128xf32, #tpu.memory_space<vmem>>, vector<1x128xf32>
      %22 = vector.broadcast %21 : vector<1x128xf32> to vector<16x128xf32>
      %23 = arith.addf %20, %22 : vector<16x128xf32>
      %cst_18 = arith.constant 0.000000e+00 : f32
      %24 = vector.broadcast %cst_18 : f32 to vector<16x128xf32>
      %25 = arith.maximumf %23, %24 : vector<16x128xf32>
      %26 = math.absf %25 : vector<16x128xf32>
      %cst_19 = arith.constant dense<0xFF800000> : vector<16xf32>
      %27 = vector.multi_reduction <maximumf>, %26, %cst_19 [1] : vector<16x128xf32> to vector<16xf32>
      %28 = vector.shape_cast %27 : vector<16xf32> to vector<16x1xf32>
      %cst_20 = arith.constant 9.99999993E-9 : f32
      %29 = vector.broadcast %cst_20 : f32 to vector<16x1xf32>
      %30 = arith.maximumf %28, %29 : vector<16x1xf32>
      %cst_21 = arith.constant 1.270000e+02 : f32
      %31 = vector.broadcast %cst_21 : f32 to vector<16x1xf32>
      %32 = arith.divf %30, %31 : vector<16x1xf32>
      %33 = vector.broadcast %32 : vector<16x1xf32> to vector<16x128xf32>
      %34 = arith.divf %25, %33 : vector<16x128xf32>
      %35 = math.roundeven %34 : vector<16x128xf32>
      %cst_22 = arith.constant -1.270000e+02 : f32
      %cst_23 = arith.constant 1.270000e+02 : f32
      %36 = vector.broadcast %cst_22 : f32 to vector<16x128xf32>
      %37 = arith.maximumf %36, %35 : vector<16x128xf32>
      %38 = vector.broadcast %cst_23 : f32 to vector<16x128xf32>
      %39 = arith.minimumf %38, %37 : vector<16x128xf32>
      %40 = arith.truncf %39 : vector<16x128xf32> to vector<16x128xbf16>
      %c0_24 = arith.constant 0 : index
      %c0_25 = arith.constant 0 : index
      %41 = vector.load %arg8[%c0_24, %c0_25] : memref<16x128xbf16, #tpu.memory_space<vmem>>, vector<16x128xbf16>
      tpu.vector_store %arg8[%c0_24, %c0_25], %40 {strides = array<i32>} : memref<16x128xbf16, #tpu.memory_space<vmem>>, vector<16x128xbf16>,
      %c0_26 = arith.constant 0 : index
      %c0_27 = arith.constant 0 : index
      %42 = vector.load %arg9[%c0_26, %c0_27] : memref<16x1xf32, #tpu.memory_space<vmem>>, vector<16x1xf32>
      tpu.vector_store %arg9[%c0_26, %c0_27], %32 {strides = array<i32>} : memref<16x1xf32, #tpu.memory_space<vmem>>, vector<16x1xf32>,
    } else {
    }
    return
  }
  func.func @transform_0(%arg0: i32, %arg1: i32, %arg2: i32) -> (i32, i32) {
    %c0_i32 = arith.constant 0 : i32
    return %arg0, %arg2 : i32, i32
  }
  func.func @transform_1(%arg0: i32, %arg1: i32, %arg2: i32) -> (i32, i32) {
    %c0_i32 = arith.constant 0 : i32
    %c0_i32_0 = arith.constant 0 : i32
    return %arg0, %c0_i32 : i32, i32
  }
  func.func @transform_2(%arg0: i32, %arg1: i32, %arg2: i32) -> (i32, i32) {
    %c0_i32 = arith.constant 0 : i32
    return %arg2, %arg1 : i32, i32
  }
  func.func @transform_3(%arg0: i32, %arg1: i32, %arg2: i32) -> (i32, i32) {
    %c0_i32 = arith.constant 0 : i32
    %c0_i32_0 = arith.constant 0 : i32
    return %c0_i32, %arg1 : i32, i32
  }
  func.func @transform_4(%arg0: i32, %arg1: i32, %arg2: i32) -> (i32, i32) {
    %c0_i32 = arith.constant 0 : i32
    %c0_i32_0 = arith.constant 0 : i32
    return %c0_i32, %arg1 : i32, i32
  }
  func.func @transform_5(%arg0: i32, %arg1: i32, %arg2: i32) -> (i32, i32) {
    %c0_i32 = arith.constant 0 : i32
    return %arg0, %arg1 : i32, i32
  }
  func.func @transform_6(%arg0: i32, %arg1: i32, %arg2: i32) -> (i32, i32) {
    %c0_i32 = arith.constant 0 : i32
    %c0_i32_0 = arith.constant 0 : i32
    return %arg0, %c0_i32 : i32, i32
  }
}

module attributes {stable_mosaic.version = 11 : i64} {
  func.func @_qmm_kernel(%arg0: i32, %arg1: i32, %arg2: i32, %arg3: memref<16x128xbf16, #tpu.memory_space<vmem>>, %arg4: memref<16x1xf32, #tpu.memory_space<vmem>>, %arg5: memref<128x32xi8, #tpu.memory_space<vmem>>, %arg6: memref<1x32xf32, #tpu.memory_space<vmem>>, %arg7: memref<1x32xf32, #tpu.memory_space<vmem>>, %arg8: memref<16x32xf32, #tpu.memory_space<vmem>>, %arg9: memref<16x32xf32, #tpu.memory_space<vmem>>, %arg10: memref<16x32xf32, #tpu.memory_space<vmem>>) attributes {dimension_semantics = [#tpu.dimension_semantics<parallel>, #tpu.dimension_semantics<parallel>, #tpu.dimension_semantics<arbitrary>], iteration_bounds = array<i64: 1, 1, 1>, scalar_prefetch = 0 : i64, scratch_operands = 1 : i64, tpu.core_type = #tpu.core_type<tc>, window_params = [{transform_indices = @transform_0, window_bounds = array<i64: 16, 128>}, {transform_indices = @transform_1, window_bounds = array<i64: 16, 1>}, {transform_indices = @transform_2, window_bounds = array<i64: 128, 32>}, {transform_indices = @transform_3, window_bounds = array<i64: 1, 32>}, {transform_indices = @transform_4, window_bounds = array<i64: 1, 32>}, {transform_indices = @transform_5, window_bounds = array<i64: 16, 32>}, {transform_indices = @transform_6, window_bounds = array<i64: 16, 32>}]} {
    %c0_i32 = arith.constant 0 : i32
    %0 = arith.cmpi eq, %arg2, %c0_i32 : i32
    %1 = arith.extui %0 : i1 to i32
    %c0_i32_0 = arith.constant 0 : i32
    %2 = arith.cmpi ne, %1, %c0_i32_0 : i32
    scf.if %2 {
      %cst_10 = arith.constant 0.000000e+00 : f32
      %14 = vector.broadcast %cst_10 : f32 to vector<16x32xf32>
      %c0_11 = arith.constant 0 : index
      %c0_12 = arith.constant 0 : index
      %15 = vector.load %arg10[%c0_11, %c0_12] : memref<16x32xf32, #tpu.memory_space<vmem>>, vector<16x32xf32>
      tpu.vector_store %arg10[%c0_11, %c0_12], %14 {strides = array<i32>} : memref<16x32xf32, #tpu.memory_space<vmem>>, vector<16x32xf32>,
    } else {
    }
    %c0 = arith.constant 0 : index
    %c0_1 = arith.constant 0 : index
    %3 = vector.load %arg5[%c0, %c0_1] : memref<128x32xi8, #tpu.memory_space<vmem>>, vector<128x32xi8>
    %4 = arith.sitofp %3 : vector<128x32xi8> to vector<128x32xf32>
    %5 = arith.truncf %4 : vector<128x32xf32> to vector<128x32xbf16>
    %c0_2 = arith.constant 0 : index
    %c0_3 = arith.constant 0 : index
    %6 = vector.load %arg10[%c0_2, %c0_3] : memref<16x32xf32, #tpu.memory_space<vmem>>, vector<16x32xf32>
    %c0_4 = arith.constant 0 : index
    %c0_5 = arith.constant 0 : index
    %7 = vector.load %arg3[%c0_4, %c0_5] : memref<16x128xbf16, #tpu.memory_space<vmem>>, vector<16x128xbf16>
    %cst = arith.constant dense<0.000000e+00> : vector<16x32xf32>
    %8 = tpu.matmul %7, %5, %cst {dimension_numbers = #tpu.dot_dimension_numbers<[1], [0], [0], [1], [0, 0, 1, 1], [], []>} : vector<16x128xbf16>, vector<128x32xbf16>, vector<16x32xf32> -> vector<16x32xf32>
    %9 = arith.addf %6, %8 : vector<16x32xf32>
    %c0_6 = arith.constant 0 : index
    %c0_7 = arith.constant 0 : index
    %10 = vector.load %arg10[%c0_6, %c0_7] : memref<16x32xf32, #tpu.memory_space<vmem>>, vector<16x32xf32>
    tpu.vector_store %arg10[%c0_6, %c0_7], %9 {strides = array<i32>} : memref<16x32xf32, #tpu.memory_space<vmem>>, vector<16x32xf32>,
    %c0_i32_8 = arith.constant 0 : i32
    %11 = arith.cmpi eq, %arg2, %c0_i32_8 : i32
    %12 = arith.extui %11 : i1 to i32
    %c0_i32_9 = arith.constant 0 : i32
    %13 = arith.cmpi ne, %12, %c0_i32_9 : i32
    scf.if %13 {
      %c0_10 = arith.constant 0 : index
      %c0_11 = arith.constant 0 : index
      %14 = vector.load %arg10[%c0_10, %c0_11] : memref<16x32xf32, #tpu.memory_space<vmem>>, vector<16x32xf32>
      %c0_12 = arith.constant 0 : index
      %c0_13 = arith.constant 0 : index
      %15 = vector.load %arg4[%c0_12, %c0_13] : memref<16x1xf32, #tpu.memory_space<vmem>>, vector<16x1xf32>
      %16 = vector.broadcast %15 : vector<16x1xf32> to vector<16x32xf32>
      %17 = arith.mulf %14, %16 : vector<16x32xf32>
      %c0_14 = arith.constant 0 : index
      %c0_15 = arith.constant 0 : index
      %18 = vector.load %arg6[%c0_14, %c0_15] : memref<1x32xf32, #tpu.memory_space<vmem>>, vector<1x32xf32>
      %19 = vector.broadcast %18 : vector<1x32xf32> to vector<16x32xf32>
      %20 = arith.mulf %17, %19 : vector<16x32xf32>
      %c0_16 = arith.constant 0 : index
      %c0_17 = arith.constant 0 : index
      %21 = vector.load %arg7[%c0_16, %c0_17] : memref<1x32xf32, #tpu.memory_space<vmem>>, vector<1x32xf32>
      %22 = vector.broadcast %21 : vector<1x32xf32> to vector<16x32xf32>
      %23 = arith.addf %20, %22 : vector<16x32xf32>
      %c0_18 = arith.constant 0 : index
      %c0_19 = arith.constant 0 : index
      %24 = vector.load %arg8[%c0_18, %c0_19] : memref<16x32xf32, #tpu.memory_space<vmem>>, vector<16x32xf32>
      %25 = arith.addf %23, %24 : vector<16x32xf32>
      %c0_20 = arith.constant 0 : index
      %c0_21 = arith.constant 0 : index
      %26 = vector.load %arg9[%c0_20, %c0_21] : memref<16x32xf32, #tpu.memory_space<vmem>>, vector<16x32xf32>
      tpu.vector_store %arg9[%c0_20, %c0_21], %25 {strides = array<i32>} : memref<16x32xf32, #tpu.memory_space<vmem>>, vector<16x32xf32>,
    } else {
    }
    return
  }
  func.func @transform_0(%arg0: i32, %arg1: i32, %arg2: i32) -> (i32, i32) {
    %c0_i32 = arith.constant 0 : i32
    return %arg0, %arg2 : i32, i32
  }
  func.func @transform_1(%arg0: i32, %arg1: i32, %arg2: i32) -> (i32, i32) {
    %c0_i32 = arith.constant 0 : i32
    %c0_i32_0 = arith.constant 0 : i32
    return %arg0, %c0_i32 : i32, i32
  }
  func.func @transform_2(%arg0: i32, %arg1: i32, %arg2: i32) -> (i32, i32) {
    %c0_i32 = arith.constant 0 : i32
    return %arg2, %arg1 : i32, i32
  }
  func.func @transform_3(%arg0: i32, %arg1: i32, %arg2: i32) -> (i32, i32) {
    %c0_i32 = arith.constant 0 : i32
    %c0_i32_0 = arith.constant 0 : i32
    return %c0_i32, %arg1 : i32, i32
  }
  func.func @transform_4(%arg0: i32, %arg1: i32, %arg2: i32) -> (i32, i32) {
    %c0_i32 = arith.constant 0 : i32
    %c0_i32_0 = arith.constant 0 : i32
    return %c0_i32, %arg1 : i32, i32
  }
  func.func @transform_5(%arg0: i32, %arg1: i32, %arg2: i32) -> (i32, i32) {
    %c0_i32 = arith.constant 0 : i32
    return %arg0, %arg1 : i32, i32
  }
  func.func @transform_6(%arg0: i32, %arg1: i32, %arg2: i32) -> (i32, i32) {
    %c0_i32 = arith.constant 0 : i32
    return %arg0, %arg1 : i32, i32
  }
}

</mosaic_0001>

<bundles_post_ra>
// kernel: quant_opt_decoder_layer.9
= control target key start
LH: loop header
LB: loop body
LE: loop exit
PB: predicated region body
PF: predicated region fallthrough
CT: control target
= control target key end

     0   :  { %v153_v0 = vmov 0.0   ;;  %vm154_vm0 = vmmov 0   ;;  %vm25_vm1 = vcmask 785408   ;;  %v155_v3 = vmov 0   ;;  %s216_s2 = inlined_call_operand.vmem [shape: s8[32,96], index: 2, kind: input, shape index: {}]   ;;  %s217_s0 = inlined_call_operand.vmem [shape: bf16[16,32], index: 0, kind: input, shape index: {}]   ;;  %s218_s1 = inlined_call_operand.vmem [shape: f32[16,1], index: 1, kind: input, shape index: {}]   ;;  %s219_s3 = inlined_call_operand.vmem [shape: f32[1,96], index: 3, kind: input, shape index: {}]   ;;  %s220_s4 = inlined_call_operand.vmem [shape: f32[1,96], index: 4, kind: input, shape index: {}]   ;;  %s221_s5 = inlined_call_operand.vmem [shape: f32[16,96], index: 5, kind: output, shape index: {}]  }
   0x1   :  { %140 = vmatprep.subr.bf16.mxu0 %v153_v0  ;;  %v28_v1 = vld [vmem:[%s216_s2] sm:$0xff]  ;;  %144 = vmatprep.mubr.msk.bf16.mxu0 %vm154_vm0, %v153_v0  ;;  %26 = vst.msk [vmem:[#allocation2] sm:$0xff] %vm25_vm1, %v153_v0  ;;  %27 = vst.msk [vmem:[#allocation2 + $0x8] sm:$0xff] %vm25_vm1, %v153_v0  ;;  %v96_v6 = vld [vmem:[%s218_s1 + $0x8] sm:$0xff]  ;;  %vm40_vm2 = vcmask 261120  }
   0x2   :  { %v29_v2 = vunpack.c.l.s8.bf16 %v28_v1  ;;  %151 = vset.pattern.permute.xlu0 %v155_v3  ;;  %v95_v4 = vld [vmem:[%s218_s1] sm:$0xff]  ;;  %v30_v5 = vunpack.c.h.s8.bf16 %v28_v1 }
   0x3   :  { %99 = vperm.xlu0 %151, %v95_v4   ;;  %v152_v7 = vld [vmem:[%s217_s0] sm:$0xff]  }
   0x4   :  { %141 = vmatpush3.bf16.msra.mxu0 %v29_v2  ;;  %v135_v17 = vld [vmem:[%s219_s3] ss:$0 sm:$0xff] }
   0x5   :  { %142 = vmatprep.subr.bf16.mxu0 %v153_v0  ;;  %v136_v20 = vld [vmem:[%s220_s4] ss:$0 sm:$0xff] }
   0x7   :  { %104 = vperm.xlu0 %151, %v96_v6  }
   0x8   :  { %143 = vmatpush3.bf16.msra.mxu0 %v30_v5  ;;  %v31_v8 = vld [vmem:[#allocation2] sm:$0xff]  ;;  %v32_v10 = vld [vmem:[#allocation2 + $0x8] sm:$0xff] }
   0xb   :  { %145 = vmatmul.mubr.msk.bf16.vlgmr.msra.gmra.mrb[0].mxu0 %vm40_vm2, %v152_v7 }
  0x82   :  { %v100_v16 = vpop.permute.xlu0 %99 }
  0x86   :  { %v105_v21 = vpop.permute.xlu0 %104 }
  0xde   :  { %v78_v9 = vpop.f32.mrb[0].mxu0 }
  0xdf   :  { %v85_v11 = vadd.f32 %v78_v9, %v31_v8  ;;  %v146_v12 = vpop.f32.mrb[1].mxu0 }
  0xe0   :  { %v81_v13 = vpop.f32.mrb[2].mxu0 }
  0xe1   :  { %88 = vst.msk [vmem:[#allocation2] sm:$0xff] %vm25_vm1, %v85_v11  ;;  %v86_v14 = vadd.f32 %v81_v13, %v32_v10  ;;  %v147_v15 = vpop.f32.mrb[3].mxu0 }
  0xe3   :  { %89 = vst.msk [vmem:[#allocation2 + $0x8] sm:$0xff] %vm25_vm1, %v86_v14 }
  0xe8   :  { %v93_v18 = vld [vmem:[#allocation2] sm:$0xff] }
  0xe9   :  { %v107_v19 = vmul.f32 %v100_v16, %v93_v18 }
  0xea   :  { %v94_v22 = vld [vmem:[#allocation2 + $0x8] sm:$0xff] }
  0xeb   :  { %v116_v23 = vmul.f32 %v135_v17, %v107_v19  ;;  %v108_v24 = vmul.f32 %v105_v21, %v94_v22 }
  0xed   :  { %v125_v25 = vadd.f32 %v136_v20, %v116_v23  ;;  %v117_v26 = vmul.f32 %v135_v17, %v108_v24 }
  0xef   :  { %127 = vst.msk [vmem:[%s221_s5] sm:$0xff] %vm25_vm1, %v125_v25  ;;  %v126_v27 = vadd.f32 %v136_v20, %v117_v26 }
  0xf1   :  { %128 = vst.msk [vmem:[%s221_s5 + $0x8] sm:$0xff] %vm25_vm1, %v126_v27 }

// kernel: quant_opt_decoder_layer.8
= control target key start
LH: loop header
LB: loop body
LE: loop exit
PB: predicated region body
PF: predicated region fallthrough
CT: control target
= control target key end

     0   :  { %vm18_vm0 = vcmask 261120   ;;  %vm98_vm1 = vcmask 7168   ;;  %vm95_vm2 = vcmask 257024   ;;  %s182_s0 = inlined_call_operand.vmem [shape: f32[16,32], index: 0, kind: input, shape index: {}]   ;;  %s183_s1 = inlined_call_operand.vmem [shape: f32[1,32], index: 1, kind: input, shape index: {}]   ;;  %s184_s2 = inlined_call_operand.vmem [shape: f32[1,32], index: 2, kind: input, shape index: {}]   ;;  %s185_s4 = inlined_call_operand.vmem [shape: f32[16,1], index: 4, kind: output, shape index: {1}]   ;;  %s186_s3 = inlined_call_operand.vmem [shape: bf16[16,32], index: 3, kind: output, shape index: {0}]  }
   0x1   :  { %v16_v0 = vld [vmem:[%s182_s0] sm:$0xff]  ;;  %v17_v1 = vld [vmem:[%s182_s0 + $0x8] sm:$0xff] }
   0x2   :  { %v19_v2 = vsel %vm18_vm0, %v16_v0, 0.0  ;;  %v22_v3 = vsel %vm18_vm0, %v17_v1, 0.0  ;;  %v109_v21 = vld [vmem:[%s183_s1] ss:$0 sm:$0xff] }
   0x3   :  { %20 = vadd.xlane.f32.xlu0 %v19_v2  ;;  %v110_v23 = vld [vmem:[%s184_s2] ss:$0 sm:$0xff] }
   0x7   :  { %23 = vadd.xlane.f32.xlu0 %v22_v3 }
  0x90   :  { %v21_v4 = vpop.xlane.xlu0 %20 }
  0x91   :  { %v26_v5 = vmul.f32 0.03125, %v21_v4 }
  0x93   :  { %v28_v6 = vsub.f32 %v16_v0, %v26_v5 }
  0x94   :  { %v24_v7 = vpop.xlane.xlu0 %23 }
  0x95   :  { %v27_v8 = vmul.f32 0.03125, %v24_v7  ;;  %v30_v9 = vmul.f32 %v28_v6, %v28_v6 }
  0x97   :  { %v29_v10 = vsub.f32 %v17_v1, %v27_v8  ;;  %v32_v11 = vsel %vm18_vm0, %v30_v9, 0.0 }
  0x98   :  { %33 = vadd.xlane.f32.xlu1 %v32_v11 }
  0x99   :  { %v31_v12 = vmul.f32 %v29_v10, %v29_v10 }
  0x9b   :  { %v35_v13 = vsel %vm18_vm0, %v31_v12, 0.0 }
  0x9c   :  { %36 = vadd.xlane.f32.xlu1 %v35_v13 }
 0x125   :  { %v34_v14 = vpop.xlane.xlu1 %33 }
 0x126   :  { %v38_v15 = vmul.f32 0.03125, %v34_v14 }
 0x128   :  { %v40_v16 = vadd.f32 1e-05, %v38_v15 }
 0x129   :  { %v37_v17 = vpop.xlane.xlu1 %36 }
 0x12a   :  { %119 = vrsqrt.f32 %v40_v16  ;;  %v39_v18 = vmul.f32 0.03125, %v37_v17 }
 0x12c   :  { %v41_v19 = vadd.f32 1e-05, %v39_v18 }
 0x12e   :  { %121 = vrsqrt.f32 %v41_v19 }
 0x134   :  { %v120_v20 = vpop.eup %119 }
 0x135   :  { %v44_v22 = vmul.f32 %v120_v20, %v28_v6 }
 0x137   :  { %v53_v24 = vmul.f32 %v109_v21, %v44_v22 }
 0x138   :  { %v122_v25 = vpop.eup %121 }
 0x139   :  { %v62_v26 = vadd.f32 %v110_v23, %v53_v24  ;;  %v45_v27 = vmul.f32 %v122_v25, %v29_v10 }
 0x13b   :  { %v64_v28 = vand.u32 2147483647, %v62_v26  ;;  %v54_v29 = vmul.f32 %v109_v21, %v45_v27 }
 0x13d   :  { %v66_v30 = vsel %vm18_vm0, %v64_v28, -inf  ;;  %v63_v31 = vadd.f32 %v110_v23, %v54_v29 }
 0x13e   :  { %67 = vmax.xlane.f32.xlu0 %v66_v30 }
 0x13f   :  { %v65_v32 = vand.u32 2147483647, %v63_v31 }
 0x141   :  { %v69_v33 = vsel %vm18_vm0, %v65_v32, -inf }
 0x142   :  { %70 = vmax.xlane.f32.xlu1 %v69_v33 }
 0x1cb   :  { %v68_v34 = vpop.xlane.xlu0 %67 }
 0x1cc   :  { %v72_v35 = vmax.f32 %v68_v34, 1e-08 }
 0x1ce   :  { %v75_v36 = vmul.f32 0.007874016, %v72_v35 }
 0x1cf   :  { %v71_v37 = vpop.xlane.xlu1 %70 }
 0x1d0   :  { %123 = vrcp.f32 %v75_v36  ;;  %99 = vst.msk [vmem:[%s185_s4] sm:$0xff] %vm98_vm1, %v75_v36  ;;  %v73_v38 = vmax.f32 %v71_v37, 1e-08 }
 0x1d2   :  { %v76_v39 = vmul.f32 0.007874016, %v73_v38 }
 0x1d4   :  { %125 = vrcp.f32 %v76_v39  ;;  %100 = vst.msk [vmem:[%s185_s4 + $0x8] sm:$0xff] %vm98_vm1, %v76_v39 }
 0x1da   :  { %v124_v40 = vpop.eup %123 }
 0x1db   :  { %v78_v41 = vmul.f32 %v124_v40, %v62_v26 }
 0x1dd   :  { %v117_v42 = vround.rtne.f32 %v78_v41 }
 0x1de   :  { %v126_v43 = vpop.eup %125 }
 0x1df   :  { %v111_v44 = vclamps-f32 %v117_v42, 127.0  ;;  %v80_v45 = vmul.f32 %v126_v43, %v63_v31 }
 0x1e1   :  { %v115_v46 = vpack.c.bf16 %v111_v44, %v111_v44  ;;  %v118_v47 = vround.rtne.f32 %v80_v45 }
 0x1e3   :  { %96 = vst.msk [vmem:[%s186_s3] sm:$0xf] %vm95_vm2, %v115_v46  ;;  %v112_v48 = vclamps-f32 %v118_v47, 127.0 }
 0x1e5   :  { %v116_v49 = vpack.c.bf16 %v112_v48, %v112_v48 }
 0x1e7   :  { %97 = vst.msk [vmem:[%s186_s3 + $0x4] sm:$0xf] %vm95_vm2, %v116_v49 }

// kernel: quant_opt_decoder_layer.10
= control target key start
LH: loop header
LB: loop body
LE: loop exit
PB: predicated region body
PF: predicated region fallthrough
CT: control target
= control target key end

     0   :  { %s932_s21 = smov 0   ;;  %s934_s22 = smov 0   ;;  %s1013_s0 = inlined_call_operand.vmem [shape: f32[2,8,96], index: 0, kind: input, shape index: {}]   ;;  %s1014_s1 = inlined_call_operand.vmem [shape: bf16[2,4,8,8], index: 1, kind: output, shape index: {0}]   ;;  %s1015_s2 = inlined_call_operand.vmem [shape: bf16[2,4,8,8], index: 2, kind: output, shape index: {1}]   ;;  %s1016_s3 = inlined_call_operand.vmem [shape: bf16[2,4,8,8], index: 3, kind: output, shape index: {2}]   ;;  %s1017_s4 = inlined_call_operand.vmem [shape: f32[2,8,1], index: 4, kind: output, shape index: {3}]   ;;  %s1018_s5 = inlined_call_operand.vmem [shape: f32[2,8,1], index: 5, kind: output, shape index: {4}]   ;;  %s1019_s6 = inlined_call_operand.vmem [shape: f32[2,8,1], index: 6, kind: output, shape index: {5}]  }
   0x1   :  { %s936_s23 = smov 0  }
   0x2 LB: > { %s29_s24 = sadd.s32 1, %s880_s22  ;;  %p784_p0 = scmp.ge.s32.totalorder %s884_s23, 1  ;;  %s884_s23 = sphi %s936_s23, %s17_s23   ;;  %s880_s22 = sphi %s934_s22, %s1021_s22   ;;  %s876_s21 = sphi %s932_s21, %s1020_s21  }
   0x3   : > { %p31_p1 = scmp.ge.s32.totalorder %s29_s24, 2  ;;  %p251_p2 = scmp.lt.s32.totalorder %s884_s23, 3 }
   0x5   : > { %s1023_s24 = smov (%p31_p1, %s29_s24), 0  ;;  %p252_p3 = pnand %p784_p0, %p251_p2 }
   0x6   : > { %p323_p4 = scmp.lt.s32.totalorder (!%p252_p3), %s876_s21, 1  ;;  %vm402_vm0 = vcmask (!%p252_p3), 785920   ;;  %vm377_vm1 = vcmask (!%p252_p3), 261120   ;;  %vm390_vm2 = vcmask (!%p252_p3), 523520   ;;  %vm479_vm3 = vcmask (!%p252_p3), 7168   ;;  %s886_s18 = smov (!%p252_p3), 64  }
   0x7   : > { %255 = sbr.rel (%p252_p3) target bundleno = 330 (0x14a), region = 24  ;;  %vm414_vm4 = vcmask (!%p252_p3), 60416   ;;  %s887_s19 = smov (!%p252_p3), 112  }
   0x8   : > { %s888_s20 = smov (!%p252_p3), 96   ;;  %s891_s26 = smov (!%p252_p3), 72  }
   0x9   : > { %s892_s27 = smov (!%p252_p3), 88   ;;  %s894_s29 = smov (!%p252_p3), 80  }
   0xa   : > { %s895_s30 = smov (!%p252_p3), 104  }
   0xe   : > { %s1025_s21 = smov (!%p323_p4, %s876_s21), 1 }
   0xf   : > { %s953_s25 = sshll.u32 %s1025_s21, 3  ;;  %s972_s14 = sshll.u32 %s1025_s21, 4 }
  0x10   : > { %s329_s28 = scalar_lea.vmem %s1013_s0, %s953_s25  ;;  %s374_s7 = scalar_lea.vmem %s1019_s6, %s953_s25 }
  0x11   : > { %v375_v0 = vld [vmem:[%s329_s28] sm:$0xff]  ;;  %s360_s10 = scalar_lea.vmem %s1017_s4, %s953_s25  ;;  %s367_s13 = scalar_lea.vmem %s1018_s5, %s953_s25 }
  0x12   : > { %v376_v1 = vand.u32 2147483647, %v375_v0  ;;  %s978_s17 = scalar_lea.vmem %s1014_s1, %s972_s14  ;;  %s889_s21 = smov 48  }
  0x13   : > { %s890_s25 = smov 120   ;;  %s893_s28 = smov 56  }
  0x14   : > { %v403_v2 = vsel %vm402_vm0, %v376_v1, -inf  ;;  %v378_v3 = vsel %vm377_vm1, %v376_v1, -inf  ;;  %v391_v4 = vsel %vm390_vm2, %v376_v1, -inf }
  0x15   : > { %404 = vmax.xlane.f32.xlu1 %v403_v2  ;;  %379 = vmax.xlane.f32.xlu0 %v378_v3 }
  0x19   : > { %392 = vmax.xlane.f32.xlu0 %v391_v4 }
  0xa2   : > { %v405_v5 = vpop.xlane.xlu1 %404  ;;  %v380_v6 = vpop.xlane.xlu0 %379 }
  0xa3   : > { %v406_v7 = vmax.f32 %v405_v5, 1e-08  ;;  %v381_v8 = vmax.f32 %v380_v6, 1e-08 }
  0xa5   : > { %v407_v9 = vmul.f32 0.007874016, %v406_v7  ;;  %v383_v10 = vmul.f32 0.007874016, %v381_v8 }
  0xa6   : > { %v393_v11 = vpop.xlane.xlu0 %392 }
  0xa7   : > { %856 = vrcp.f32 %v407_v9  ;;  %482 = vst.msk [vmem:[%s374_s7] sm:$0xff] %vm479_vm3, %v407_v9  ;;  %v478_v12 = vmul.f32 0.35355338, %v383_v10  ;;  %v394_v13 = vmax.f32 %v393_v11, 1e-08  ;;  %s896_s7 = smov 40  }
  0xa8   : > { %858 = vrcp.f32 %v383_v10 }
  0xa9   : > { %480 = vst.msk [vmem:[%s360_s10] sm:$0xff] %vm479_vm3, %v478_v12  ;;  %v395_v14 = vmul.f32 0.007874016, %v394_v13  ;;  %s353_s10 = scalar_lea.vmem %s1016_s3, %s972_s14 }
  0xab   : > { %860 = vrcp.f32 %v395_v14  ;;  %481 = vst.msk [vmem:[%s367_s13] sm:$0xff] %vm479_vm3, %v395_v14  ;;  %s345_s13 = scalar_lea.vmem %s1015_s2, %s972_s14 }
  0xb1   : > { %v857_v15 = vpop.eup %856 }
  0xb2   : > { %v859_v16 = vpop.eup %858  ;;  %v409_v17 = vmul.f32 %v857_v15, %v375_v0 }
  0xb3   : > { %v385_v18 = vmul.f32 %v859_v16, %v375_v0 }
  0xb4   : > { %v820_v19 = vround.rtne.f32 %v409_v17 }
  0xb5   : > { %v861_v20 = vpop.eup %860  ;;  %v818_v21 = vround.rtne.f32 %v385_v18 }
  0xb6   : > { %v797_v22 = vclamps-f32 %v820_v19, 127.0  ;;  %v397_v23 = vmul.f32 %v861_v20, %v375_v0 }
  0xb7   : > { %v795_v24 = vclamps-f32 %v818_v21, 127.0 }
  0xb8   : > { %v816_v25 = vpack.c.bf16 %v797_v22, %v797_v22  ;;  %v819_v26 = vround.rtne.f32 %v397_v23 }
  0xb9   : > { %v389_v27 = vpack.c.bf16 %v795_v24, %v795_v24 }
  0xba   : > { %426 = vrot.lane.b32.xlu0 %v816_v25, %s886_s18  ;;  %v796_v28 = vclamps-f32 %v819_v26, 127.0 }
  0xbb   : > { %415 = vst.msk [vmem:[%s978_s17] sm:$0xf] %vm414_vm4, %v389_v27 }
  0xbc   : > { %v815_v29 = vpack.c.bf16 %v796_v28, %v796_v28 }
  0xbe   : > { %448 = vrot.lane.b32.xlu0 %v389_v27, %s887_s19  ;;  %419 = vrot.lane.b32.xlu1 %v815_v29, %s888_s20 }
  0xc2   : > { %458 = vrot.lane.b32.xlu0 %v816_v25, %s889_s21  ;;  %433 = vrot.lane.b32.xlu1 %v389_v27, %s890_s25 }
  0xc6   : > { %468 = vrot.lane.b32.xlu0 %v815_v29, %s891_s26  ;;  %438 = vrot.lane.b32.xlu1 %v815_v29, %s892_s27 }
  0xca   : > { %443 = vrot.lane.b32.xlu1 %v816_v25, %s893_s28 }
  0xce   : > { %453 = vrot.lane.b32.xlu1 %v815_v29, %s894_s29 }
  0xd2   : > { %463 = vrot.lane.b32.xlu1 %v389_v27, %s895_s30 }
  0xd6   : > { %473 = vrot.lane.b32.xlu1 %v816_v25, %s896_s7 }
 0x12c   : > { %v427_v30 = vpop.permute.xlu0 %426 }
 0x12d   : > { %429 = vst.msk [vmem:[%s353_s10] sm:$0xf] %vm414_vm4, %v427_v30 }
 0x130   : > { %v420_v31 = vpop.permute.xlu1 %419  ;;  %v449_v32 = vpop.permute.xlu0 %448 }
 0x131   : > { %422 = vst.msk [vmem:[%s345_s13] sm:$0xf] %vm414_vm4, %v420_v31  ;;  %804 = vst.msk [vmem:[%s978_s17 + $0x8] sm:$0xf] %vm414_vm4, %v449_v32 }
 0x134   : > { %v434_v33 = vpop.permute.xlu1 %433  ;;  %v459_v34 = vpop.permute.xlu0 %458 }
 0x135   : > { %801 = vst.msk [vmem:[%s978_s17 + $0x4] sm:$0xf] %vm414_vm4, %v434_v33  ;;  %806 = vst.msk [vmem:[%s353_s10 + $0x8] sm:$0xf] %vm414_vm4, %v459_v34 }
 0x138   : > { %v439_v35 = vpop.permute.xlu1 %438  ;;  %v469_v36 = vpop.permute.xlu0 %468 }
 0x139   : > { %802 = vst.msk [vmem:[%s345_s13 + $0x4] sm:$0xf] %vm414_vm4, %v439_v35  ;;  %808 = vst.msk [vmem:[%s345_s13 + $0xc] sm:$0xf] %vm414_vm4, %v469_v36 }
 0x13c   : > { %v444_v37 = vpop.permute.xlu1 %443 }
 0x13d   : > { %803 = vst.msk [vmem:[%s353_s10 + $0x4] sm:$0xf] %vm414_vm4, %v444_v37 }
 0x140   : > { %v454_v38 = vpop.permute.xlu1 %453 }
 0x141   : > { %805 = vst.msk [vmem:[%s345_s13 + $0x8] sm:$0xf] %vm414_vm4, %v454_v38 }
 0x144   : > { %v464_v39 = vpop.permute.xlu1 %463 }
 0x145   : > { %807 = vst.msk [vmem:[%s978_s17 + $0xc] sm:$0xf] %vm414_vm4, %v464_v39 }
 0x148   : > { %v474_v40 = vpop.permute.xlu1 %473 }
 0x149   : > { %809 = vst.msk [vmem:[%s353_s10 + $0xc] sm:$0xf] %vm414_vm4, %v474_v40 }
 0x14a PF: > { %s17_s23 = sadd.s32 1, %s884_s23   ;;  %s1020_s21 = smov %s880_s22 }
 0x14b   : > { %p14_p5 = scmp.ge.s32.totalorder %s17_s23, 4   ;;  %s1021_s22 = smov %s1023_s24 }
 0x14d   :  { %16 = sbr.rel (!%p14_p5) target bundleno = 2 (0x2), region = 123 }

// kernel: quant_opt_decoder_layer.12
= control target key start
LH: loop header
LB: loop body
LE: loop exit
PB: predicated region body
PF: predicated region fallthrough
CT: control target
= control target key end

     0   :  { %vm14_vm0 = vcmask 261120   ;;  %vm47_vm1 = vcmask 7168   ;;  %vm44_vm2 = vcmask 257024   ;;  %s103_s0 = inlined_call_operand.vmem [shape: f32[16,32], index: 0, kind: input, shape index: {}]   ;;  %s104_s2 = inlined_call_operand.vmem [shape: f32[16,1], index: 2, kind: output, shape index: {1}]   ;;  %s105_s1 = inlined_call_operand.vmem [shape: bf16[16,32], index: 1, kind: output, shape index: {0}]  }
   0x1   :  { %v10_v0 = vld [vmem:[%s103_s0] sm:$0xff]  ;;  %v11_v1 = vld [vmem:[%s103_s0 + $0x8] sm:$0xff] }
   0x2   :  { %v12_v2 = vand.u32 2147483647, %v10_v0  ;;  %v13_v3 = vand.u32 2147483647, %v11_v1 }
   0x4   :  { %v15_v4 = vsel %vm14_vm0, %v12_v2, -inf  ;;  %v18_v5 = vsel %vm14_vm0, %v13_v3, -inf }
   0x5   :  { %16 = vmax.xlane.f32.xlu0 %v15_v4 }
   0x9   :  { %19 = vmax.xlane.f32.xlu0 %v18_v5 }
  0x92   :  { %v17_v6 = vpop.xlane.xlu0 %16 }
  0x93   :  { %v21_v7 = vmax.f32 %v17_v6, 1e-08 }
  0x95   :  { %v24_v8 = vmul.f32 0.007874016, %v21_v7 }
  0x96   :  { %v20_v9 = vpop.xlane.xlu0 %19 }
  0x97   :  { %66 = vrcp.f32 %v24_v8  ;;  %48 = vst.msk [vmem:[%s104_s2] sm:$0xff] %vm47_vm1, %v24_v8  ;;  %v22_v10 = vmax.f32 %v20_v9, 1e-08 }
  0x99   :  { %v25_v11 = vmul.f32 0.007874016, %v22_v10 }
  0x9b   :  { %68 = vrcp.f32 %v25_v11  ;;  %49 = vst.msk [vmem:[%s104_s2 + $0x8] sm:$0xff] %vm47_vm1, %v25_v11 }
  0xa1   :  { %v67_v12 = vpop.eup %66 }
  0xa2   :  { %v27_v13 = vmul.f32 %v67_v12, %v10_v0 }
  0xa4   :  { %v64_v14 = vround.rtne.f32 %v27_v13 }
  0xa5   :  { %v69_v15 = vpop.eup %68 }
  0xa6   :  { %v58_v16 = vclamps-f32 %v64_v14, 127.0  ;;  %v29_v17 = vmul.f32 %v69_v15, %v11_v1 }
  0xa8   :  { %v62_v18 = vpack.c.bf16 %v58_v16, %v58_v16  ;;  %v65_v19 = vround.rtne.f32 %v29_v17 }
  0xaa   :  { %45 = vst.msk [vmem:[%s105_s1] sm:$0xf] %vm44_vm2, %v62_v18  ;;  %v59_v20 = vclamps-f32 %v65_v19, 127.0 }
  0xac   :  { %v63_v21 = vpack.c.bf16 %v59_v20, %v59_v20 }
  0xae   :  { %46 = vst.msk [vmem:[%s105_s1 + $0x4] sm:$0xf] %vm44_vm2, %v63_v21 }

// kernel: quant_opt_decoder_layer.13
= control target key start
LH: loop header
LB: loop body
LE: loop exit
PB: predicated region body
PF: predicated region fallthrough
CT: control target
= control target key end

     0   :  { %vm37_vm0 = vcmask 261120   ;;  %v276_v0 = vmov 0.0   ;;  %vm277_vm1 = vmmov 0   ;;  %v278_v3 = vmov 0   ;;  %s395_s2 = inlined_call_operand.vmem [shape: s8[32,32], index: 2, kind: input, shape index: {}]   ;;  %s396_s0 = inlined_call_operand.vmem [shape: bf16[16,32], index: 0, kind: input, shape index: {}]   ;;  %s397_s1 = inlined_call_operand.vmem [shape: f32[16,1], index: 1, kind: input, shape index: {}]   ;;  %s398_s3 = inlined_call_operand.vmem [shape: f32[1,32], index: 3, kind: input, shape index: {}]   ;;  %s399_s4 = inlined_call_operand.vmem [shape: f32[1,32], index: 4, kind: input, shape index: {}]   ;;  %s400_s5 = inlined_call_operand.vmem [shape: f32[16,32], index: 5, kind: input, shape index: {}]   ;;  %s401_s8 = inlined_call_operand.vmem [shape: f32[16,32], index: 8, kind: output, shape index: {0}]   ;;  %s402_s6 = inlined_call_operand.vmem [shape: f32[1,32], index: 6, kind: input, shape index: {}]   ;;  %s403_s7 = inlined_call_operand.vmem [shape: f32[1,32], index: 7, kind: input, shape index: {}]   ;;  %s404_s10 = inlined_call_operand.vmem [shape: f32[16,1], index: 10, kind: output, shape index: {2}]   ;;  %s405_s9 = inlined_call_operand.vmem [shape: bf16[16,32], index: 9, kind: output, shape index: {1}]  }
   0x1   :  { %253 = vmatprep.subr.bf16.mxu0 %v276_v0  ;;  %v40_v1 = vld [vmem:[%s395_s2] sm:$0xff]  ;;  %257 = vmatprep.mubr.msk.bf16.mxu0 %vm277_vm1, %v276_v0  ;;  %38 = vst.msk [vmem:[#allocation2] sm:$0xff] %vm37_vm0, %v276_v0  ;;  %39 = vst.msk [vmem:[#allocation2 + $0x8] sm:$0xff] %vm37_vm0, %v276_v0  ;;  %v107_v6 = vld [vmem:[%s397_s1 + $0x8] sm:$0xff]  ;;  %vm223_vm2 = vcmask 7168   ;;  %vm220_vm3 = vcmask 257024  }
   0x2   :  { %v41_v2 = vunpack.c.l.s8.bf16 %v40_v1  ;;  %266 = vset.pattern.permute.xlu0 %v278_v3  ;;  %v106_v4 = vld [vmem:[%s397_s1] sm:$0xff]  ;;  %v42_v5 = vunpack.c.h.s8.bf16 %v40_v1  ;;  %v139_v28 = vld [vmem:[%s400_s5 + $0x8] sm:$0xff] }
   0x3   :  { %110 = vperm.xlu0 %266, %v106_v4   ;;  %v267_v7 = vld [vmem:[%s396_s0] sm:$0xff]  }
   0x4   :  { %254 = vmatpush3.bf16.msra.mxu0 %v41_v2  ;;  %v240_v17 = vld [vmem:[%s398_s3] ss:$0 sm:$0xff] }
   0x5   :  { %255 = vmatprep.subr.bf16.mxu0 %v276_v0  ;;  %v241_v20 = vld [vmem:[%s399_s4] ss:$0 sm:$0xff] }
   0x6   :  { %v138_v25 = vld [vmem:[%s400_s5] sm:$0xff] }
   0x7   :  { %115 = vperm.xlu0 %266, %v107_v6   ;;  %v242_v51 = vld [vmem:[%s402_s6] ss:$0 sm:$0xff] }
   0x8   :  { %256 = vmatpush3.bf16.msra.mxu0 %v42_v5  ;;  %v43_v8 = vld [vmem:[#allocation2] sm:$0xff]  ;;  %v44_v10 = vld [vmem:[#allocation2 + $0x8] sm:$0xff] }
   0x9   :  { %v243_v53 = vld [vmem:[%s403_s7] ss:$0 sm:$0xff] }
   0xb   :  { %258 = vmatmul.mubr.msk.bf16.vlgmr.msra.gmra.mrb[0].mxu0 %vm37_vm0, %v267_v7 }
  0x82   :  { %v111_v16 = vpop.permute.xlu0 %110 }
  0x86   :  { %v116_v21 = vpop.permute.xlu0 %115 }
  0xde   :  { %v90_v9 = vpop.f32.mrb[0].mxu0 }
  0xdf   :  { %v97_v11 = vadd.f32 %v90_v9, %v43_v8  ;;  %v259_v12 = vpop.f32.mrb[1].mxu0 }
  0xe0   :  { %v93_v13 = vpop.f32.mrb[2].mxu0 }
  0xe1   :  { %99 = vst.msk [vmem:[#allocation2] sm:$0xff] %vm37_vm0, %v97_v11  ;;  %v98_v14 = vadd.f32 %v93_v13, %v44_v10  ;;  %v260_v15 = vpop.f32.mrb[3].mxu0 }
  0xe3   :  { %100 = vst.msk [vmem:[#allocation2 + $0x8] sm:$0xff] %vm37_vm0, %v98_v14 }
  0xe8   :  { %v104_v18 = vld [vmem:[#allocation2] sm:$0xff] }
  0xe9   :  { %v118_v19 = vmul.f32 %v111_v16, %v104_v18 }
  0xea   :  { %v105_v22 = vld [vmem:[#allocation2 + $0x8] sm:$0xff] }
  0xeb   :  { %v127_v23 = vmul.f32 %v240_v17, %v118_v19  ;;  %v119_v24 = vmul.f32 %v116_v21, %v105_v22 }
  0xed   :  { %v136_v26 = vadd.f32 %v241_v20, %v127_v23  ;;  %v128_v27 = vmul.f32 %v240_v17, %v119_v24 }
  0xef   :  { %v137_v29 = vadd.f32 %v241_v20, %v128_v27  ;;  %v140_v30 = vadd.f32 %v138_v25, %v136_v26 }
  0xf1   :  { %v144_v31 = vsel %vm37_vm0, %v140_v30, 0.0  ;;  %142 = vst.msk [vmem:[%s401_s8] sm:$0xff] %vm37_vm0, %v140_v30  ;;  %v141_v32 = vadd.f32 %v139_v28, %v137_v29 }
  0xf2   :  { %145 = vadd.xlane.f32.xlu1 %v144_v31 }
  0xf3   :  { %143 = vst.msk [vmem:[%s401_s8 + $0x8] sm:$0xff] %vm37_vm0, %v141_v32  ;;  %v147_v33 = vsel %vm37_vm0, %v141_v32, 0.0 }
  0xf6   :  { %148 = vadd.xlane.f32.xlu1 %v147_v33 }
 0x17f   :  { %v146_v34 = vpop.xlane.xlu1 %145 }
 0x180   :  { %v151_v35 = vmul.f32 0.03125, %v146_v34 }
 0x182   :  { %v153_v36 = vsub.f32 %v140_v30, %v151_v35 }
 0x183   :  { %v149_v37 = vpop.xlane.xlu1 %148 }
 0x184   :  { %v152_v38 = vmul.f32 0.03125, %v149_v37  ;;  %v155_v39 = vmul.f32 %v153_v36, %v153_v36 }
 0x186   :  { %v154_v40 = vsub.f32 %v141_v32, %v152_v38  ;;  %v157_v41 = vsel %vm37_vm0, %v155_v39, 0.0 }
 0x187   :  { %158 = vadd.xlane.f32.xlu0 %v157_v41 }
 0x188   :  { %v156_v42 = vmul.f32 %v154_v40, %v154_v40 }
 0x18a   :  { %v160_v43 = vsel %vm37_vm0, %v156_v42, 0.0 }
 0x18b   :  { %161 = vadd.xlane.f32.xlu1 %v160_v43 }
 0x214   :  { %v159_v44 = vpop.xlane.xlu0 %158 }
 0x215   :  { %v163_v45 = vmul.f32 0.03125, %v159_v44 }
 0x217   :  { %v165_v46 = vadd.f32 1e-05, %v163_v45 }
 0x218   :  { %v162_v47 = vpop.xlane.xlu1 %161 }
 0x219   :  { %268 = vrsqrt.f32 %v165_v46  ;;  %v164_v48 = vmul.f32 0.03125, %v162_v47 }
 0x21b   :  { %v166_v49 = vadd.f32 1e-05, %v164_v48 }
 0x21d   :  { %270 = vrsqrt.f32 %v166_v49 }
 0x223   :  { %v269_v50 = vpop.eup %268 }
 0x224   :  { %v169_v52 = vmul.f32 %v269_v50, %v153_v36 }
 0x226   :  { %v178_v54 = vmul.f32 %v242_v51, %v169_v52 }
 0x227   :  { %v271_v55 = vpop.eup %270 }
 0x228   :  { %v187_v56 = vadd.f32 %v243_v53, %v178_v54  ;;  %v170_v57 = vmul.f32 %v271_v55, %v154_v40 }
 0x22a   :  { %v189_v58 = vand.u32 2147483647, %v187_v56  ;;  %v179_v59 = vmul.f32 %v242_v51, %v170_v57 }
 0x22c   :  { %v191_v60 = vsel %vm37_vm0, %v189_v58, -inf  ;;  %v188_v61 = vadd.f32 %v243_v53, %v179_v59 }
 0x22d   :  { %192 = vmax.xlane.f32.xlu1 %v191_v60 }
 0x22e   :  { %v190_v62 = vand.u32 2147483647, %v188_v61 }
 0x230   :  { %v194_v63 = vsel %vm37_vm0, %v190_v62, -inf }
 0x231   :  { %195 = vmax.xlane.f32.xlu1 %v194_v63 }
 0x2ba   :  { %v193_v0 = vpop.xlane.xlu1 %192 }
 0x2bb   :  { %v197_v1 = vmax.f32 %v193_v0, 1e-08 }
 0x2bd   :  { %v200_v2 = vmul.f32 0.007874016, %v197_v1 }
 0x2be   :  { %v196_v3 = vpop.xlane.xlu1 %195 }
 0x2bf   :  { %272 = vrcp.f32 %v200_v2  ;;  %224 = vst.msk [vmem:[%s404_s10] sm:$0xff] %vm223_vm2, %v200_v2  ;;  %v198_v4 = vmax.f32 %v196_v3, 1e-08 }
 0x2c1   :  { %v201_v5 = vmul.f32 0.007874016, %v198_v4 }
 0x2c3   :  { %274 = vrcp.f32 %v201_v5  ;;  %225 = vst.msk [vmem:[%s404_s10 + $0x8] sm:$0xff] %vm223_vm2, %v201_v5 }
 0x2c9   :  { %v273_v6 = vpop.eup %272 }
 0x2ca   :  { %v203_v7 = vmul.f32 %v273_v6, %v187_v56 }
 0x2cc   :  { %v261_v8 = vround.rtne.f32 %v203_v7 }
 0x2cd   :  { %v275_v9 = vpop.eup %274 }
 0x2ce   :  { %v244_v10 = vclamps-f32 %v261_v8, 127.0  ;;  %v205_v11 = vmul.f32 %v275_v9, %v188_v61 }
 0x2d0   :  { %v248_v12 = vpack.c.bf16 %v244_v10, %v244_v10  ;;  %v262_v13 = vround.rtne.f32 %v205_v11 }
 0x2d2   :  { %221 = vst.msk [vmem:[%s405_s9] sm:$0xf] %vm220_vm3, %v248_v12  ;;  %v245_v14 = vclamps-f32 %v262_v13, 127.0 }
 0x2d4   :  { %v249_v15 = vpack.c.bf16 %v245_v14, %v245_v14 }
 0x2d6   :  { %222 = vst.msk [vmem:[%s405_s9 + $0x4] sm:$0xf] %vm220_vm3, %v249_v15 }

// kernel: quant_opt_decoder_layer.11
= control target key start
LH: loop header
LB: loop body
LE: loop exit
PB: predicated region body
PF: predicated region fallthrough
CT: control target
= control target key end

     0   :  { %s1603_s24 = smov 0   ;;  %s1605_s25 = smov 0   ;;  %s1799_s0 = inlined_call_operand.vmem [shape: bf16[2,4,8,8], index: 0, kind: input, shape index: {}]   ;;  %s1800_s1 = inlined_call_operand.vmem [shape: bf16[2,4,8,8], index: 1, kind: input, shape index: {}]   ;;  %s1801_s2 = inlined_call_operand.vmem [shape: bf16[2,4,8,8], index: 2, kind: input, shape index: {}]   ;;  %s1802_s3 = inlined_call_operand.vmem [shape: f32[2,8,1], index: 3, kind: input, shape index: {}]   ;;  %s1803_s4 = inlined_call_operand.vmem [shape: f32[2,1,8], index: 4, kind: input, shape index: {}]   ;;  %s1804_s5 = inlined_call_operand.vmem [shape: f32[2,1,8], index: 5, kind: input, shape index: {}]   ;;  %s1805_s6 = inlined_call_operand.vmem [shape: f32[2,1,8,8], index: 6, kind: input, shape index: {}]   ;;  %s1806_s7 = inlined_call_operand.vmem [shape: f32[2,8,32], index: 7, kind: output, shape index: {}]  }
   0x1   :  { %s1607_s26 = smov 0  }
   0x2 LB: > { %s43_s27 = sadd.s32 1, %s1550_s25  ;;  %p1386_p0 = scmp.ge.s32.totalorder %s1554_s26, 1  ;;  %s1554_s26 = sphi %s1607_s26, %s17_s26   ;;  %s1550_s25 = sphi %s1605_s25, %s1808_s25   ;;  %s1546_s24 = sphi %s1603_s24, %s1807_s24  }
   0x3   : > { %p45_p1 = scmp.ge.s32.totalorder %s43_s27, 2  ;;  %p382_p2 = scmp.lt.s32.totalorder %s1554_s26, 3 }
   0x5   : > { %s1810_s27 = smov (%p45_p1, %s43_s27), 0  ;;  %p383_p3 = pnand %p1386_p0, %p382_p2 }
   0x6   : > { %p480_p4 = scmp.lt.s32.totalorder (!%p383_p3), %s1546_s24, 1  ;;  %vm571_vm0 = vcmask (!%p383_p3), 64512   ;;  %v1556_v0 = vmov (!%p383_p3), 0.0   ;;  %vm1557_vm1 = vmmov (!%p383_p3), 0   ;;  %v1558_v1 = vmov (!%p383_p3), 0   ;;  %s1561_s10 = smov (!%p383_p3), 16  }
   0x7   : > { %386 = sbr.rel (%p383_p3) target bundleno = 952 (0x3b8), region = 48  ;;  %1427 = vmatprep.subr.bf16.mxu0 (!%p383_p3), %v1556_v0  ;;  %1433 = vmatprep.subr.bf16.mxu1 (!%p383_p3), %v1556_v0  ;;  %572 = vst.msk [vmem:[#allocation4] sm:$0xff] (!%p383_p3), %vm571_vm0, %v1556_v0  ;;  %573 = vst.msk [vmem:[#allocation4 + $0x8] sm:$0xff] (!%p383_p3), %vm571_vm0, %v1556_v0  ;;  %vm562_vm2 = vcmask (!%p383_p3), 7168   ;;  %v1559_v15 = vmov (!%p383_p3), -inf   ;;  %vm939_vm3 = vcmask (!%p383_p3), 1043456  }
   0x8   : > { %574 = vst.msk [vmem:[#allocation4 + $0x10] sm:$0xff] (!%p383_p3), %vm571_vm0, %v1556_v0  ;;  %575 = vst.msk [vmem:[#allocation4 + $0x18] sm:$0xff] (!%p383_p3), %vm571_vm0, %v1556_v0  ;;  %1429 = vmatprep.mubr.msk.bf16.mxu0 (!%p383_p3), %vm1557_vm1, %v1556_v0  ;;  %1435 = vmatprep.mubr.msk.bf16.mxu1 (!%p383_p3), %vm1557_vm1, %v1556_v0  ;;  %s1562_s11 = smov (!%p383_p3), 24   ;;  %vm1173_vm4 = vcmask (!%p383_p3), 130112   ;;  %vm1179_vm5 = vcmask (!%p383_p3), 195712   ;;  %vm1185_vm6 = vcmask (!%p383_p3), 261312  }
   0x9   : > { %1506 = vset.pattern.permute.xlu0 (!%p383_p3), %v1558_v1  ;;  %1507 = vset.pattern.permute.xlu1 (!%p383_p3), %v1558_v1  ;;  %563 = vst.msk [vmem:[#allocation2] sm:$0xff] (!%p383_p3), %vm562_vm2, %v1559_v15  ;;  %564 = vst.msk [vmem:[#allocation2 + $0x8] sm:$0xff] (!%p383_p3), %vm562_vm2, %v1559_v15 }
   0xa   : > { %565 = vst.msk [vmem:[#allocation2 + $0x10] sm:$0xff] (!%p383_p3), %vm562_vm2, %v1559_v15  ;;  %566 = vst.msk [vmem:[#allocation2 + $0x18] sm:$0xff] (!%p383_p3), %vm562_vm2, %v1559_v15 }
   0xb   : > { %567 = vst.msk [vmem:[#allocation3] sm:$0xff] (!%p383_p3), %vm562_vm2, %v1556_v0  ;;  %568 = vst.msk [vmem:[#allocation3 + $0x8] sm:$0xff] (!%p383_p3), %vm562_vm2, %v1556_v0 }
   0xc   : > { %569 = vst.msk [vmem:[#allocation3 + $0x10] sm:$0xff] (!%p383_p3), %vm562_vm2, %v1556_v0  ;;  %570 = vst.msk [vmem:[#allocation3 + $0x18] sm:$0xff] (!%p383_p3), %vm562_vm2, %v1556_v0 }
   0xe   : > { %s1812_s24 = smov (!%p480_p4, %s1546_s24), 1 }
   0xf   : > { %s1638_s28 = sshll.u32 %s1812_s24, 4  ;;  %s1641_s29 = sshll.u32 %s1812_s24, 3 }
  0x10   : > { %s503_s9 = scalar_lea.vmem %s1800_s1, %s1638_s28  ;;  %s524_s12 = scalar_lea.vmem %s1802_s3, %s1641_s29  ;;  %v1702_v48 = vld [vmem:[#allocation2] sm:$0xff]  ;;  %v1704_v49 = vld [vmem:[#allocation2 + $0x8] sm:$0xff] }
  0x11   : > { %v580_v2 = vld [vmem:[%s503_s9] sm:$0xf]  ;;  %v581_v3 = vld [vmem:[%s503_s9 + $0x4] sm:$0xf]  ;;  %s490_s15 = scalar_lea.vmem %s1799_s0, %s1638_s28  ;;  %v582_v7 = vld [vmem:[%s503_s9 + $0x8] sm:$0xf]  ;;  %s530_s18 = scalar_lea.vmem %s1803_s4, %s1812_s24 }
  0x12   : > { %v597_v4 = vsel %vm571_vm0, %v580_v2, 0  ;;  %v643_v5 = vsel %vm571_vm0, %v581_v3, 0  ;;  %v588_v6 = vld [vmem:[%s524_s12] sm:$0xff]  ;;  %v583_v8 = vld [vmem:[%s503_s9 + $0xc] sm:$0xf]  ;;  %v689_v11 = vsel %vm571_vm0, %v582_v7, 0  ;;  %s546_s21 = scalar_lea.vmem %s1805_s6, %s1641_s29  ;;  %s516_s30 = scalar_lea.vmem %s1801_s2, %s1638_s28 }
  0x13   : > { %1428 = vmatpush3.bf16.xpose.msra.mxu0 %v597_v4  ;;  %1434 = vmatpush3.bf16.xpose.msra.mxu1 %v643_v5  ;;  %v576_v9 = vld [vmem:[%s490_s15] sm:$0xf]  ;;  %v577_v10 = vld [vmem:[%s490_s15 + $0x4] sm:$0xf]  ;;  %v735_v12 = vsel %vm571_vm0, %v583_v8, 0  ;;  %v1721_v56 = vld [vmem:[#allocation2 + $0x10] sm:$0xff]  ;;  %s536_s9 = scalar_lea.vmem %s1804_s5, %s1812_s24  ;;  %s556_s14 = scalar_lea.vmem %s1806_s7, %s1641_s29 }
  0x14   : > { %1439 = vmatprep.subr.bf16.mxu0 %v1556_v0  ;;  %1445 = vmatprep.subr.bf16.mxu1 %v1556_v0  ;;  %v578_v13 = vld [vmem:[%s490_s15 + $0x8] sm:$0xf]  ;;  %v579_v14 = vld [vmem:[%s490_s15 + $0xc] sm:$0xf]  ;;  %v1400_v16 = vld [vmem:[%s530_s18] ss:$0 sm:$0xff] }
  0x15   : > { %779 = vperm.xlu0 %1506, %v588_v6   ;;  %v591_v19 = vld [vmem:[%s546_s21] sm:$0xff]  ;;  %v1727_v59 = vld [vmem:[#allocation2 + $0x18] sm:$0xff]  ;;  %v586_v5 = vld [vmem:[%s516_s30 + $0x8] sm:$0xf]  ;;  %s1560_s24 = smov 8  }
  0x16   : > { %v584_v1 = vld [vmem:[%s516_s30] sm:$0xf]  ;;  %v585_v3 = vld [vmem:[%s516_s30 + $0x4] sm:$0xf]  ;;  %v1033_v6 = vsel %vm939_vm3, %v586_v5, 0 }
  0x17   : > { %v941_v2 = vsel %vm939_vm3, %v584_v1, 0  ;;  %v987_v4 = vsel %vm939_vm3, %v585_v3, 0  ;;  %v587_v7 = vld [vmem:[%s516_s30 + $0xc] sm:$0xf] }
  0x18   : > { %v1079_v8 = vsel %vm939_vm3, %v587_v7, 0 }
  0x1a   : > { %1430 = vmatmul.mubr.msk.bf16.vlgmr.msra.gmra.mrb[0].mxu0 %vm571_vm0, %v576_v9  ;;  %1436 = vmatmul.mubr.msk.bf16.vlgmr.msra.gmra.mrb[0].mxu1 %vm571_vm0, %v577_v10 }
  0x1b   : > { %1440 = vmatpush3.bf16.xpose.msra.mxu0 %v689_v11  ;;  %1446 = vmatpush3.bf16.xpose.msra.mxu1 %v735_v12 }
  0x1c   : > { %1441 = vmatprep.mubr.msk.bf16.mxu0 %vm1557_vm1, %v1556_v0  ;;  %1447 = vmatprep.mubr.msk.bf16.mxu1 %vm1557_vm1, %v1556_v0 }
  0x1d   : > { %1451 = vmatprep.subr.bf16.mxu0 %v1556_v0  ;;  %1457 = vmatprep.subr.bf16.mxu1 %v1556_v0 }
  0x22   : > { %1442 = vmatmul.mubr.msk.bf16.vlgmr.msra.gmra.mrb[4].mxu0 %vm571_vm0, %v578_v13  ;;  %1448 = vmatmul.mubr.msk.bf16.vlgmr.msra.gmra.mrb[4].mxu1 %vm571_vm0, %v579_v14 }
  0x23   : > { %1453 = vmatprep.mubr.msk.bf16.mxu0 %vm1557_vm1, %v1556_v0  ;;  %1459 = vmatprep.mubr.msk.bf16.mxu1 %vm1557_vm1, %v1556_v0 }
  0x24   : > { %1452 = vmatpush3.bf16.msra.mxu0 %v941_v2  ;;  %1458 = vmatpush3.bf16.msra.mxu1 %v987_v4 }
  0x25   : > { %1463 = vmatprep.subr.bf16.mxu0 %v1556_v0  ;;  %1469 = vmatprep.subr.bf16.mxu1 %v1556_v0 }
  0x94   : > { %v780_v17 = vpop.permute.xlu0 %779 }
  0x95   : > { %v788_v18 = vmul.f32 %v1400_v16, %v780_v17 }
  0xed   : > { %v633_v20 = vpop.f32.mrb[0].mxu0  ;;  %v679_v21 = vpop.f32.mrb[0].mxu1 }
  0xee   : > { %v789_v22 = vmul.f32 %v788_v18, %v633_v20  ;;  %v1431_v23 = vpop.f32.mrb[1].mxu0  ;;  %v790_v24 = vmul.f32 %v788_v18, %v679_v21  ;;  %v1437_v25 = vpop.f32.mrb[1].mxu1  ;;  %v1401_v20 = vld [vmem:[%s536_s9] ss:$0 sm:$0xff] }
  0xef   : > { %v636_v26 = vpop.f32.mrb[2].mxu0  ;;  %v682_v27 = vpop.f32.mrb[2].mxu1 }
  0xf0   : > { %v1432_v28 = vpop.f32.mrb[3].mxu0  ;;  %v1438_v29 = vpop.f32.mrb[3].mxu1  ;;  %v793_v30 = vadd.f32 %v789_v22, %v591_v19  ;;  %v1695_v31 = vadd.f32 %v790_v24, %v591_v19 }
  0xf2   : > { %v801_v32 = vsel %vm571_vm0, %v793_v30, -inf  ;;  %v804_v33 = vsel %vm571_vm0, %v1695_v31, -inf }
  0xf3   : > { %802 = vmax.xlane.f32.xlu0 %v801_v32  ;;  %805 = vmax.xlane.f32.xlu1 %v804_v33 }
  0xf5   : > { %v725_v34 = vpop.f32.mrb[4].mxu0  ;;  %v771_v35 = vpop.f32.mrb[4].mxu1 }
  0xf6   : > { %v791_v36 = vmul.f32 %v788_v18, %v725_v34  ;;  %v792_v37 = vmul.f32 %v788_v18, %v771_v35  ;;  %v1443_v38 = vpop.f32.mrb[5].mxu0  ;;  %v1449_v39 = vpop.f32.mrb[5].mxu1 }
  0xf7   : > { %v728_v40 = vpop.f32.mrb[6].mxu0  ;;  %v774_v41 = vpop.f32.mrb[6].mxu1 }
  0xf8   : > { %v1444_v42 = vpop.f32.mrb[7].mxu0  ;;  %v1450_v43 = vpop.f32.mrb[7].mxu1  ;;  %v795_v44 = vadd.f32 %v791_v36, %v591_v19  ;;  %v796_v45 = vadd.f32 %v792_v37, %v591_v19 }
  0xfa   : > { %v807_v46 = vsel %vm571_vm0, %v795_v44, -inf  ;;  %v810_v47 = vsel %vm571_vm0, %v796_v45, -inf }
  0xfb   : > { %808 = vmax.xlane.f32.xlu1 %v807_v46 }
  0xff   : > { %811 = vmax.xlane.f32.xlu1 %v810_v47  ;;  %v863_v47 = vld [vmem:[#allocation3 + $0x10] sm:$0xff] }
 0x180   : > { %v803_v50 = vpop.xlane.xlu0 %802  ;;  %v806_v51 = vpop.xlane.xlu1 %805 }
 0x181   : > { %v1707_v52 = vmax.f32 %v1702_v48, %v803_v50  ;;  %v1710_v53 = vmax.f32 %v1704_v49, %v806_v51 }
 0x183   : > { %v817_v54 = vsub.f32 %v1702_v48, %v1707_v52  ;;  %890 = vst.msk [vmem:[#allocation2] sm:$0xff] %vm562_vm2, %v1707_v52  ;;  %831 = vperm.xlu1 %1507, %v1707_v52   ;;  %v818_v55 = vsub.f32 %v1704_v49, %v1710_v53  ;;  %891 = vst.msk [vmem:[#allocation2 + $0x8] sm:$0xff] %vm562_vm2, %v1710_v53 }
 0x185   : > { %v821_v43 = vmul.f32 1.442695, %v817_v54 }
 0x187   : > { %836 = vperm.xlu1 %1507, %v1710_v53   ;;  %v864_v53 = vld [vmem:[#allocation3 + $0x18] sm:$0xff] }
 0x188   : > { %v809_v57 = vpop.xlane.xlu1 %808 }
 0x189   : > { %v1725_v58 = vmax.f32 %v1721_v56, %v809_v57 }
 0x18b   : > { %v819_v60 = vsub.f32 %v1721_v56, %v1725_v58  ;;  %892 = vst.msk [vmem:[#allocation2 + $0x10] sm:$0xff] %vm562_vm2, %v1725_v58  ;;  %841 = vperm.xlu1 %1507, %v1725_v58  }
 0x18c   : > { %v812_v61 = vpop.xlane.xlu1 %811 }
 0x18d   : > { %v1735_v62 = vmax.f32 %v1727_v59, %v812_v61  ;;  %v825_v37 = vmul.f32 1.442695, %v819_v60 }
 0x18f   : > { %v820_v63 = vsub.f32 %v1727_v59, %v1735_v62  ;;  %893 = vst.msk [vmem:[#allocation2 + $0x18] sm:$0xff] %vm562_vm2, %v1735_v62  ;;  %846 = vperm.xlu0 %1506, %v1735_v62   ;;  %v861_v59 = vld [vmem:[#allocation3] sm:$0xff] }
 0x191   : > { %v827_v39 = vmul.f32 1.442695, %v820_v63 }
 0x202   : > { %v832_v9 = vpop.permute.xlu1 %831 }
 0x203   : > { %v849_v10 = vsub.f32 %v793_v30, %v832_v9 }
 0x205   : > { %v853_v11 = vmul.f32 1.442695, %v849_v10 }
 0x206   : > { %v837_v12 = vpop.permute.xlu1 %836 }
 0x207   : > { %1508 = vpow2.f32 %v853_v11  ;;  %v850_v13 = vsub.f32 %v1695_v31, %v837_v12 }
 0x209   : > { %v855_v14 = vmul.f32 1.442695, %v850_v13  ;;  %v910_v13 = vld [vmem:[#allocation4 + $0x10] sm:$0xff] }
 0x20a   : > { %v842_v15 = vpop.permute.xlu1 %841 }
 0x20b   : > { %1510 = vpow2.f32 %v855_v14  ;;  %v851_v16 = vsub.f32 %v795_v44, %v842_v15  ;;  %v862_v44 = vld [vmem:[#allocation3 + $0x8] sm:$0xff] }
 0x20d   : > { %v857_v17 = vmul.f32 1.442695, %v851_v16 }
 0x20e   : > { %v847_v18 = vpop.permute.xlu0 %846 }
 0x20f   : > { %1512 = vpow2.f32 %v857_v17  ;;  %v852_v19 = vsub.f32 %v796_v45, %v847_v18 }
 0x211   : > { %v1509_v21 = vpop.eup %1508  ;;  %v859_v22 = vmul.f32 1.442695, %v852_v19 }
 0x212   : > { %v900_v23 = vmul.f32 %v1509_v21, %v1401_v20  ;;  %v869_v38 = vsel %vm571_vm0, %v1509_v21, 0.0  ;;  %v911_v21 = vld [vmem:[#allocation4 + $0x18] sm:$0xff] }
 0x213   : > { %1514 = vpow2.f32 %v859_v22 }
 0x214   : > { %v904_v24 = vpack.c.bf16 %v900_v23, %v900_v23  ;;  %1516 = vpow2.f32 %v825_v37 }
 0x215   : > { %v1511_v25 = vpop.eup %1510 }
 0x216   : > { %1454 = vmatmul.mubr.msk.bf16.vlgmr.msra.gmra.mrb[8].mxu0 %vm571_vm0, %v904_v24  ;;  %v872_v26 = vsel %vm571_vm0, %v1511_v25, 0.0  ;;  %v901_v27 = vmul.f32 %v1511_v25, %v1401_v20 }
 0x217   : > { %873 = vadd.xlane.f32.xlu1 %v872_v26  ;;  %1464 = vmatpush3.bf16.msra.mxu0 %v1033_v6  ;;  %v909_v6 = vld [vmem:[#allocation4 + $0x8] sm:$0xff] }
 0x218   : > { %v905_v28 = vpack.c.bf16 %v901_v27, %v901_v27  ;;  %1465 = vmatprep.mubr.msk.bf16.mxu0 %vm1557_vm1, %v1556_v0 }
 0x219   : > { %v1513_v29 = vpop.eup %1512 }
 0x21a   : > { %1460 = vmatmul.mubr.msk.bf16.vlgmr.msra.gmra.mrb[8].mxu1 %vm571_vm0, %v905_v28  ;;  %v875_v30 = vsel %vm571_vm0, %v1513_v29, 0.0  ;;  %v902_v31 = vmul.f32 %v1513_v29, %v1401_v20 }
 0x21b   : > { %876 = vadd.xlane.f32.xlu0 %v875_v30  ;;  %1470 = vmatpush3.bf16.msra.mxu1 %v1079_v8 }
 0x21c   : > { %v906_v32 = vpack.c.bf16 %v902_v31, %v902_v31  ;;  %1471 = vmatprep.mubr.msk.bf16.mxu1 %vm1557_vm1, %v1556_v0  ;;  %v823_v0 = vmul.f32 1.442695, %v818_v55 }
 0x21d   : > { %v1515_v33 = vpop.eup %1514 }
 0x21e   : > { %1466 = vmatmul.mubr.msk.bf16.vlgmr.msra.gmra.mrb[12].mxu0 %vm571_vm0, %v906_v32  ;;  %v878_v34 = vsel %vm571_vm0, %v1515_v33, 0.0  ;;  %v903_v35 = vmul.f32 %v1515_v33, %v1401_v20  ;;  %1518 = vpow2.f32 %v823_v0  ;;  %v1517_v40 = vpop.eup %1516 }
 0x21f   : > { %879 = vadd.xlane.f32.xlu1 %v878_v34  ;;  %1520 = vpow2.f32 %v827_v39  ;;  %v867_v50 = vmul.f32 %v1517_v40, %v863_v47  ;;  %v908_v39 = vld [vmem:[#allocation4] sm:$0xff] }
 0x220   : > { %v907_v36 = vpack.c.bf16 %v903_v35, %v903_v35  ;;  %1522 = vpow2.f32 %v821_v43 }
 0x222   : > { %1472 = vmatmul.mubr.msk.bf16.vlgmr.msra.gmra.mrb[12].mxu1 %vm571_vm0, %v907_v36 }
 0x223   : > { %870 = vadd.xlane.f32.xlu1 %v869_v38 }
 0x228   : > { %v1519_v41 = vpop.eup %1518 }
 0x229   : > { %v1521_v42 = vpop.eup %1520  ;;  %v866_v45 = vmul.f32 %v1519_v41, %v862_v44 }
 0x22a   : > { %v868_v56 = vmul.f32 %v1521_v42, %v864_v53  ;;  %v1523_v57 = vpop.eup %1522 }
 0x22b   : > { %v865_v54 = vmul.f32 %v1523_v57, %v861_v59 }
 0x231   : > { %924 = vperm.xlu0 %1506, %v1517_v40  }
 0x234   : > { %919 = vperm.xlu1 %1507, %v1519_v41  }
 0x238   : > { %929 = vperm.xlu1 %1507, %v1521_v42  }
 0x2a4   : > { %v874_v46 = vpop.xlane.xlu1 %873 }
 0x2a5   : > { %v882_v49 = vadd.f32 %v874_v46, %v866_v45 }
 0x2a7   : > { %887 = vst.msk [vmem:[#allocation3 + $0x8] sm:$0xff] %vm562_vm2, %v882_v49 }
 0x2a8   : > { %v877_v51 = vpop.xlane.xlu0 %876 }
 0x2a9   : > { %v883_v55 = vadd.f32 %v877_v51, %v867_v50 }
 0x2ab   : > { %888 = vst.msk [vmem:[#allocation3 + $0x10] sm:$0xff] %vm562_vm2, %v883_v55 }
 0x2ac   : > { %v880_v58 = vpop.xlane.xlu1 %879 }
 0x2ad   : > { %v884_v48 = vadd.f32 %v880_v58, %v868_v56 }
 0x2ae   : > { %v1137_v52 = vld [vmem:[#allocation3 + $0x8] sm:$0xff] }
 0x2af   : > { %889 = vst.msk [vmem:[#allocation3 + $0x18] sm:$0xff] %vm562_vm2, %v884_v48  ;;  %1524 = vrcp.f32 %v1137_v52 }
 0x2b0   : > { %v871_v60 = vpop.xlane.xlu1 %870  ;;  %v925_v14 = vpop.permute.xlu0 %924 }
 0x2b1   : > { %v881_v61 = vadd.f32 %v871_v60, %v865_v54  ;;  %v934_v19 = vmul.f32 %v925_v14, %v910_v13 }
 0x2b2   : > { %v1138_v62 = vld [vmem:[#allocation3 + $0x10] sm:$0xff] }
 0x2b3   : > { %886 = vst.msk [vmem:[#allocation3] sm:$0xff] %vm562_vm2, %v881_v61  ;;  %1526 = vrcp.f32 %v1138_v62 }
 0x2b4   : > { %v920_v7 = vpop.permute.xlu1 %919 }
 0x2b5   : > { %v933_v11 = vmul.f32 %v920_v7, %v909_v6 }
 0x2b6   : > { %v1139_v63 = vld [vmem:[#allocation3 + $0x18] sm:$0xff] }
 0x2b7   : > { %1528 = vrcp.f32 %v1139_v63 }
 0x2b8   : > { %v930_v22 = vpop.permute.xlu1 %929 }
 0x2b9   : > { %v1525_v1 = vpop.eup %1524  ;;  %v935_v27 = vmul.f32 %v930_v22, %v911_v21 }
 0x2ba   : > { %1151 = vperm.xlu1 %1507, %v1525_v1   ;;  %v1136_v2 = vld [vmem:[#allocation3] sm:$0xff] }
 0x2bb   : > { %1530 = vrcp.f32 %v1136_v2 }
 0x2bd   : > { %v1527_v3 = vpop.eup %1526 }
 0x2be   : > { %1156 = vperm.xlu1 %1507, %v1527_v3  }
 0x2c1   : > { %v1529_v4 = vpop.eup %1528 }
 0x2c2   : > { %914 = vperm.xlu1 %1507, %v1523_v57   ;;  %1161 = vperm.xlu0 %1506, %v1529_v4  }
 0x2c5   : > { %v1531_v5 = vpop.eup %1530 }
 0x2c6   : > { %1146 = vperm.xlu0 %1506, %v1531_v5  }
 0x2e9   : > { %v977_v8 = vpop.f32.mrb[8].mxu0 }
 0x2ea   : > { %v1455_v9 = vpop.f32.mrb[9].mxu0 }
 0x2eb   : > { %v980_v10 = vpop.f32.mrb[10].mxu0 }
 0x2ec   : > { %v1456_v12 = vpop.f32.mrb[11].mxu0 }
 0x2ed   : > { %v1023_v15 = vpop.f32.mrb[8].mxu1 }
 0x2ee   : > { %v1122_v16 = vadd.f32 %v1023_v15, %v933_v11  ;;  %v1461_v17 = vpop.f32.mrb[9].mxu1 }
 0x2ef   : > { %v1026_v18 = vpop.f32.mrb[10].mxu1 }
 0x2f0   : > { %1126 = vst.msk [vmem:[#allocation4 + $0x8] sm:$0xff] %vm571_vm0, %v1122_v16  ;;  %v1462_v20 = vpop.f32.mrb[11].mxu1 }
 0x2f1   : > { %v1069_v23 = vpop.f32.mrb[12].mxu0 }
 0x2f2   : > { %v1123_v24 = vadd.f32 %v1069_v23, %v934_v19  ;;  %v1467_v25 = vpop.f32.mrb[13].mxu0 }
 0x2f3   : > { %v1072_v26 = vpop.f32.mrb[14].mxu0 }
 0x2f4   : > { %1127 = vst.msk [vmem:[#allocation4 + $0x10] sm:$0xff] %vm571_vm0, %v1123_v24  ;;  %v1468_v28 = vpop.f32.mrb[15].mxu0 }
 0x2f5   : > { %v1115_v29 = vpop.f32.mrb[12].mxu1 }
 0x2f6   : > { %v1124_v30 = vadd.f32 %v1115_v29, %v935_v27  ;;  %v1473_v31 = vpop.f32.mrb[13].mxu1 }
 0x2f7   : > { %v1118_v32 = vpop.f32.mrb[14].mxu1  ;;  %v1133_v34 = vld [vmem:[#allocation4 + $0x8] sm:$0xff] }
 0x2f8   : > { %1128 = vst.msk [vmem:[#allocation4 + $0x18] sm:$0xff] %vm571_vm0, %v1124_v30  ;;  %v1474_v33 = vpop.f32.mrb[15].mxu1 }
 0x2fb   : > { %v1134_v38 = vld [vmem:[#allocation4 + $0x10] sm:$0xff] }
 0x2ff   : > { %v1135_v41 = vld [vmem:[#allocation4 + $0x18] sm:$0xff] }
 0x339   : > { %v1152_v35 = vpop.permute.xlu1 %1151 }
 0x33a   : > { %v1165_v36 = vmul.f32 %v1152_v35, %v1133_v34 }
 0x33c   : > { %1170 = vrot.lane.b32.xlu1 %v1165_v36, %s1560_s24 }
 0x33d   : > { %v1157_v37 = vpop.permute.xlu1 %1156 }
 0x33e   : > { %v1166_v0 = vmul.f32 %v1157_v37, %v1134_v38 }
 0x340   : > { %1176 = vrot.lane.b32.xlu0 %v1166_v0, %s1561_s10 }
 0x341   : > { %v1162_v40 = vpop.permute.xlu0 %1161  ;;  %v915_v42 = vpop.permute.xlu1 %914 }
 0x342   : > { %v1167_v43 = vmul.f32 %v1162_v40, %v1135_v41  ;;  %v932_v44 = vmul.f32 %v915_v42, %v908_v39 }
 0x344   : > { %v1121_v45 = vadd.f32 %v977_v8, %v932_v44  ;;  %1182 = vrot.lane.b32.xlu1 %v1167_v43, %s1562_s11 }
 0x345   : > { %v1147_v46 = vpop.permute.xlu0 %1146 }
 0x346   : > { %1125 = vst.msk [vmem:[#allocation4] sm:$0xff] %vm571_vm0, %v1121_v45 }
 0x34d   : > { %v1132_v47 = vld [vmem:[#allocation4] sm:$0xff] }
 0x34e   : > { %v1164_v49 = vmul.f32 %v1147_v46, %v1132_v47 }
 0x350   : > { %1168 = vst.msk [vmem:[%s556_s14] sm:$0xff] %vm571_vm0, %v1164_v49 }
 0x3ae   : > { %v1171_v50 = vpop.permute.xlu1 %1170 }
 0x3af   : > { %1174 = vst.msk [vmem:[%s556_s14] sm:$0xff] %vm1173_vm4, %v1171_v50 }
 0x3b2   : > { %v1177_v51 = vpop.permute.xlu0 %1176 }
 0x3b3   : > { %1180 = vst.msk [vmem:[%s556_s14] sm:$0xff] %vm1179_vm5, %v1177_v51 }
 0x3b6   : > { %v1183_v53 = vpop.permute.xlu1 %1182 }
 0x3b7   : > { %1186 = vst.msk [vmem:[%s556_s14] sm:$0xff] %vm1185_vm6, %v1183_v53 }
 0x3b8 PF: > { %s17_s26 = sadd.s32 1, %s1554_s26   ;;  %s1807_s24 = smov %s1550_s25 }
 0x3b9   : > { %p14_p5 = scmp.ge.s32.totalorder %s17_s26, 4   ;;  %s1808_s25 = smov %s1810_s27 }
 0x3bb   :  { %16 = sbr.rel (!%p14_p5) target bundleno = 2 (0x2), region = 104 }

// kernel: quant_opt_decoder_layer.14
= control target key start
LH: loop header
LB: loop body
LE: loop exit
PB: predicated region body
PF: predicated region fallthrough
CT: control target
= control target key end

     0   :  { %v208_v0 = vmov 0.0   ;;  %vm209_vm0 = vmmov 0   ;;  %v210_v3 = vmov 0   ;;  %vm41_vm1 = vcmask 261120   ;;  %s273_s2 = inlined_call_operand.vmem [shape: s8[32,128], index: 2, kind: input, shape index: {}]   ;;  %s274_s0 = inlined_call_operand.vmem [shape: bf16[16,32], index: 0, kind: input, shape index: {}]   ;;  %s275_s1 = inlined_call_operand.vmem [shape: f32[16,1], index: 1, kind: input, shape index: {}]   ;;  %s276_s3 = inlined_call_operand.vmem [shape: f32[1,128], index: 3, kind: input, shape index: {}]   ;;  %s277_s4 = inlined_call_operand.vmem [shape: f32[1,128], index: 4, kind: input, shape index: {}]   ;;  %s278_s6 = inlined_call_operand.vmem [shape: f32[16,1], index: 6, kind: output, shape index: {1}]   ;;  %s279_s5 = inlined_call_operand.vmem [shape: bf16[16,128], index: 5, kind: output, shape index: {0}]  }
   0x1   :  { %189 = vmatprep.subr.bf16.mxu0 %v208_v0  ;;  %v29_v1 = vld [vmem:[%s273_s2] sm:$0xff]  ;;  %193 = vmatprep.mubr.msk.bf16.mxu0 %vm209_vm0, %v208_v0  ;;  %v96_v6 = vld [vmem:[%s275_s1 + $0x8] sm:$0xff]  ;;  %vm160_vm2 = vcmask 7168  }
   0x2   :  { %v30_v2 = vunpack.c.l.s8.bf16 %v29_v1  ;;  %202 = vset.pattern.permute.xlu0 %v210_v3  ;;  %v95_v4 = vld [vmem:[%s275_s1] sm:$0xff]  ;;  %v31_v5 = vunpack.c.h.s8.bf16 %v29_v1 }
   0x3   :  { %99 = vperm.xlu0 %202, %v95_v4   ;;  %v203_v7 = vld [vmem:[%s274_s0] sm:$0xff]  }
   0x4   :  { %190 = vmatpush3.bf16.msra.mxu0 %v30_v2  ;;  %v173_v10 = vld [vmem:[%s276_s3] ss:$0 sm:$0xff] }
   0x5   :  { %191 = vmatprep.subr.bf16.mxu0 %v208_v0  ;;  %v174_v15 = vld [vmem:[%s277_s4] ss:$0 sm:$0xff] }
   0x7   :  { %104 = vperm.xlu0 %202, %v96_v6  }
   0x8   :  { %192 = vmatpush3.bf16.msra.mxu0 %v31_v5 }
   0xb   :  { %194 = vmatmul.mubr.msk.bf16.vlgmr.msra.gmra.mrb[0].mxu0 %vm41_vm1, %v203_v7 }
  0x82   :  { %v100_v8 = vpop.permute.xlu0 %99 }
  0x86   :  { %v105_v13 = vpop.permute.xlu0 %104 }
  0xde   :  { %v79_v9 = vpop.f32.mrb[0].mxu0 }
  0xdf   :  { %v107_v11 = vmul.f32 %v100_v8, %v79_v9  ;;  %v195_v12 = vpop.f32.mrb[1].mxu0 }
  0xe0   :  { %v82_v14 = vpop.f32.mrb[2].mxu0 }
  0xe1   :  { %v116_v16 = vmul.f32 %v173_v10, %v107_v11  ;;  %v108_v17 = vmul.f32 %v105_v13, %v82_v14  ;;  %v196_v18 = vpop.f32.mrb[3].mxu0 }
  0xe3   :  { %v117_v19 = vmul.f32 %v173_v10, %v108_v17  ;;  %v125_v20 = vadd.f32 %v174_v15, %v116_v16 }
  0xe5   :  { %v127_v21 = vmax.f32 %v125_v20, 0.0  ;;  %v126_v22 = vadd.f32 %v174_v15, %v117_v19 }
  0xe7   :  { %v129_v23 = vand.u32 2147483647, %v127_v21  ;;  %v128_v24 = vmax.f32 %v126_v22, 0.0 }
  0xe9   :  { %131 = vmax.xlane.f32.xlu1 %v129_v23  ;;  %v130_v25 = vand.u32 2147483647, %v128_v24 }
  0xed   :  { %133 = vmax.xlane.f32.xlu1 %v130_v25 }
 0x176   :  { %v132_v26 = vpop.xlane.xlu1 %131 }
 0x177   :  { %v135_v27 = vmax.f32 %v132_v26, 1e-08 }
 0x179   :  { %v138_v28 = vmul.f32 0.007874016, %v135_v27 }
 0x17a   :  { %v134_v29 = vpop.xlane.xlu1 %133 }
 0x17b   :  { %204 = vrcp.f32 %v138_v28  ;;  %161 = vst.msk [vmem:[%s278_s6] sm:$0xff] %vm160_vm2, %v138_v28  ;;  %v136_v30 = vmax.f32 %v134_v29, 1e-08 }
 0x17d   :  { %v139_v31 = vmul.f32 0.007874016, %v136_v30 }
 0x17f   :  { %206 = vrcp.f32 %v139_v31  ;;  %162 = vst.msk [vmem:[%s278_s6 + $0x8] sm:$0xff] %vm160_vm2, %v139_v31 }
 0x185   :  { %v205_v32 = vpop.eup %204 }
 0x186   :  { %v141_v33 = vmul.f32 %v205_v32, %v127_v21 }
 0x188   :  { %v197_v35 = vround.rtne.f32 %v141_v33 }
 0x189   :  { %v207_v34 = vpop.eup %206 }
 0x18a   :  { %v143_v36 = vmul.f32 %v207_v34, %v128_v24  ;;  %v175_v38 = vclamps-f32 %v197_v35, 127.0 }
 0x18c   :  { %v198_v37 = vround.rtne.f32 %v143_v36 }
 0x18e   :  { %v176_v39 = vclamps-f32 %v198_v37, 127.0 }
 0x190   :  { %v184_v40 = vpack.c.bf16 %v176_v39, %v175_v38 }
 0x192   :  { %185 = vst [vmem:[%s279_s5] sm:$0xff] %v184_v40  }

// kernel: quant_opt_decoder_layer.15
= control target key start
LH: loop header
LB: loop body
LE: loop exit
PB: predicated region body
PF: predicated region fallthrough
CT: control target
= control target key end

     0   :  { %v223_v1 = vmov 0.0   ;;  %vm224_vm0 = vmmov 0   ;;  %v225_v3 = vmov 0   ;;  %vm29_vm1 = vcmask 261120   ;;  %s315_s0 = inlined_call_operand.vmem [shape: bf16[16,128], index: 0, kind: input, shape index: {}]   ;;  %s316_s1 = inlined_call_operand.vmem [shape: f32[16,1], index: 1, kind: input, shape index: {}]   ;;  %s317_s2 = inlined_call_operand.vmem [shape: s8[128,32], index: 2, kind: input, shape index: {}]   ;;  %s318_s3 = inlined_call_operand.vmem [shape: f32[1,32], index: 3, kind: input, shape index: {}]   ;;  %s319_s4 = inlined_call_operand.vmem [shape: f32[1,32], index: 4, kind: input, shape index: {}]   ;;  %s320_s5 = inlined_call_operand.vmem [shape: f32[16,32], index: 5, kind: input, shape index: {}]   ;;  %s321_s6 = inlined_call_operand.hbm [shape: f32[16,32], index: 6, kind: output, shape index: {}]  }
   0x1   :  { %v32_v0 = vld [vmem:[%s317_s2] sm:$0xff]  ;;  %171 = vmatprep.subr.bf16.mxu0 %v223_v1  ;;  %187 = vmatprep.mubr.msk.bf16.mxu0 %vm224_vm0, %v223_v1 }
   0x2   :  { %v36_v2 = vunpack.c.l.s8.bf16 %v32_v0  ;;  %197 = vset.pattern.permute.xlu0 %v225_v3  ;;  %v105_v4 = vld [vmem:[%s316_s1] sm:$0xff]  ;;  %v37_v5 = vunpack.c.h.s8.bf16 %v32_v0 }
   0x3   :  { %109 = vperm.xlu0 %197, %v105_v4  }
   0x4   :  { %172 = vmatpush3.bf16.msra.mxu0 %v36_v2 }
   0x5   :  { %11 = vsyncpa [#allocation4], 0  ;;  %173 = vmatprep.subr.bf16.mxu0 %v223_v1  ;;  %v33_v6 = vld [vmem:[%s317_s2 + $0x8] sm:$0xff]  ;;  %30 = vst.msk [vmem:[#allocation2] sm:$0xff] %vm29_vm1, %v223_v1  ;;  %v34_v10 = vld [vmem:[%s317_s2 + $0x10] sm:$0xff]  ;;  %s226_s14 = smov [#allocation3]  }
   0x6   :  { %v106_v7 = vld [vmem:[%s316_s1 + $0x8] sm:$0xff]  ;;  %31 = vst.msk [vmem:[#allocation2 + $0x8] sm:$0xff] %vm29_vm1, %v223_v1  ;;  %v38_v8 = vunpack.c.l.s8.bf16 %v33_v6  ;;  %v39_v9 = vunpack.c.h.s8.bf16 %v33_v6  ;;  %v40_v11 = vunpack.c.l.s8.bf16 %v34_v10  ;;  %v41_v12 = vunpack.c.h.s8.bf16 %v34_v10  ;;  %v35_v13 = vld [vmem:[%s317_s2 + $0x18] sm:$0xff]  ;;  %v198_v16 = vld [vmem:[%s315_s0] sm:$0xff]   ;;  %s148_s15 = sshll.u32 %s226_s14, 4  ;;  %s149_s15 = int_to_ptr.vmem [resolvable:$true] %s148_s15 }
   0x7   :  { %114 = vperm.xlu0 %197, %v106_v7   ;;  %v42_v14 = vunpack.c.l.s8.bf16 %v35_v13  ;;  %v43_v15 = vunpack.c.h.s8.bf16 %v35_v13  ;;  %v160_v26 = vld [vmem:[%s318_s3] ss:$0 sm:$0xff]  ;;  %v138_v37 = vld [vmem:[%s320_s5 + $0x8] sm:$0xff]  ;;  %p204_p1 = scmp.lt.s32.totalorder %s149_s15, %s149_s15 }
   0x8   :  { %174 = vmatpush3.bf16.msra.mxu0 %v37_v5  ;;  %v161_v29 = vld [vmem:[%s319_s4] ss:$0 sm:$0xff]  ;;  %s199_s4 = scalar_lea.vmem %s149_s15, 256 }
   0x9   :  { %175 = vmatprep.subr.bf16.mxu0 %v223_v1  ;;  %v137_v34 = vld [vmem:[%s320_s5] sm:$0xff]  ;;  %p200_p0 = scmp.ne.s32.totalorder %s149_s15, %s199_s4  ;;  %p205_p2 = scmp.lt.s32.totalorder %s199_s4, %s199_s4 }
   0xb   :  { %p206_p3 = por %p205_p2, %p204_p1 }
   0xc   :  { %176 = vmatpush3.bf16.msra.mxu0 %v38_v8  ;;  %v44_v17 = vld [vmem:[#allocation2] sm:$0xff] }
   0xd   :  { %177 = vmatprep.subr.bf16.mxu0 %v223_v1  ;;  %v45_v19 = vld [vmem:[#allocation2 + $0x8] sm:$0xff]  ;;  %p207_p4 = pnand %p206_p3, %p200_p0 }
  0x10   :  { %178 = vmatpush3.bf16.msra.mxu0 %v39_v9 }
  0x11   :  { %179 = vmatprep.subr.bf16.mxu0 %v223_v1 }
  0x14   :  { %180 = vmatpush3.bf16.msra.mxu0 %v40_v11 }
  0x15   :  { %181 = vmatprep.subr.bf16.mxu0 %v223_v1 }
  0x18   :  { %182 = vmatpush3.bf16.msra.mxu0 %v41_v12 }
  0x19   :  { %183 = vmatprep.subr.bf16.mxu0 %v223_v1 }
  0x1c   :  { %184 = vmatpush3.bf16.msra.mxu0 %v42_v14 }
  0x1d   :  { %185 = vmatprep.subr.bf16.mxu0 %v223_v1 }
  0x20   :  { %186 = vmatpush3.bf16.msra.mxu0 %v43_v15 }
  0x23   :  { %188 = vmatmul.mubr.bf16.vlgmr.msra.gmra.mrb[0].mxu0 %v198_v16 }
  0x82   :  { %v110_v25 = vpop.permute.xlu0 %109 }
  0x86   :  { %v115_v30 = vpop.permute.xlu0 %114 }
  0xf6   :  { %v88_v18 = vpop.f32.mrb[0].mxu0 }
  0xf7   :  { %v95_v20 = vadd.f32 %v88_v18, %v44_v17  ;;  %v189_v21 = vpop.f32.mrb[1].mxu0 }
  0xf8   :  { %v91_v22 = vpop.f32.mrb[2].mxu0 }
  0xf9   :  { %98 = vst.msk [vmem:[#allocation2] sm:$0xff] %vm29_vm1, %v95_v20  ;;  %v96_v23 = vadd.f32 %v91_v22, %v45_v19  ;;  %v190_v24 = vpop.f32.mrb[3].mxu0 }
  0xfb   :  { %99 = vst.msk [vmem:[#allocation2 + $0x8] sm:$0xff] %vm29_vm1, %v96_v23 }
 0x100   :  { %v103_v27 = vld [vmem:[#allocation2] sm:$0xff] }
 0x101   :  { %v117_v28 = vmul.f32 %v110_v25, %v103_v27 }
 0x102   :  { %v104_v31 = vld [vmem:[#allocation2 + $0x8] sm:$0xff] }
 0x103   :  { %v126_v32 = vmul.f32 %v160_v26, %v117_v28  ;;  %v118_v33 = vmul.f32 %v115_v30, %v104_v31 }
 0x105   :  { %v135_v35 = vadd.f32 %v161_v29, %v126_v32  ;;  %v127_v36 = vmul.f32 %v160_v26, %v118_v33 }
 0x107   :  { %v139_v38 = vadd.f32 %v137_v34, %v135_v35  ;;  %v136_v39 = vadd.f32 %v161_v29, %v127_v36 }
 0x109   :  { %141 = vst.msk [vmem:[#allocation3] sm:$0xff] %vm29_vm1, %v139_v38  ;;  %v140_v40 = vadd.f32 %v138_v37, %v136_v39 }
 0x10b   :  { %142 = vst.msk [vmem:[#allocation3 + $0x8] sm:$0xff] %vm29_vm1, %v140_v40 }
 0x10c   :  { %210 = shalt.err (!%p207_p4)
}
 0x10d   :  { %s211_s19 = scalar_lea.hbm %s321_s6, 256 }
 0x10e   :  { %p212_p5 = scmp.ne.s32.totalorder %s321_s6, %s211_s19  ;;  %p215_p6 = scmp.lt.u32.totalorder %s211_s19, %s321_s6 }
 0x110   :  { %p217_p7 = pnand %p215_p6, %p212_p5 }
 0x112   :  { %220 = shalt.err (!%p217_p7)
}
 0x113   :  { %s227_s23 = smov 128   ;;  %s228_s24 = smov 8  }
 0x114   :  { %154 = dma.vmem_to_hbm [thread:$0]  %s149_s15, 256, %s321_s6, [#allocation4], %s227_s23, %s227_s23, %s228_s24  }
 0x115   :  { %221 = dma.done.wait [#allocation4], 256  }
 0x116   :  { %222 = vsyncadd [#allocation4], 4294967040 }
 0x117   :  { %158 = vsyncpa [#allocation4], 1 }

</bundles_post_ra>
